<compile_context>
chip_gen: v7x
topology: tpu7x:2x2x1
jax: 0.10.0
libtpu: 0.0.40
codegen_flags: <defaults>
</compile_context>

<pallas_src>
import functools

import jax
import jax.numpy as jnp
from jax.experimental import pallas as pl
from jax.experimental.pallas import tpu as pltpu

_EPS = 1e-5

# ----------------------------- chip-aware sizing ----------------------------------
try:
    _VMEM_CAP = int(pltpu.get_tpu_info().vmem_capacity_bytes)
except Exception:  # pragma: no cover - fallback when query is unavailable
    _VMEM_CAP = 64 * 1024 * 1024
_VMEM_LIMIT = min(96 * 1024 * 1024, (_VMEM_CAP * 3) // 4)   # 48 MiB on v7x, 96 MiB on v5e/v6e
_BIG_VMEM = _VMEM_CAP >= 100 * 1024 * 1024

_TM = 512 if _BIG_VMEM else 256       # M (row) tile preference
_TN = 1024 if _BIG_VMEM else 512      # N (output-column) tile preference
_TK = 1024 if _BIG_VMEM else 512      # K / hidden reduction tile preference


def _cap_tile(dim, pref):
    """Row/column tile: full dim if small, else the fixed preference (cdiv grid)."""
    return dim if dim <= pref else pref


def _div_tile(dim, pref):
    """Reduction tile: largest multiple of 128 <= pref that divides dim, else dim."""
    if dim <= pref:
        return dim
    t = pref
    while t >= 128:
        if dim % t == 0:
            return t
        t -= 128
    return dim


def _cparams(sem):
    return pltpu.CompilerParams(dimension_semantics=sem,
                                vmem_limit_bytes=_VMEM_LIMIT)


def _gelu_exact(y):
    # exact (erf) GELU, matching nn.GELU(approximate='none'); computed in f32
    return 0.5 * y * (1.0 + jax.lax.erf(y * 0.7071067811865476))


def _head_group(n_head, hd):
    """Smallest head-group size g (dividing n_head) with 128-lane-aligned width."""
    for g in range(1, n_head + 1):
        if n_head % g == 0 and (g * hd) % 128 == 0:
            return g
    return n_head


# --------------------- fused LayerNorm + Linear (xn @ wT + b) ---------------------
def _ln_linear_kernel(*refs, eps, has_bias):
    if has_bias:
        x_ref, lnw_ref, lnb_ref, wT_ref, b_ref, o_ref, xn_scr = refs
    else:
        x_ref, lnw_ref, lnb_ref, wT_ref, o_ref, xn_scr = refs
        b_ref = None

    # LayerNorm computed once per M tile (hoisted out of the N-tile loop).
    @pl.when(pl.program_id(1) == 0)
    def _():
        x = x_ref[...].astype(jnp.float32)          # LayerNorm.forward casts to float
        mu = jnp.mean(x, axis=-1, keepdims=True)
        var = jnp.mean(jnp.square(x - mu), axis=-1, keepdims=True)
        xn = (x - mu) * jax.lax.rsqrt(var + eps) * lnw_ref[...] + lnb_ref[...]
        xn_scr[...] = xn.astype(xn_scr.dtype)        # bf16, matches torch-half LN output

    y = jnp.dot(xn_scr[...], wT_ref[...], preferred_element_type=jnp.float32)
    if has_bias:
        y = y + b_ref[...]
    o_ref[...] = y.astype(o_ref.dtype)


def ln_linear(x2d, ln_w, ln_b, wT, b=None, out_dtype=None, eps=_EPS,
              tm_pref=None, weight_multibuffer=False):
    M, D = x2d.shape
    N = wT.shape[1]
    out_dtype = out_dtype or x2d.dtype
    tm = _cap_tile(M, tm_pref or _TM)
    tn = _cap_tile(N, _TN)
    gm, gn = pl.cdiv(M, tm), pl.cdiv(N, tn)
    has_bias = b is not None

    w_map = lambda i, j: (0, j)
    if weight_multibuffer and gn >= 3 and hasattr(pl, "Buffered"):
        w_spec = pl.BlockSpec((D, tn), w_map, pipeline_mode=pl.Buffered(3))
    else:
        w_spec = pl.BlockSpec((D, tn), w_map)

    in_specs = [
        pl.BlockSpec((tm, D), lambda i, j: (i, 0)),
        pl.BlockSpec((1, D), lambda i, j: (0, 0)),
        pl.BlockSpec((1, D), lambda i, j: (0, 0)),
        w_spec,
    ]
    args = [x2d, ln_w.reshape(1, D), ln_b.reshape(1, D), wT]
    if has_bias:
        in_specs.append(pl.BlockSpec((1, tn), lambda i, j: (0, j)))
        args.append(b.reshape(1, N))

    return pl.pallas_call(
        functools.partial(_ln_linear_kernel, eps=eps, has_bias=has_bias),
        out_shape=jax.ShapeDtypeStruct((M, N), out_dtype),
        grid=(gm, gn),
        in_specs=in_specs,
        out_specs=pl.BlockSpec((tm, tn), lambda i, j: (i, j)),
        scratch_shapes=[pltpu.VMEM((tm, D), wT.dtype)],
        compiler_params=_cparams(("parallel", "arbitrary")),
    )(*args)


# --------------------------- tiled Linear (K-accumulated) -------------------------
def _linear_kernel(*refs, has_bias):
    if has_bias:
        x_ref, wT_ref, b_ref, o_ref, acc_ref = refs
    else:
        x_ref, wT_ref, o_ref, acc_ref = refs
        b_ref = None
    k = pl.program_id(2)

    @pl.when(k == 0)
    def _():
        acc_ref[...] = jnp.zeros_like(acc_ref)

    acc_ref[...] += jnp.dot(x_ref[...], wT_ref[...],
                            preferred_element_type=jnp.float32)

    @pl.when(k == pl.num_programs(2) - 1)
    def _():
        y = acc_ref[...]
        if has_bias:
            y = y + b_ref[...]
        o_ref[...] = y.astype(o_ref.dtype)


def linear(x2d, wT, b=None, out_dtype=None):
    M, K = x2d.shape
    N = wT.shape[1]
    out_dtype = out_dtype or x2d.dtype
    tm = _cap_tile(M, _TM)
    tn = _cap_tile(N, _TN)
    tk = _div_tile(K, _TK)                       # exact divisor -> exact accumulation
    has_bias = b is not None
    in_specs = [
        pl.BlockSpec((tm, tk), lambda i, j, k: (i, k)),
        pl.BlockSpec((tk, tn), lambda i, j, k: (k, j)),
    ]
    args = [x2d, wT]
    if has_bias:
        in_specs.append(pl.BlockSpec((1, tn), lambda i, j, k: (0, j)))
        args.append(b.reshape(1, N))
    return pl.pallas_call(
        functools.partial(_linear_kernel, has_bias=has_bias),
        out_shape=jax.ShapeDtypeStruct((M, N), out_dtype),
        grid=(pl.cdiv(M, tm), pl.cdiv(N, tn), K // tk),
        in_specs=in_specs,
        out_specs=pl.BlockSpec((tm, tn), lambda i, j, k: (i, j)),
        scratch_shapes=[pltpu.VMEM((tm, tn), jnp.float32)],
        compiler_params=_cparams(("parallel", "parallel", "arbitrary")),
    )(*args)


# ------------------ fused LayerNorm + MLP(GELU) + residual kernel -----------------
def _ln_mlp_kernel(h_ref, lnw_ref, lnb_ref, w1T_ref, b1_ref, w2T_ref, b2_ref,
                   o_ref, xn_scr, acc_scr, *, eps):
    k = pl.program_id(1)

    @pl.when(k == 0)
    def _():
        x = h_ref[...].astype(jnp.float32)
        mu = jnp.mean(x, axis=-1, keepdims=True)
        var = jnp.mean(jnp.square(x - mu), axis=-1, keepdims=True)
        xn = (x - mu) * jax.lax.rsqrt(var + eps) * lnw_ref[...] + lnb_ref[...]
        xn_scr[...] = xn.astype(xn_scr.dtype)
        acc_scr[...] = x + b2_ref[...]            # residual + final bias (f32)

    u = jnp.dot(xn_scr[...], w1T_ref[...], preferred_element_type=jnp.float32)
    u = _gelu_exact(u + b1_ref[...])
    acc_scr[...] += jnp.dot(u.astype(w2T_ref.dtype), w2T_ref[...],
                            preferred_element_type=jnp.float32)

    @pl.when(k == pl.num_programs(1) - 1)
    def _():
        o_ref[...] = acc_scr[...].astype(o_ref.dtype)


def ln_mlp(h2d, ln_w, ln_b, w1T, b1, w2T, b2, eps=_EPS):
    M, D = h2d.shape
    H = w1T.shape[1]
    tm = _cap_tile(M, _TM)
    th = _div_tile(H, _TK)                       # hidden axis is a reduction: exact tiles
    return pl.pallas_call(
        functools.partial(_ln_mlp_kernel, eps=eps),
        out_shape=jax.ShapeDtypeStruct((M, D), h2d.dtype),
        grid=(pl.cdiv(M, tm), H // th),
        in_specs=[
            pl.BlockSpec((tm, D), lambda i, k: (i, 0)),
            pl.BlockSpec((1, D), lambda i, k: (0, 0)),
            pl.BlockSpec((1, D), lambda i, k: (0, 0)),
            pl.BlockSpec((D, th), lambda i, k: (0, k)),
            pl.BlockSpec((1, th), lambda i, k: (0, k)),
            pl.BlockSpec((th, D), lambda i, k: (k, 0)),
            pl.BlockSpec((1, D), lambda i, k: (0, 0)),
        ],
        out_specs=pl.BlockSpec((tm, D), lambda i, k: (i, 0)),
        scratch_shapes=[pltpu.VMEM((tm, D), w1T.dtype),
                        pltpu.VMEM((tm, D), jnp.float32)],
        compiler_params=_cparams(("parallel", "arbitrary")),
    )(h2d, ln_w.reshape(1, D), ln_b.reshape(1, D), w1T, b1.reshape(1, H),
      w2T, b2.reshape(1, D))


# -------------- fused self-attention + out-projection + residual ------------------
def _self_attn_kernel(qkv_ref, mask_ref, woT_ref, wob_ref, res_ref, o_ref,
                      *, n_head, hd, scale):
    D = n_head * hd
    wv_heads = []
    for h in range(n_head):
        q = qkv_ref[:, h * hd:(h + 1) * hd] * scale
        k = qkv_ref[:, D + h * hd:D + (h + 1) * hd]
        v = qkv_ref[:, 2 * D + h * hd:2 * D + (h + 1) * hd]
        s = jax.lax.dot_general(q, k, (((1,), (1,)), ((), ())),
                                preferred_element_type=jnp.float32)
        s = s + mask_ref[...]
        s = s - jnp.max(s, axis=-1, keepdims=True)
        p = jnp.exp(s)
        denom = jnp.sum(p, axis=-1, keepdims=True)
        wv = jnp.dot(p.astype(v.dtype), v, preferred_element_type=jnp.float32)
        wv = wv * pl.reciprocal(denom, approx=True)
        wv_heads.append(wv.astype(qkv_ref.dtype))
    # Single K=D out-projection (full MXU depth) + bias + residual, all heads at once.
    wv_all = jnp.concatenate(wv_heads, axis=-1)                       # (T, D)
    y = res_ref[...].astype(jnp.float32) + wob_ref[...]
    y = y + jnp.dot(wv_all, woT_ref[...], preferred_element_type=jnp.float32)
    o_ref[...] = y.astype(o_ref.dtype)


def self_attention(qkv, mask, woT, wob, res, n_head):
    """qkv:(B,T,3D)  mask:(T,T)  woT:(D,D)  wob:(D,)  res:(B,T,D) -> (B,T,D)."""
    B, T, threeD = qkv.shape
    D = threeD // 3
    hd = D // n_head
    scale = float(hd) ** -0.5
    return pl.pallas_call(
        functools.partial(_self_attn_kernel, n_head=n_head, hd=hd, scale=scale),
        out_shape=jax.ShapeDtypeStruct((B, T, D), res.dtype),
        grid=(B,),
        in_specs=[
            pl.BlockSpec((None, T, threeD), lambda b: (b, 0, 0)),
            pl.BlockSpec((T, T), lambda b: (0, 0)),
            pl.BlockSpec((D, D), lambda b: (0, 0)),
            pl.BlockSpec((1, D), lambda b: (0, 0)),
            pl.BlockSpec((None, T, D), lambda b: (b, 0, 0)),
        ],
        out_specs=pl.BlockSpec((None, T, D), lambda b: (b, 0, 0)),
        compiler_params=_cparams(("parallel",)),
    )(qkv, mask, woT, wob.reshape(1, D), res)


# ------- fused cross-attention (head-group tiled KV) + out-proj + residual --------
def _cross_attn_kernel(q_ref, kv_ref, woT_ref, wob_ref, res_ref, o_ref, acc_scr,
                       *, heads_per_grp, hd, scale):
    g = pl.program_id(1)
    W = heads_per_grp * hd

    @pl.when(g == 0)
    def _():
        acc_scr[...] = res_ref[...].astype(jnp.float32) + wob_ref[...]

    wv_grp = []
    for j in range(heads_per_grp):
        q = q_ref[:, j * hd:(j + 1) * hd] * scale
        k = kv_ref[:, j * hd:(j + 1) * hd]
        v = kv_ref[:, W + j * hd:W + (j + 1) * hd]
        s = jax.lax.dot_general(q, k, (((1,), (1,)), ((), ())),
                                preferred_element_type=jnp.float32)
        s = s - jnp.max(s, axis=-1, keepdims=True)
        p = jnp.exp(s)
        denom = jnp.sum(p, axis=-1, keepdims=True)
        wv = jnp.dot(p.astype(v.dtype), v, preferred_element_type=jnp.float32)
        wv = wv * pl.reciprocal(denom, approx=True)
        wv_grp.append(wv.astype(woT_ref.dtype))
    # One out-projection per (128-lane aligned) head group, accumulated across groups.
    wv_grp = jnp.concatenate(wv_grp, axis=-1)                         # (T, W)
    acc_scr[...] += jnp.dot(wv_grp, woT_ref[...],
                            preferred_element_type=jnp.float32)

    @pl.when(g == pl.num_programs(1) - 1)
    def _():
        o_ref[...] = acc_scr[...].astype(o_ref.dtype)


def cross_attention(q, kv, woT, wob, res, n_head, heads_per_grp):
    """q:(B,T,D)  kv:(B,Ta,2D) per-group layout  woT:(D,D)  res:(B,T,D) -> (B,T,D)."""
    B, T, D = q.shape
    Ta = kv.shape[1]
    hd = D // n_head
    W = heads_per_grp * hd
    n_grp = n_head // heads_per_grp
    scale = float(hd) ** -0.5
    return pl.pallas_call(
        functools.partial(_cross_attn_kernel, heads_per_grp=heads_per_grp,
                          hd=hd, scale=scale),
        out_shape=jax.ShapeDtypeStruct((B, T, D), res.dtype),
        grid=(B, n_grp),
        in_specs=[
            pl.BlockSpec((None, T, W), lambda b, g: (b, 0, g)),
            pl.BlockSpec((None, Ta, 2 * W), lambda b, g: (b, 0, g)),
            pl.BlockSpec((W, D), lambda b, g: (g, 0)),
            pl.BlockSpec((1, D), lambda b, g: (0, 0)),
            pl.BlockSpec((None, T, D), lambda b, g: (b, 0, 0)),
        ],
        out_specs=pl.BlockSpec((None, T, D), lambda b, g: (b, 0, 0)),
        scratch_shapes=[pltpu.VMEM((T, D), jnp.float32)],
        compiler_params=_cparams(("parallel", "arbitrary")),
    )(q, kv, woT, wob.reshape(1, D), res)


# ---------------------------------- parameters -----------------------------------
def init_params(key, n_vocab, n_ctx, n_state, n_layer):
    D, M = n_state, 4 * n_state

    def nrm(k, shape, std=0.02):
        return (std * jax.random.normal(k, shape)).astype(jnp.float32)

    keys = jax.random.split(key, 2 + n_layer)
    params = {
        "tok_emb": nrm(keys[0], (n_vocab, D)),
        "pos_emb": nrm(keys[1], (n_ctx, D)),
        "ln_w": jnp.ones((D,), jnp.float32),
        "ln_b": jnp.zeros((D,), jnp.float32),
        "blocks": [],
    }
    for l in range(n_layer):
        bk = jax.random.split(keys[2 + l], 16)
        blk = {
            "attn_ln_w": jnp.ones((D,), jnp.float32), "attn_ln_b": jnp.zeros((D,), jnp.float32),
            "attn_q_w": nrm(bk[0], (D, D)), "attn_q_b": nrm(bk[1], (D,)),
            "attn_k_w": nrm(bk[2], (D, D)),                          # key: bias=False
            "attn_v_w": nrm(bk[3], (D, D)), "attn_v_b": nrm(bk[4], (D,)),
            "attn_o_w": nrm(bk[5], (D, D)), "attn_o_b": nrm(bk[6], (D,)),
            "cross_ln_w": jnp.ones((D,), jnp.float32), "cross_ln_b": jnp.zeros((D,), jnp.float32),
            "cross_q_w": nrm(bk[7], (D, D)), "cross_q_b": nrm(bk[8], (D,)),
            "cross_k_w": nrm(bk[9], (D, D)),                         # key: bias=False
            "cross_v_w": nrm(bk[10], (D, D)), "cross_v_b": nrm(bk[11], (D,)),
            "cross_o_w": nrm(bk[12], (D, D)), "cross_o_b": nrm(bk[13], (D,)),
            "mlp_ln_w": jnp.ones((D,), jnp.float32), "mlp_ln_b": jnp.zeros((D,), jnp.float32),
            "mlp1_w": nrm(bk[14], (M, D)), "mlp1_b": jnp.zeros((M,), jnp.float32),
            "mlp2_w": nrm(bk[15], (D, M)), "mlp2_b": jnp.zeros((D,), jnp.float32),
        }
        params["blocks"].append(blk)
    return params


def prepare_params(params, n_head, compute_dtype=jnp.bfloat16):
    """One-time weight prep: (D_in, D_out) transpose, bf16 cast, fused QKV,
    per-head-group [K_g | V_g] cross-KV layout."""
    D = params["tok_emb"].shape[1]
    hd = D // n_head
    G = _head_group(n_head, hd)
    W = G * hd
    n_grp = n_head // G
    zero = jnp.zeros((D,), jnp.float32)
    cd = compute_dtype

    prepped = {
        "tok_emb": params["tok_emb"],
        "pos_emb": params["pos_emb"],
        "ln_w": params["ln_w"], "ln_b": params["ln_b"],
        "logits_wT": params["tok_emb"].T.astype(cd),      # (D, n_vocab), tied weights
        "blocks": [],
    }
    for blk in params["blocks"]:
        ckT, cvT, cvb = blk["cross_k_w"].T, blk["cross_v_w"].T, blk["cross_v_b"]
        kv_cols, kv_bias = [], []
        for g in range(n_grp):
            kv_cols += [ckT[:, g * W:(g + 1) * W], cvT[:, g * W:(g + 1) * W]]
            kv_bias += [jnp.zeros((W,), jnp.float32), cvb[g * W:(g + 1) * W]]
        prepped["blocks"].append({
            "attn_ln_w": blk["attn_ln_w"], "attn_ln_b": blk["attn_ln_b"],
            "attn_qkv_wT": jnp.concatenate(
                [blk["attn_q_w"].T, blk["attn_k_w"].T, blk["attn_v_w"].T], axis=1).astype(cd),
            "attn_qkv_b": jnp.concatenate([blk["attn_q_b"], zero, blk["attn_v_b"]]),
            "attn_o_wT": blk["attn_o_w"].T.astype(cd), "attn_o_b": blk["attn_o_b"],
            "cross_ln_w": blk["cross_ln_w"], "cross_ln_b": blk["cross_ln_b"],
            "cross_q_wT": blk["cross_q_w"].T.astype(cd), "cross_q_b": blk["cross_q_b"],
            "cross_kv_wT": jnp.concatenate(kv_cols, axis=1).astype(cd),
            "cross_kv_b": jnp.concatenate(kv_bias),
            "cross_o_wT": blk["cross_o_w"].T.astype(cd), "cross_o_b": blk["cross_o_b"],
            "mlp_ln_w": blk["mlp_ln_w"], "mlp_ln_b": blk["mlp_ln_b"],
            "mlp1_wT": blk["mlp1_w"].T.astype(cd), "mlp1_b": blk["mlp1_b"],
            "mlp2_wT": blk["mlp2_w"].T.astype(cd), "mlp2_b": blk["mlp2_b"],
        })
    return prepped


# ---------------------------------- TextDecoder -----------------------------------
def text_decoder_forward(params, x_tokens, xa, causal_mask, *, n_head,
                         compute_dtype=jnp.bfloat16):
    """x_tokens: (B, T) int32 ; xa: (B, Ta, D) -> logits (B, T, n_vocab) float32."""
    B, T = x_tokens.shape
    D = params["tok_emb"].shape[1]
    Ta = xa.shape[1]
    hd = D // n_head
    G = _head_group(n_head, hd)

    # token embedding + positional embedding (offset=0, no kv_cache) -- glue
    h = (params["tok_emb"][x_tokens] + params["pos_emb"][:T]).astype(compute_dtype)
    xa2 = xa.reshape(B * Ta, D).astype(compute_dtype)
    cmask = causal_mask[:T, :T].astype(jnp.float32)

    for blk in params["blocks"]:
        # ---- self attention: LN + fused QKV proj, then attn + O-proj + residual ----
        qkv = ln_linear(h.reshape(B * T, D), blk["attn_ln_w"], blk["attn_ln_b"],
                        blk["attn_qkv_wT"], blk["attn_qkv_b"])
        h = self_attention(qkv.reshape(B, T, 3 * D), cmask,
                           blk["attn_o_wT"], blk["attn_o_b"], h, n_head)

        # ---- cross attention (keys/values from audio features, no mask) ----
        q = ln_linear(h.reshape(B * T, D), blk["cross_ln_w"], blk["cross_ln_b"],
                      blk["cross_q_wT"], blk["cross_q_b"])
        kv = linear(xa2, blk["cross_kv_wT"], blk["cross_kv_b"])
        h = cross_attention(q.reshape(B, T, D), kv.reshape(B, Ta, 2 * D),
                            blk["cross_o_wT"], blk["cross_o_b"], h, n_head, G)

        # ---- MLP: LN + Linear + GELU + Linear + residual in one kernel ----
        h = ln_mlp(h.reshape(B * T, D), blk["mlp_ln_w"], blk["mlp_ln_b"],
                   blk["mlp1_wT"], blk["mlp1_b"],
                   blk["mlp2_wT"], blk["mlp2_b"]).reshape(B, T, D)

    # final LN + tied-embedding logits, tiled over vocab, f32 output: (x @ tok_emb.T).float()
    logits = ln_linear(h.reshape(B * T, D), params["ln_w"], params["ln_b"],
                       params["logits_wT"], None, out_dtype=jnp.float32,
                       tm_pref=1024, weight_multibuffer=True)
    return logits.reshape(B, T, -1)


if __name__ == "__main__":
    n_vocab, n_ctx, n_state, n_head, n_layer = 256, 16, 128, 4, 2
    B, T, Ta = 2, 8, 16

    key = jax.random.PRNGKey(0)
    kp, kx, ka = jax.random.split(key, 3)

    params = init_params(kp, n_vocab, n_ctx, n_state, n_layer)
    prepped = prepare_params(params, n_head)

    x_tokens = jax.random.randint(kx, (B, T), 0, n_vocab, dtype=jnp.int32)
    xa = jax.random.normal(ka, (B, Ta, n_state), dtype=jnp.float32)

    # causal mask: -inf strictly above the diagonal, 0 elsewhere (TextDecoder.__init__)
    tri = jnp.triu(jnp.ones((n_ctx, n_ctx), jnp.float32), k=1)
    causal_mask = jnp.where(tri > 0, -jnp.inf, 0.0).astype(jnp.float32)

    fwd = jax.jit(functools.partial(text_decoder_forward, n_head=n_head))
    logits = jax.block_until_ready(fwd(prepped, x_tokens, xa, causal_mask))

    assert logits.shape == (B, T, n_vocab), logits.shape
    assert logits.dtype == jnp.float32
    assert bool(jnp.all(jnp.isfinite(logits)))
    print("KERNEL_OK")
</pallas_src>

<mosaic_0001>
module attributes {stable_mosaic.version = 11 : i64} {
  func.func @_ln_linear_kernel(%arg0: i32, %arg1: i32, %arg2: memref<16x128xbf16, #tpu.memory_space<vmem>>, %arg3: memref<1x128xf32, #tpu.memory_space<vmem>>, %arg4: memref<1x128xf32, #tpu.memory_space<vmem>>, %arg5: memref<128x128xbf16, #tpu.memory_space<vmem>>, %arg6: memref<1x128xf32, #tpu.memory_space<vmem>>, %arg7: memref<16x128xbf16, #tpu.memory_space<vmem>>, %arg8: memref<16x128xbf16, #tpu.memory_space<vmem>>) attributes {dimension_semantics = [#tpu.dimension_semantics<parallel>, #tpu.dimension_semantics<arbitrary>], iteration_bounds = array<i64: 1, 1>, scalar_prefetch = 0 : i64, scratch_operands = 1 : i64, tpu.core_type = #tpu.core_type<tc>, window_params = [{transform_indices = @transform_0, window_bounds = array<i64: 16, 128>}, {pipeline_mode = #tpu.pipeline_mode<synchronous>, transform_indices = @transform_1, window_bounds = array<i64: 1, 128>}, {pipeline_mode = #tpu.pipeline_mode<synchronous>, transform_indices = @transform_2, window_bounds = array<i64: 1, 128>}, {transform_indices = @transform_3, window_bounds = array<i64: 128, 128>}, {transform_indices = @transform_4, window_bounds = array<i64: 1, 128>}, {transform_indices = @transform_5, window_bounds = array<i64: 16, 128>}]} {
    %c0_i32 = arith.constant 0 : i32
    %0 = arith.cmpi eq, %arg1, %c0_i32 : i32
    %1 = arith.extui %0 : i1 to i32
    %c0_i32_0 = arith.constant 0 : i32
    %2 = arith.cmpi ne, %1, %c0_i32_0 : i32
    scf.if %2 {
      %c0_8 = arith.constant 0 : index
      %c0_9 = arith.constant 0 : index
      %11 = vector.load %arg2[%c0_8, %c0_9] : memref<16x128xbf16, #tpu.memory_space<vmem>>, vector<16x128xbf16>
      %12 = arith.extf %11 : vector<16x128xbf16> to vector<16x128xf32>
      %cst_10 = arith.constant dense<0.000000e+00> : vector<16xf32>
      %13 = vector.multi_reduction <add>, %12, %cst_10 [1] : vector<16x128xf32> to vector<16xf32>
      %14 = vector.shape_cast %13 : vector<16xf32> to vector<16x1xf32>
      %cst_11 = arith.constant 1.280000e+02 : f32
      %15 = vector.broadcast %cst_11 : f32 to vector<16x1xf32>
      %16 = arith.divf %14, %15 : vector<16x1xf32>
      %17 = vector.broadcast %16 : vector<16x1xf32> to vector<16x128xf32>
      %18 = arith.subf %12, %17 : vector<16x128xf32>
      %19 = arith.mulf %18, %18 : vector<16x128xf32>
      %cst_12 = arith.constant dense<0.000000e+00> : vector<16xf32>
      %20 = vector.multi_reduction <add>, %19, %cst_12 [1] : vector<16x128xf32> to vector<16xf32>
      %21 = vector.shape_cast %20 : vector<16xf32> to vector<16x1xf32>
      %cst_13 = arith.constant 1.280000e+02 : f32
      %22 = vector.broadcast %cst_13 : f32 to vector<16x1xf32>
      %23 = arith.divf %21, %22 : vector<16x1xf32>
      %24 = vector.broadcast %16 : vector<16x1xf32> to vector<16x128xf32>
      %25 = arith.subf %12, %24 : vector<16x128xf32>
      %cst_14 = arith.constant 9.99999974E-6 : f32
      %26 = vector.broadcast %cst_14 : f32 to vector<16x1xf32>
      %27 = arith.addf %23, %26 : vector<16x1xf32>
      %28 = math.rsqrt %27 : vector<16x1xf32>
      %29 = vector.broadcast %28 : vector<16x1xf32> to vector<16x128xf32>
      %30 = arith.mulf %25, %29 : vector<16x128xf32>
      %c0_15 = arith.constant 0 : index
      %c0_16 = arith.constant 0 : index
      %31 = vector.load %arg3[%c0_15, %c0_16] : memref<1x128xf32, #tpu.memory_space<vmem>>, vector<1x128xf32>
      %32 = vector.broadcast %31 : vector<1x128xf32> to vector<16x128xf32>
      %33 = arith.mulf %30, %32 : vector<16x128xf32>
      %c0_17 = arith.constant 0 : index
      %c0_18 = arith.constant 0 : index
      %34 = vector.load %arg4[%c0_17, %c0_18] : memref<1x128xf32, #tpu.memory_space<vmem>>, vector<1x128xf32>
      %35 = vector.broadcast %34 : vector<1x128xf32> to vector<16x128xf32>
      %36 = arith.addf %33, %35 : vector<16x128xf32>
      %37 = arith.truncf %36 : vector<16x128xf32> to vector<16x128xbf16>
      %c0_19 = arith.constant 0 : index
      %c0_20 = arith.constant 0 : index
      %38 = vector.load %arg8[%c0_19, %c0_20] : memref<16x128xbf16, #tpu.memory_space<vmem>>, vector<16x128xbf16>
      tpu.vector_store %arg8[%c0_19, %c0_20], %37 {strides = array<i32>} : memref<16x128xbf16, #tpu.memory_space<vmem>>, vector<16x128xbf16>,
    } else {
    }
    %c0 = arith.constant 0 : index
    %c0_1 = arith.constant 0 : index
    %3 = vector.load %arg8[%c0, %c0_1] : memref<16x128xbf16, #tpu.memory_space<vmem>>, vector<16x128xbf16>
    %c0_2 = arith.constant 0 : index
    %c0_3 = arith.constant 0 : index
    %4 = vector.load %arg5[%c0_2, %c0_3] : memref<128x128xbf16, #tpu.memory_space<vmem>>, vector<128x128xbf16>
    %cst = arith.constant dense<0.000000e+00> : vector<16x128xf32>
    %5 = tpu.matmul %3, %4, %cst {dimension_numbers = #tpu.dot_dimension_numbers<[1], [0], [0], [1], [0, 0, 1, 1], [], []>} : vector<16x128xbf16>, vector<128x128xbf16>, vector<16x128xf32> -> vector<16x128xf32>
    %c0_4 = arith.constant 0 : index
    %c0_5 = arith.constant 0 : index
    %6 = vector.load %arg6[%c0_4, %c0_5] : memref<1x128xf32, #tpu.memory_space<vmem>>, vector<1x128xf32>
    %7 = vector.broadcast %6 : vector<1x128xf32> to vector<16x128xf32>
    %8 = arith.addf %5, %7 : vector<16x128xf32>
    %9 = arith.truncf %8 : vector<16x128xf32> to vector<16x128xbf16>
    %c0_6 = arith.constant 0 : index
    %c0_7 = arith.constant 0 : index
    %10 = vector.load %arg7[%c0_6, %c0_7] : memref<16x128xbf16, #tpu.memory_space<vmem>>, vector<16x128xbf16>
    tpu.vector_store %arg7[%c0_6, %c0_7], %9 {strides = array<i32>} : memref<16x128xbf16, #tpu.memory_space<vmem>>, vector<16x128xbf16>,
    return
  }
  func.func @transform_0(%arg0: i32, %arg1: i32) -> (i32, i32) {
    %c0_i32 = arith.constant 0 : i32
    %c0_i32_0 = arith.constant 0 : i32
    return %arg0, %c0_i32 : i32, i32
  }
  func.func @transform_1(%arg0: i32, %arg1: i32) -> (i32, i32) {
    %c0_i32 = arith.constant 0 : i32
    %c0_i32_0 = arith.constant 0 : i32
    %c0_i32_1 = arith.constant 0 : i32
    return %c0_i32, %c0_i32_0 : i32, i32
  }
  func.func @transform_2(%arg0: i32, %arg1: i32) -> (i32, i32) {
    %c0_i32 = arith.constant 0 : i32
    %c0_i32_0 = arith.constant 0 : i32
    %c0_i32_1 = arith.constant 0 : i32
    return %c0_i32, %c0_i32_0 : i32, i32
  }
  func.func @transform_3(%arg0: i32, %arg1: i32) -> (i32, i32) {
    %c0_i32 = arith.constant 0 : i32
    %c0_i32_0 = arith.constant 0 : i32
    return %c0_i32, %arg1 : i32, i32
  }
  func.func @transform_4(%arg0: i32, %arg1: i32) -> (i32, i32) {
    %c0_i32 = arith.constant 0 : i32
    %c0_i32_0 = arith.constant 0 : i32
    return %c0_i32, %arg1 : i32, i32
  }
  func.func @transform_5(%arg0: i32, %arg1: i32) -> (i32, i32) {
    %c0_i32 = arith.constant 0 : i32
    return %arg0, %arg1 : i32, i32
  }
}

module attributes {stable_mosaic.version = 11 : i64} {
  func.func @_ln_linear_kernel(%arg0: i32, %arg1: i32, %arg2: memref<16x128xbf16, #tpu.memory_space<vmem>>, %arg3: memref<1x128xf32, #tpu.memory_space<vmem>>, %arg4: memref<1x128xf32, #tpu.memory_space<vmem>>, %arg5: memref<128x384xbf16, #tpu.memory_space<vmem>>, %arg6: memref<1x384xf32, #tpu.memory_space<vmem>>, %arg7: memref<16x384xbf16, #tpu.memory_space<vmem>>, %arg8: memref<16x128xbf16, #tpu.memory_space<vmem>>) attributes {dimension_semantics = [#tpu.dimension_semantics<parallel>, #tpu.dimension_semantics<arbitrary>], iteration_bounds = array<i64: 1, 1>, scalar_prefetch = 0 : i64, scratch_operands = 1 : i64, tpu.core_type = #tpu.core_type<tc>, window_params = [{transform_indices = @transform_0, window_bounds = array<i64: 16, 128>}, {pipeline_mode = #tpu.pipeline_mode<synchronous>, transform_indices = @transform_1, window_bounds = array<i64: 1, 128>}, {pipeline_mode = #tpu.pipeline_mode<synchronous>, transform_indices = @transform_2, window_bounds = array<i64: 1, 128>}, {transform_indices = @transform_3, window_bounds = array<i64: 128, 384>}, {transform_indices = @transform_4, window_bounds = array<i64: 1, 384>}, {transform_indices = @transform_5, window_bounds = array<i64: 16, 384>}]} {
    %c0_i32 = arith.constant 0 : i32
    %0 = arith.cmpi eq, %arg1, %c0_i32 : i32
    %1 = arith.extui %0 : i1 to i32
    %c0_i32_0 = arith.constant 0 : i32
    %2 = arith.cmpi ne, %1, %c0_i32_0 : i32
    scf.if %2 {
      %c0_8 = arith.constant 0 : index
      %c0_9 = arith.constant 0 : index
      %11 = vector.load %arg2[%c0_8, %c0_9] : memref<16x128xbf16, #tpu.memory_space<vmem>>, vector<16x128xbf16>
      %12 = arith.extf %11 : vector<16x128xbf16> to vector<16x128xf32>
      %cst_10 = arith.constant dense<0.000000e+00> : vector<16xf32>
      %13 = vector.multi_reduction <add>, %12, %cst_10 [1] : vector<16x128xf32> to vector<16xf32>
      %14 = vector.shape_cast %13 : vector<16xf32> to vector<16x1xf32>
      %cst_11 = arith.constant 1.280000e+02 : f32
      %15 = vector.broadcast %cst_11 : f32 to vector<16x1xf32>
      %16 = arith.divf %14, %15 : vector<16x1xf32>
      %17 = vector.broadcast %16 : vector<16x1xf32> to vector<16x128xf32>
      %18 = arith.subf %12, %17 : vector<16x128xf32>
      %19 = arith.mulf %18, %18 : vector<16x128xf32>
      %cst_12 = arith.constant dense<0.000000e+00> : vector<16xf32>
      %20 = vector.multi_reduction <add>, %19, %cst_12 [1] : vector<16x128xf32> to vector<16xf32>
      %21 = vector.shape_cast %20 : vector<16xf32> to vector<16x1xf32>
      %cst_13 = arith.constant 1.280000e+02 : f32
      %22 = vector.broadcast %cst_13 : f32 to vector<16x1xf32>
      %23 = arith.divf %21, %22 : vector<16x1xf32>
      %24 = vector.broadcast %16 : vector<16x1xf32> to vector<16x128xf32>
      %25 = arith.subf %12, %24 : vector<16x128xf32>
      %cst_14 = arith.constant 9.99999974E-6 : f32
      %26 = vector.broadcast %cst_14 : f32 to vector<16x1xf32>
      %27 = arith.addf %23, %26 : vector<16x1xf32>
      %28 = math.rsqrt %27 : vector<16x1xf32>
      %29 = vector.broadcast %28 : vector<16x1xf32> to vector<16x128xf32>
      %30 = arith.mulf %25, %29 : vector<16x128xf32>
      %c0_15 = arith.constant 0 : index
      %c0_16 = arith.constant 0 : index
      %31 = vector.load %arg3[%c0_15, %c0_16] : memref<1x128xf32, #tpu.memory_space<vmem>>, vector<1x128xf32>
      %32 = vector.broadcast %31 : vector<1x128xf32> to vector<16x128xf32>
      %33 = arith.mulf %30, %32 : vector<16x128xf32>
      %c0_17 = arith.constant 0 : index
      %c0_18 = arith.constant 0 : index
      %34 = vector.load %arg4[%c0_17, %c0_18] : memref<1x128xf32, #tpu.memory_space<vmem>>, vector<1x128xf32>
      %35 = vector.broadcast %34 : vector<1x128xf32> to vector<16x128xf32>
      %36 = arith.addf %33, %35 : vector<16x128xf32>
      %37 = arith.truncf %36 : vector<16x128xf32> to vector<16x128xbf16>
      %c0_19 = arith.constant 0 : index
      %c0_20 = arith.constant 0 : index
      %38 = vector.load %arg8[%c0_19, %c0_20] : memref<16x128xbf16, #tpu.memory_space<vmem>>, vector<16x128xbf16>
      tpu.vector_store %arg8[%c0_19, %c0_20], %37 {strides = array<i32>} : memref<16x128xbf16, #tpu.memory_space<vmem>>, vector<16x128xbf16>,
    } else {
    }
    %c0 = arith.constant 0 : index
    %c0_1 = arith.constant 0 : index
    %3 = vector.load %arg8[%c0, %c0_1] : memref<16x128xbf16, #tpu.memory_space<vmem>>, vector<16x128xbf16>
    %c0_2 = arith.constant 0 : index
    %c0_3 = arith.constant 0 : index
    %4 = vector.load %arg5[%c0_2, %c0_3] : memref<128x384xbf16, #tpu.memory_space<vmem>>, vector<128x384xbf16>
    %cst = arith.constant dense<0.000000e+00> : vector<16x384xf32>
    %5 = tpu.matmul %3, %4, %cst {dimension_numbers = #tpu.dot_dimension_numbers<[1], [0], [0], [1], [0, 0, 1, 1], [], []>} : vector<16x128xbf16>, vector<128x384xbf16>, vector<16x384xf32> -> vector<16x384xf32>
    %c0_4 = arith.constant 0 : index
    %c0_5 = arith.constant 0 : index
    %6 = vector.load %arg6[%c0_4, %c0_5] : memref<1x384xf32, #tpu.memory_space<vmem>>, vector<1x384xf32>
    %7 = vector.broadcast %6 : vector<1x384xf32> to vector<16x384xf32>
    %8 = arith.addf %5, %7 : vector<16x384xf32>
    %9 = arith.truncf %8 : vector<16x384xf32> to vector<16x384xbf16>
    %c0_6 = arith.constant 0 : index
    %c0_7 = arith.constant 0 : index
    %10 = vector.load %arg7[%c0_6, %c0_7] : memref<16x384xbf16, #tpu.memory_space<vmem>>, vector<16x384xbf16>
    tpu.vector_store %arg7[%c0_6, %c0_7], %9 {strides = array<i32>} : memref<16x384xbf16, #tpu.memory_space<vmem>>, vector<16x384xbf16>,
    return
  }
  func.func @transform_0(%arg0: i32, %arg1: i32) -> (i32, i32) {
    %c0_i32 = arith.constant 0 : i32
    %c0_i32_0 = arith.constant 0 : i32
    return %arg0, %c0_i32 : i32, i32
  }
  func.func @transform_1(%arg0: i32, %arg1: i32) -> (i32, i32) {
    %c0_i32 = arith.constant 0 : i32
    %c0_i32_0 = arith.constant 0 : i32
    %c0_i32_1 = arith.constant 0 : i32
    return %c0_i32, %c0_i32_0 : i32, i32
  }
  func.func @transform_2(%arg0: i32, %arg1: i32) -> (i32, i32) {
    %c0_i32 = arith.constant 0 : i32
    %c0_i32_0 = arith.constant 0 : i32
    %c0_i32_1 = arith.constant 0 : i32
    return %c0_i32, %c0_i32_0 : i32, i32
  }
  func.func @transform_3(%arg0: i32, %arg1: i32) -> (i32, i32) {
    %c0_i32 = arith.constant 0 : i32
    %c0_i32_0 = arith.constant 0 : i32
    return %c0_i32, %arg1 : i32, i32
  }
  func.func @transform_4(%arg0: i32, %arg1: i32) -> (i32, i32) {
    %c0_i32 = arith.constant 0 : i32
    %c0_i32_0 = arith.constant 0 : i32
    return %c0_i32, %arg1 : i32, i32
  }
  func.func @transform_5(%arg0: i32, %arg1: i32) -> (i32, i32) {
    %c0_i32 = arith.constant 0 : i32
    return %arg0, %arg1 : i32, i32
  }
}

module attributes {stable_mosaic.version = 11 : i64} {
  func.func @_linear_kernel(%arg0: i32, %arg1: i32, %arg2: i32, %arg3: memref<32x128xbf16, #tpu.memory_space<vmem>>, %arg4: memref<128x256xbf16, #tpu.memory_space<vmem>>, %arg5: memref<1x256xf32, #tpu.memory_space<vmem>>, %arg6: memref<32x256xbf16, #tpu.memory_space<vmem>>, %arg7: memref<32x256xf32, #tpu.memory_space<vmem>>) attributes {dimension_semantics = [#tpu.dimension_semantics<parallel>, #tpu.dimension_semantics<parallel>, #tpu.dimension_semantics<arbitrary>], iteration_bounds = array<i64: 1, 1, 1>, scalar_prefetch = 0 : i64, scratch_operands = 1 : i64, tpu.core_type = #tpu.core_type<tc>, window_params = [{transform_indices = @transform_0, window_bounds = array<i64: 32, 128>}, {transform_indices = @transform_1, window_bounds = array<i64: 128, 256>}, {transform_indices = @transform_2, window_bounds = array<i64: 1, 256>}, {transform_indices = @transform_3, window_bounds = array<i64: 32, 256>}]} {
    %c0_i32 = arith.constant 0 : i32
    %0 = arith.cmpi eq, %arg2, %c0_i32 : i32
    %1 = arith.extui %0 : i1 to i32
    %c0_i32_0 = arith.constant 0 : i32
    %2 = arith.cmpi ne, %1, %c0_i32_0 : i32
    scf.if %2 {
      %cst_10 = arith.constant 0.000000e+00 : f32
      %12 = vector.broadcast %cst_10 : f32 to vector<32x256xf32>
      %c0_11 = arith.constant 0 : index
      %c0_12 = arith.constant 0 : index
      %13 = vector.load %arg7[%c0_11, %c0_12] : memref<32x256xf32, #tpu.memory_space<vmem>>, vector<32x256xf32>
      tpu.vector_store %arg7[%c0_11, %c0_12], %12 {strides = array<i32>} : memref<32x256xf32, #tpu.memory_space<vmem>>, vector<32x256xf32>,
    } else {
    }
    %c0 = arith.constant 0 : index
    %c0_1 = arith.constant 0 : index
    %3 = vector.load %arg7[%c0, %c0_1] : memref<32x256xf32, #tpu.memory_space<vmem>>, vector<32x256xf32>
    %c0_2 = arith.constant 0 : index
    %c0_3 = arith.constant 0 : index
    %4 = vector.load %arg3[%c0_2, %c0_3] : memref<32x128xbf16, #tpu.memory_space<vmem>>, vector<32x128xbf16>
    %c0_4 = arith.constant 0 : index
    %c0_5 = arith.constant 0 : index
    %5 = vector.load %arg4[%c0_4, %c0_5] : memref<128x256xbf16, #tpu.memory_space<vmem>>, vector<128x256xbf16>
    %cst = arith.constant dense<0.000000e+00> : vector<32x256xf32>
    %6 = tpu.matmul %4, %5, %cst {dimension_numbers = #tpu.dot_dimension_numbers<[1], [0], [0], [1], [0, 0, 1, 1], [], []>} : vector<32x128xbf16>, vector<128x256xbf16>, vector<32x256xf32> -> vector<32x256xf32>
    %7 = arith.addf %3, %6 : vector<32x256xf32>
    %c0_6 = arith.constant 0 : index
    %c0_7 = arith.constant 0 : index
    %8 = vector.load %arg7[%c0_6, %c0_7] : memref<32x256xf32, #tpu.memory_space<vmem>>, vector<32x256xf32>
    tpu.vector_store %arg7[%c0_6, %c0_7], %7 {strides = array<i32>} : memref<32x256xf32, #tpu.memory_space<vmem>>, vector<32x256xf32>,
    %c0_i32_8 = arith.constant 0 : i32
    %9 = arith.cmpi eq, %arg2, %c0_i32_8 : i32
    %10 = arith.extui %9 : i1 to i32
    %c0_i32_9 = arith.constant 0 : i32
    %11 = arith.cmpi ne, %10, %c0_i32_9 : i32
    scf.if %11 {
      %c0_10 = arith.constant 0 : index
      %c0_11 = arith.constant 0 : index
      %12 = vector.load %arg7[%c0_10, %c0_11] : memref<32x256xf32, #tpu.memory_space<vmem>>, vector<32x256xf32>
      %c0_12 = arith.constant 0 : index
      %c0_13 = arith.constant 0 : index
      %13 = vector.load %arg5[%c0_12, %c0_13] : memref<1x256xf32, #tpu.memory_space<vmem>>, vector<1x256xf32>
      %14 = vector.broadcast %13 : vector<1x256xf32> to vector<32x256xf32>
      %15 = arith.addf %12, %14 : vector<32x256xf32>
      %16 = arith.truncf %15 : vector<32x256xf32> to vector<32x256xbf16>
      %c0_14 = arith.constant 0 : index
      %c0_15 = arith.constant 0 : index
      %17 = vector.load %arg6[%c0_14, %c0_15] : memref<32x256xbf16, #tpu.memory_space<vmem>>, vector<32x256xbf16>
      tpu.vector_store %arg6[%c0_14, %c0_15], %16 {strides = array<i32>} : memref<32x256xbf16, #tpu.memory_space<vmem>>, vector<32x256xbf16>,
    } else {
    }
    return
  }
  func.func @transform_0(%arg0: i32, %arg1: i32, %arg2: i32) -> (i32, i32) {
    %c0_i32 = arith.constant 0 : i32
    return %arg0, %arg2 : i32, i32
  }
  func.func @transform_1(%arg0: i32, %arg1: i32, %arg2: i32) -> (i32, i32) {
    %c0_i32 = arith.constant 0 : i32
    return %arg2, %arg1 : i32, i32
  }
  func.func @transform_2(%arg0: i32, %arg1: i32, %arg2: i32) -> (i32, i32) {
    %c0_i32 = arith.constant 0 : i32
    %c0_i32_0 = arith.constant 0 : i32
    return %c0_i32, %arg1 : i32, i32
  }
  func.func @transform_3(%arg0: i32, %arg1: i32, %arg2: i32) -> (i32, i32) {
    %c0_i32 = arith.constant 0 : i32
    return %arg0, %arg1 : i32, i32
  }
}

module attributes {stable_mosaic.version = 11 : i64} {
  func.func @_self_attn_kernel(%arg0: i32, %arg1: memref<1x8x384xbf16, #tpu.memory_space<vmem>>, %arg2: memref<8x8xf32, #tpu.memory_space<vmem>>, %arg3: memref<128x128xbf16, #tpu.memory_space<vmem>>, %arg4: memref<1x128xf32, #tpu.memory_space<vmem>>, %arg5: memref<1x8x128xbf16, #tpu.memory_space<vmem>>, %arg6: memref<1x8x128xbf16, #tpu.memory_space<vmem>>) attributes {dimension_semantics = [#tpu.dimension_semantics<parallel>], iteration_bounds = array<i64: 2>, scalar_prefetch = 0 : i64, scratch_operands = 0 : i64, tpu.core_type = #tpu.core_type<tc>, window_params = [{transform_indices = @transform_0, window_bounds = array<i64: 1, 8, 384>}, {pipeline_mode = #tpu.pipeline_mode<synchronous>, transform_indices = @transform_1, window_bounds = array<i64: 8, 8>}, {pipeline_mode = #tpu.pipeline_mode<synchronous>, transform_indices = @transform_2, window_bounds = array<i64: 128, 128>}, {pipeline_mode = #tpu.pipeline_mode<synchronous>, transform_indices = @transform_3, window_bounds = array<i64: 1, 128>}, {transform_indices = @transform_4, window_bounds = array<i64: 1, 8, 128>}, {transform_indices = @transform_5, window_bounds = array<i64: 1, 8, 128>}]} {
    %c0 = arith.constant 0 : index
    %c0_0 = arith.constant 0 : index
    %c0_1 = arith.constant 0 : index
    %0 = vector.load %arg1[%c0, %c0_0, %c0_1] : memref<1x8x384xbf16, #tpu.memory_space<vmem>>, vector<1x8x32xbf16>
    %1 = vector.shape_cast %0 : vector<1x8x32xbf16> to vector<8x32xbf16>
    %cst = arith.constant 1.767580e-01 : bf16
    %2 = vector.broadcast %cst : bf16 to vector<8x32xbf16>
    %3 = arith.mulf %1, %2 : vector<8x32xbf16>
    %c0_2 = arith.constant 0 : index
    %c0_3 = arith.constant 0 : index
    %c128 = arith.constant 128 : index
    %4 = vector.load %arg1[%c0_2, %c0_3, %c128] : memref<1x8x384xbf16, #tpu.memory_space<vmem>>, vector<1x8x32xbf16>
    %5 = vector.shape_cast %4 : vector<1x8x32xbf16> to vector<8x32xbf16>
    %c0_4 = arith.constant 0 : index
    %c0_5 = arith.constant 0 : index
    %c256 = arith.constant 256 : index
    %6 = vector.load %arg1[%c0_4, %c0_5, %c256] : memref<1x8x384xbf16, #tpu.memory_space<vmem>>, vector<1x8x32xbf16>
    %7 = vector.shape_cast %6 : vector<1x8x32xbf16> to vector<8x32xbf16>
    %cst_6 = arith.constant dense<0.000000e+00> : vector<8x8xf32>
    %8 = tpu.matmul %3, %5, %cst_6 {dimension_numbers = #tpu.dot_dimension_numbers<[1], [1], [0], [0], [0, 0, 1, 0], [], []>} : vector<8x32xbf16>, vector<8x32xbf16>, vector<8x8xf32> -> vector<8x8xf32>
    %c0_7 = arith.constant 0 : index
    %c0_8 = arith.constant 0 : index
    %9 = vector.load %arg2[%c0_7, %c0_8] : memref<8x8xf32, #tpu.memory_space<vmem>>, vector<8x8xf32>
    %10 = arith.addf %8, %9 : vector<8x8xf32>
    %cst_9 = arith.constant dense<0xFF800000> : vector<8xf32>
    %11 = vector.multi_reduction <maximumf>, %10, %cst_9 [1] : vector<8x8xf32> to vector<8xf32>
    %12 = vector.shape_cast %11 : vector<8xf32> to vector<8x1xf32>
    %13 = vector.broadcast %12 : vector<8x1xf32> to vector<8x8xf32>
    %14 = arith.subf %10, %13 : vector<8x8xf32>
    %15 = math.exp %14 : vector<8x8xf32>
    %cst_10 = arith.constant dense<0.000000e+00> : vector<8xf32>
    %16 = vector.multi_reduction <add>, %15, %cst_10 [1] : vector<8x8xf32> to vector<8xf32>
    %17 = vector.shape_cast %16 : vector<8xf32> to vector<8x1xf32>
    %18 = arith.truncf %15 : vector<8x8xf32> to vector<8x8xbf16>
    %cst_11 = arith.constant dense<0.000000e+00> : vector<8x32xf32>
    %19 = tpu.matmul %18, %7, %cst_11 {dimension_numbers = #tpu.dot_dimension_numbers<[1], [0], [0], [1], [0, 0, 1, 1], [], []>} : vector<8x8xbf16>, vector<8x32xbf16>, vector<8x32xf32> -> vector<8x32xf32>
    %20 = tpu.reciprocal %17 {approx = true} : vector<8x1xf32> -> vector<8x1xf32>
    %21 = vector.broadcast %20 : vector<8x1xf32> to vector<8x32xf32>
    %22 = arith.mulf %19, %21 : vector<8x32xf32>
    %23 = arith.truncf %22 : vector<8x32xf32> to vector<8x32xbf16>
    %c0_12 = arith.constant 0 : index
    %c0_13 = arith.constant 0 : index
    %c32 = arith.constant 32 : index
    %24 = vector.load %arg1[%c0_12, %c0_13, %c32] : memref<1x8x384xbf16, #tpu.memory_space<vmem>>, vector<1x8x32xbf16>
    %25 = vector.shape_cast %24 : vector<1x8x32xbf16> to vector<8x32xbf16>
    %cst_14 = arith.constant 1.767580e-01 : bf16
    %26 = vector.broadcast %cst_14 : bf16 to vector<8x32xbf16>
    %27 = arith.mulf %25, %26 : vector<8x32xbf16>
    %c0_15 = arith.constant 0 : index
    %c0_16 = arith.constant 0 : index
    %c160 = arith.constant 160 : index
    %28 = vector.load %arg1[%c0_15, %c0_16, %c160] : memref<1x8x384xbf16, #tpu.memory_space<vmem>>, vector<1x8x32xbf16>
    %29 = vector.shape_cast %28 : vector<1x8x32xbf16> to vector<8x32xbf16>
    %c0_17 = arith.constant 0 : index
    %c0_18 = arith.constant 0 : index
    %c288 = arith.constant 288 : index
    %30 = vector.load %arg1[%c0_17, %c0_18, %c288] : memref<1x8x384xbf16, #tpu.memory_space<vmem>>, vector<1x8x32xbf16>
    %31 = vector.shape_cast %30 : vector<1x8x32xbf16> to vector<8x32xbf16>
    %cst_19 = arith.constant dense<0.000000e+00> : vector<8x8xf32>
    %32 = tpu.matmul %27, %29, %cst_19 {dimension_numbers = #tpu.dot_dimension_numbers<[1], [1], [0], [0], [0, 0, 1, 0], [], []>} : vector<8x32xbf16>, vector<8x32xbf16>, vector<8x8xf32> -> vector<8x8xf32>
    %c0_20 = arith.constant 0 : index
    %c0_21 = arith.constant 0 : index
    %33 = vector.load %arg2[%c0_20, %c0_21] : memref<8x8xf32, #tpu.memory_space<vmem>>, vector<8x8xf32>
    %34 = arith.addf %32, %33 : vector<8x8xf32>
    %cst_22 = arith.constant dense<0xFF800000> : vector<8xf32>
    %35 = vector.multi_reduction <maximumf>, %34, %cst_22 [1] : vector<8x8xf32> to vector<8xf32>
    %36 = vector.shape_cast %35 : vector<8xf32> to vector<8x1xf32>
    %37 = vector.broadcast %36 : vector<8x1xf32> to vector<8x8xf32>
    %38 = arith.subf %34, %37 : vector<8x8xf32>
    %39 = math.exp %38 : vector<8x8xf32>
    %cst_23 = arith.constant dense<0.000000e+00> : vector<8xf32>
    %40 = vector.multi_reduction <add>, %39, %cst_23 [1] : vector<8x8xf32> to vector<8xf32>
    %41 = vector.shape_cast %40 : vector<8xf32> to vector<8x1xf32>
    %42 = arith.truncf %39 : vector<8x8xf32> to vector<8x8xbf16>
    %cst_24 = arith.constant dense<0.000000e+00> : vector<8x32xf32>
    %43 = tpu.matmul %42, %31, %cst_24 {dimension_numbers = #tpu.dot_dimension_numbers<[1], [0], [0], [1], [0, 0, 1, 1], [], []>} : vector<8x8xbf16>, vector<8x32xbf16>, vector<8x32xf32> -> vector<8x32xf32>
    %44 = tpu.reciprocal %41 {approx = true} : vector<8x1xf32> -> vector<8x1xf32>
    %45 = vector.broadcast %44 : vector<8x1xf32> to vector<8x32xf32>
    %46 = arith.mulf %43, %45 : vector<8x32xf32>
    %47 = arith.truncf %46 : vector<8x32xf32> to vector<8x32xbf16>
    %c0_25 = arith.constant 0 : index
    %c0_26 = arith.constant 0 : index
    %c64 = arith.constant 64 : index
    %48 = vector.load %arg1[%c0_25, %c0_26, %c64] : memref<1x8x384xbf16, #tpu.memory_space<vmem>>, vector<1x8x32xbf16>
    %49 = vector.shape_cast %48 : vector<1x8x32xbf16> to vector<8x32xbf16>
    %cst_27 = arith.constant 1.767580e-01 : bf16
    %50 = vector.broadcast %cst_27 : bf16 to vector<8x32xbf16>
    %51 = arith.mulf %49, %50 : vector<8x32xbf16>
    %c0_28 = arith.constant 0 : index
    %c0_29 = arith.constant 0 : index
    %c192 = arith.constant 192 : index
    %52 = vector.load %arg1[%c0_28, %c0_29, %c192] : memref<1x8x384xbf16, #tpu.memory_space<vmem>>, vector<1x8x32xbf16>
    %53 = vector.shape_cast %52 : vector<1x8x32xbf16> to vector<8x32xbf16>
    %c0_30 = arith.constant 0 : index
    %c0_31 = arith.constant 0 : index
    %c320 = arith.constant 320 : index
    %54 = vector.load %arg1[%c0_30, %c0_31, %c320] : memref<1x8x384xbf16, #tpu.memory_space<vmem>>, vector<1x8x32xbf16>
    %55 = vector.shape_cast %54 : vector<1x8x32xbf16> to vector<8x32xbf16>
    %cst_32 = arith.constant dense<0.000000e+00> : vector<8x8xf32>
    %56 = tpu.matmul %51, %53, %cst_32 {dimension_numbers = #tpu.dot_dimension_numbers<[1], [1], [0], [0], [0, 0, 1, 0], [], []>} : vector<8x32xbf16>, vector<8x32xbf16>, vector<8x8xf32> -> vector<8x8xf32>
    %c0_33 = arith.constant 0 : index
    %c0_34 = arith.constant 0 : index
    %57 = vector.load %arg2[%c0_33, %c0_34] : memref<8x8xf32, #tpu.memory_space<vmem>>, vector<8x8xf32>
    %58 = arith.addf %56, %57 : vector<8x8xf32>
    %cst_35 = arith.constant dense<0xFF800000> : vector<8xf32>
    %59 = vector.multi_reduction <maximumf>, %58, %cst_35 [1] : vector<8x8xf32> to vector<8xf32>
    %60 = vector.shape_cast %59 : vector<8xf32> to vector<8x1xf32>
    %61 = vector.broadcast %60 : vector<8x1xf32> to vector<8x8xf32>
    %62 = arith.subf %58, %61 : vector<8x8xf32>
    %63 = math.exp %62 : vector<8x8xf32>
    %cst_36 = arith.constant dense<0.000000e+00> : vector<8xf32>
    %64 = vector.multi_reduction <add>, %63, %cst_36 [1] : vector<8x8xf32> to vector<8xf32>
    %65 = vector.shape_cast %64 : vector<8xf32> to vector<8x1xf32>
    %66 = arith.truncf %63 : vector<8x8xf32> to vector<8x8xbf16>
    %cst_37 = arith.constant dense<0.000000e+00> : vector<8x32xf32>
    %67 = tpu.matmul %66, %55, %cst_37 {dimension_numbers = #tpu.dot_dimension_numbers<[1], [0], [0], [1], [0, 0, 1, 1], [], []>} : vector<8x8xbf16>, vector<8x32xbf16>, vector<8x32xf32> -> vector<8x32xf32>
    %68 = tpu.reciprocal %65 {approx = true} : vector<8x1xf32> -> vector<8x1xf32>
    %69 = vector.broadcast %68 : vector<8x1xf32> to vector<8x32xf32>
    %70 = arith.mulf %67, %69 : vector<8x32xf32>
    %71 = arith.truncf %70 : vector<8x32xf32> to vector<8x32xbf16>
    %c0_38 = arith.constant 0 : index
    %c0_39 = arith.constant 0 : index
    %c96 = arith.constant 96 : index
    %72 = vector.load %arg1[%c0_38, %c0_39, %c96] : memref<1x8x384xbf16, #tpu.memory_space<vmem>>, vector<1x8x32xbf16>
    %73 = vector.shape_cast %72 : vector<1x8x32xbf16> to vector<8x32xbf16>
    %cst_40 = arith.constant 1.767580e-01 : bf16
    %74 = vector.broadcast %cst_40 : bf16 to vector<8x32xbf16>
    %75 = arith.mulf %73, %74 : vector<8x32xbf16>
    %c0_41 = arith.constant 0 : index
    %c0_42 = arith.constant 0 : index
    %c224 = arith.constant 224 : index
    %76 = vector.load %arg1[%c0_41, %c0_42, %c224] : memref<1x8x384xbf16, #tpu.memory_space<vmem>>, vector<1x8x32xbf16>
    %77 = vector.shape_cast %76 : vector<1x8x32xbf16> to vector<8x32xbf16>
    %c0_43 = arith.constant 0 : index
    %c0_44 = arith.constant 0 : index
    %c352 = arith.constant 352 : index
    %78 = vector.load %arg1[%c0_43, %c0_44, %c352] : memref<1x8x384xbf16, #tpu.memory_space<vmem>>, vector<1x8x32xbf16>
    %79 = vector.shape_cast %78 : vector<1x8x32xbf16> to vector<8x32xbf16>
    %cst_45 = arith.constant dense<0.000000e+00> : vector<8x8xf32>
    %80 = tpu.matmul %75, %77, %cst_45 {dimension_numbers = #tpu.dot_dimension_numbers<[1], [1], [0], [0], [0, 0, 1, 0], [], []>} : vector<8x32xbf16>, vector<8x32xbf16>, vector<8x8xf32> -> vector<8x8xf32>
    %c0_46 = arith.constant 0 : index
    %c0_47 = arith.constant 0 : index
    %81 = vector.load %arg2[%c0_46, %c0_47] : memref<8x8xf32, #tpu.memory_space<vmem>>, vector<8x8xf32>
    %82 = arith.addf %80, %81 : vector<8x8xf32>
    %cst_48 = arith.constant dense<0xFF800000> : vector<8xf32>
    %83 = vector.multi_reduction <maximumf>, %82, %cst_48 [1] : vector<8x8xf32> to vector<8xf32>
    %84 = vector.shape_cast %83 : vector<8xf32> to vector<8x1xf32>
    %85 = vector.broadcast %84 : vector<8x1xf32> to vector<8x8xf32>
    %86 = arith.subf %82, %85 : vector<8x8xf32>
    %87 = math.exp %86 : vector<8x8xf32>
    %cst_49 = arith.constant dense<0.000000e+00> : vector<8xf32>
    %88 = vector.multi_reduction <add>, %87, %cst_49 [1] : vector<8x8xf32> to vector<8xf32>
    %89 = vector.shape_cast %88 : vector<8xf32> to vector<8x1xf32>
    %90 = arith.truncf %87 : vector<8x8xf32> to vector<8x8xbf16>
    %cst_50 = arith.constant dense<0.000000e+00> : vector<8x32xf32>
    %91 = tpu.matmul %90, %79, %cst_50 {dimension_numbers = #tpu.dot_dimension_numbers<[1], [0], [0], [1], [0, 0, 1, 1], [], []>} : vector<8x8xbf16>, vector<8x32xbf16>, vector<8x32xf32> -> vector<8x32xf32>
    %92 = tpu.reciprocal %89 {approx = true} : vector<8x1xf32> -> vector<8x1xf32>
    %93 = vector.broadcast %92 : vector<8x1xf32> to vector<8x32xf32>
    %94 = arith.mulf %91, %93 : vector<8x32xf32>
    %95 = arith.truncf %94 : vector<8x32xf32> to vector<8x32xbf16>
    %96 = tpu.concatenate %23, %47, %71, %95 in 1 : vector<8x32xbf16>, vector<8x32xbf16>, vector<8x32xbf16>, vector<8x32xbf16> -> vector<8x128xbf16>
    %c0_51 = arith.constant 0 : index
    %c0_52 = arith.constant 0 : index
    %c0_53 = arith.constant 0 : index
    %97 = vector.load %arg5[%c0_51, %c0_52, %c0_53] : memref<1x8x128xbf16, #tpu.memory_space<vmem>>, vector<1x8x128xbf16>
    %98 = vector.shape_cast %97 : vector<1x8x128xbf16> to vector<8x128xbf16>
    %99 = arith.extf %98 : vector<8x128xbf16> to vector<8x128xf32>
    %c0_54 = arith.constant 0 : index
    %c0_55 = arith.constant 0 : index
    %100 = vector.load %arg4[%c0_54, %c0_55] : memref<1x128xf32, #tpu.memory_space<vmem>>, vector<1x128xf32>
    %101 = vector.broadcast %100 : vector<1x128xf32> to vector<8x128xf32>
    %102 = arith.addf %99, %101 : vector<8x128xf32>
    %c0_56 = arith.constant 0 : index
    %c0_57 = arith.constant 0 : index
    %103 = vector.load %arg3[%c0_56, %c0_57] : memref<128x128xbf16, #tpu.memory_space<vmem>>, vector<128x128xbf16>
    %cst_58 = arith.constant dense<0.000000e+00> : vector<8x128xf32>
    %104 = tpu.matmul %96, %103, %cst_58 {dimension_numbers = #tpu.dot_dimension_numbers<[1], [0], [0], [1], [0, 0, 1, 1], [], []>} : vector<8x128xbf16>, vector<128x128xbf16>, vector<8x128xf32> -> vector<8x128xf32>
    %105 = arith.addf %102, %104 : vector<8x128xf32>
    %106 = arith.truncf %105 : vector<8x128xf32> to vector<8x128xbf16>
    %c0_59 = arith.constant 0 : index
    %c0_60 = arith.constant 0 : index
    %c0_61 = arith.constant 0 : index
    %107 = vector.load %arg6[%c0_59, %c0_60, %c0_61] : memref<1x8x128xbf16, #tpu.memory_space<vmem>>, vector<1x8x128xbf16>
    %108 = vector.shape_cast %107 : vector<1x8x128xbf16> to vector<8x128xbf16>
    %109 = vector.shape_cast %106 : vector<8x128xbf16> to vector<1x8x128xbf16>
    tpu.vector_store %arg6[%c0_59, %c0_60, %c0_61], %109 {strides = array<i32>} : memref<1x8x128xbf16, #tpu.memory_space<vmem>>, vector<1x8x128xbf16>,
    return
  }
  func.func @transform_0(%arg0: i32) -> (i32, i32, i32) {
    %c0_i32 = arith.constant 0 : i32
    %c0_i32_0 = arith.constant 0 : i32
    %c0_i32_1 = arith.constant 0 : i32
    return %arg0, %c0_i32, %c0_i32_0 : i32, i32, i32
  }
  func.func @transform_1(%arg0: i32) -> (i32, i32) {
    %c0_i32 = arith.constant 0 : i32
    %c0_i32_0 = arith.constant 0 : i32
    %c0_i32_1 = arith.constant 0 : i32
    return %c0_i32, %c0_i32_0 : i32, i32
  }
  func.func @transform_2(%arg0: i32) -> (i32, i32) {
    %c0_i32 = arith.constant 0 : i32
    %c0_i32_0 = arith.constant 0 : i32
    %c0_i32_1 = arith.constant 0 : i32
    return %c0_i32, %c0_i32_0 : i32, i32
  }
  func.func @transform_3(%arg0: i32) -> (i32, i32) {
    %c0_i32 = arith.constant 0 : i32
    %c0_i32_0 = arith.constant 0 : i32
    %c0_i32_1 = arith.constant 0 : i32
    return %c0_i32, %c0_i32_0 : i32, i32
  }
  func.func @transform_4(%arg0: i32) -> (i32, i32, i32) {
    %c0_i32 = arith.constant 0 : i32
    %c0_i32_0 = arith.constant 0 : i32
    %c0_i32_1 = arith.constant 0 : i32
    return %arg0, %c0_i32, %c0_i32_0 : i32, i32, i32
  }
  func.func @transform_5(%arg0: i32) -> (i32, i32, i32) {
    %c0_i32 = arith.constant 0 : i32
    %c0_i32_0 = arith.constant 0 : i32
    %c0_i32_1 = arith.constant 0 : i32
    return %arg0, %c0_i32, %c0_i32_0 : i32, i32, i32
  }
}

module attributes {stable_mosaic.version = 11 : i64} {
  func.func @_ln_mlp_kernel(%arg0: i32, %arg1: i32, %arg2: memref<16x128xbf16, #tpu.memory_space<vmem>>, %arg3: memref<1x128xf32, #tpu.memory_space<vmem>>, %arg4: memref<1x128xf32, #tpu.memory_space<vmem>>, %arg5: memref<128x512xbf16, #tpu.memory_space<vmem>>, %arg6: memref<1x512xf32, #tpu.memory_space<vmem>>, %arg7: memref<512x128xbf16, #tpu.memory_space<vmem>>, %arg8: memref<1x128xf32, #tpu.memory_space<vmem>>, %arg9: memref<16x128xbf16, #tpu.memory_space<vmem>>, %arg10: memref<16x128xbf16, #tpu.memory_space<vmem>>, %arg11: memref<16x128xf32, #tpu.memory_space<vmem>>) attributes {dimension_semantics = [#tpu.dimension_semantics<parallel>, #tpu.dimension_semantics<arbitrary>], iteration_bounds = array<i64: 1, 1>, scalar_prefetch = 0 : i64, scratch_operands = 2 : i64, tpu.core_type = #tpu.core_type<tc>, window_params = [{transform_indices = @transform_0, window_bounds = array<i64: 16, 128>}, {pipeline_mode = #tpu.pipeline_mode<synchronous>, transform_indices = @transform_1, window_bounds = array<i64: 1, 128>}, {pipeline_mode = #tpu.pipeline_mode<synchronous>, transform_indices = @transform_2, window_bounds = array<i64: 1, 128>}, {transform_indices = @transform_3, window_bounds = array<i64: 128, 512>}, {transform_indices = @transform_4, window_bounds = array<i64: 1, 512>}, {transform_indices = @transform_5, window_bounds = array<i64: 512, 128>}, {pipeline_mode = #tpu.pipeline_mode<synchronous>, transform_indices = @transform_6, window_bounds = array<i64: 1, 128>}, {transform_indices = @transform_7, window_bounds = array<i64: 16, 128>}]} {
    %c0_i32 = arith.constant 0 : i32
    %0 = arith.cmpi eq, %arg1, %c0_i32 : i32
    %1 = arith.extui %0 : i1 to i32
    %c0_i32_0 = arith.constant 0 : i32
    %2 = arith.cmpi ne, %1, %c0_i32_0 : i32
    scf.if %2 {
      %c0_18 = arith.constant 0 : index
      %c0_19 = arith.constant 0 : index
      %26 = vector.load %arg2[%c0_18, %c0_19] : memref<16x128xbf16, #tpu.memory_space<vmem>>, vector<16x128xbf16>
      %27 = arith.extf %26 : vector<16x128xbf16> to vector<16x128xf32>
      %cst_20 = arith.constant dense<0.000000e+00> : vector<16xf32>
      %28 = vector.multi_reduction <add>, %27, %cst_20 [1] : vector<16x128xf32> to vector<16xf32>
      %29 = vector.shape_cast %28 : vector<16xf32> to vector<16x1xf32>
      %cst_21 = arith.constant 1.280000e+02 : f32
      %30 = vector.broadcast %cst_21 : f32 to vector<16x1xf32>
      %31 = arith.divf %29, %30 : vector<16x1xf32>
      %32 = vector.broadcast %31 : vector<16x1xf32> to vector<16x128xf32>
      %33 = arith.subf %27, %32 : vector<16x128xf32>
      %34 = arith.mulf %33, %33 : vector<16x128xf32>
      %cst_22 = arith.constant dense<0.000000e+00> : vector<16xf32>
      %35 = vector.multi_reduction <add>, %34, %cst_22 [1] : vector<16x128xf32> to vector<16xf32>
      %36 = vector.shape_cast %35 : vector<16xf32> to vector<16x1xf32>
      %cst_23 = arith.constant 1.280000e+02 : f32
      %37 = vector.broadcast %cst_23 : f32 to vector<16x1xf32>
      %38 = arith.divf %36, %37 : vector<16x1xf32>
      %39 = vector.broadcast %31 : vector<16x1xf32> to vector<16x128xf32>
      %40 = arith.subf %27, %39 : vector<16x128xf32>
      %cst_24 = arith.constant 9.99999974E-6 : f32
      %41 = vector.broadcast %cst_24 : f32 to vector<16x1xf32>
      %42 = arith.addf %38, %41 : vector<16x1xf32>
      %43 = math.rsqrt %42 : vector<16x1xf32>
      %44 = vector.broadcast %43 : vector<16x1xf32> to vector<16x128xf32>
      %45 = arith.mulf %40, %44 : vector<16x128xf32>
      %c0_25 = arith.constant 0 : index
      %c0_26 = arith.constant 0 : index
      %46 = vector.load %arg3[%c0_25, %c0_26] : memref<1x128xf32, #tpu.memory_space<vmem>>, vector<1x128xf32>
      %47 = vector.broadcast %46 : vector<1x128xf32> to vector<16x128xf32>
      %48 = arith.mulf %45, %47 : vector<16x128xf32>
      %c0_27 = arith.constant 0 : index
      %c0_28 = arith.constant 0 : index
      %49 = vector.load %arg4[%c0_27, %c0_28] : memref<1x128xf32, #tpu.memory_space<vmem>>, vector<1x128xf32>
      %50 = vector.broadcast %49 : vector<1x128xf32> to vector<16x128xf32>
      %51 = arith.addf %48, %50 : vector<16x128xf32>
      %52 = arith.truncf %51 : vector<16x128xf32> to vector<16x128xbf16>
      %c0_29 = arith.constant 0 : index
      %c0_30 = arith.constant 0 : index
      %53 = vector.load %arg10[%c0_29, %c0_30] : memref<16x128xbf16, #tpu.memory_space<vmem>>, vector<16x128xbf16>
      tpu.vector_store %arg10[%c0_29, %c0_30], %52 {strides = array<i32>} : memref<16x128xbf16, #tpu.memory_space<vmem>>, vector<16x128xbf16>,
      %c0_31 = arith.constant 0 : index
      %c0_32 = arith.constant 0 : index
      %54 = vector.load %arg8[%c0_31, %c0_32] : memref<1x128xf32, #tpu.memory_space<vmem>>, vector<1x128xf32>
      %55 = vector.broadcast %54 : vector<1x128xf32> to vector<16x128xf32>
      %56 = arith.addf %27, %55 : vector<16x128xf32>
      %c0_33 = arith.constant 0 : index
      %c0_34 = arith.constant 0 : index
      %57 = vector.load %arg11[%c0_33, %c0_34] : memref<16x128xf32, #tpu.memory_space<vmem>>, vector<16x128xf32>
      tpu.vector_store %arg11[%c0_33, %c0_34], %56 {strides = array<i32>} : memref<16x128xf32, #tpu.memory_space<vmem>>, vector<16x128xf32>,
    } else {
    }
    %c0 = arith.constant 0 : index
    %c0_1 = arith.constant 0 : index
    %3 = vector.load %arg10[%c0, %c0_1] : memref<16x128xbf16, #tpu.memory_space<vmem>>, vector<16x128xbf16>
    %c0_2 = arith.constant 0 : index
    %c0_3 = arith.constant 0 : index
    %4 = vector.load %arg5[%c0_2, %c0_3] : memref<128x512xbf16, #tpu.memory_space<vmem>>, vector<128x512xbf16>
    %cst = arith.constant dense<0.000000e+00> : vector<16x512xf32>
    %5 = tpu.matmul %3, %4, %cst {dimension_numbers = #tpu.dot_dimension_numbers<[1], [0], [0], [1], [0, 0, 1, 1], [], []>} : vector<16x128xbf16>, vector<128x512xbf16>, vector<16x512xf32> -> vector<16x512xf32>
    %c0_4 = arith.constant 0 : index
    %c0_5 = arith.constant 0 : index
    %6 = vector.load %arg6[%c0_4, %c0_5] : memref<1x512xf32, #tpu.memory_space<vmem>>, vector<1x512xf32>
    %7 = vector.broadcast %6 : vector<1x512xf32> to vector<16x512xf32>
    %8 = arith.addf %5, %7 : vector<16x512xf32>
    %cst_6 = arith.constant 5.000000e-01 : f32
    %9 = vector.broadcast %cst_6 : f32 to vector<16x512xf32>
    %10 = arith.mulf %9, %8 : vector<16x512xf32>
    %cst_7 = arith.constant 0.707106769 : f32
    %11 = vector.broadcast %cst_7 : f32 to vector<16x512xf32>
    %12 = arith.mulf %8, %11 : vector<16x512xf32>
    %13 = math.erf %12 : vector<16x512xf32>
    %cst_8 = arith.constant 1.000000e+00 : f32
    %14 = vector.broadcast %cst_8 : f32 to vector<16x512xf32>
    %15 = arith.addf %14, %13 : vector<16x512xf32>
    %16 = arith.mulf %10, %15 : vector<16x512xf32>
    %c0_9 = arith.constant 0 : index
    %c0_10 = arith.constant 0 : index
    %17 = vector.load %arg11[%c0_9, %c0_10] : memref<16x128xf32, #tpu.memory_space<vmem>>, vector<16x128xf32>
    %18 = arith.truncf %16 : vector<16x512xf32> to vector<16x512xbf16>
    %c0_11 = arith.constant 0 : index
    %c0_12 = arith.constant 0 : index
    %19 = vector.load %arg7[%c0_11, %c0_12] : memref<512x128xbf16, #tpu.memory_space<vmem>>, vector<512x128xbf16>
    %cst_13 = arith.constant dense<0.000000e+00> : vector<16x128xf32>
    %20 = tpu.matmul %18, %19, %cst_13 {dimension_numbers = #tpu.dot_dimension_numbers<[1], [0], [0], [1], [0, 0, 1, 1], [], []>} : vector<16x512xbf16>, vector<512x128xbf16>, vector<16x128xf32> -> vector<16x128xf32>
    %21 = arith.addf %17, %20 : vector<16x128xf32>
    %c0_14 = arith.constant 0 : index
    %c0_15 = arith.constant 0 : index
    %22 = vector.load %arg11[%c0_14, %c0_15] : memref<16x128xf32, #tpu.memory_space<vmem>>, vector<16x128xf32>
    tpu.vector_store %arg11[%c0_14, %c0_15], %21 {strides = array<i32>} : memref<16x128xf32, #tpu.memory_space<vmem>>, vector<16x128xf32>,
    %c0_i32_16 = arith.constant 0 : i32
    %23 = arith.cmpi eq, %arg1, %c0_i32_16 : i32
    %24 = arith.extui %23 : i1 to i32
    %c0_i32_17 = arith.constant 0 : i32
    %25 = arith.cmpi ne, %24, %c0_i32_17 : i32
    scf.if %25 {
      %c0_18 = arith.constant 0 : index
      %c0_19 = arith.constant 0 : index
      %26 = vector.load %arg11[%c0_18, %c0_19] : memref<16x128xf32, #tpu.memory_space<vmem>>, vector<16x128xf32>
      %27 = arith.truncf %26 : vector<16x128xf32> to vector<16x128xbf16>
      %c0_20 = arith.constant 0 : index
      %c0_21 = arith.constant 0 : index
      %28 = vector.load %arg9[%c0_20, %c0_21] : memref<16x128xbf16, #tpu.memory_space<vmem>>, vector<16x128xbf16>
      tpu.vector_store %arg9[%c0_20, %c0_21], %27 {strides = array<i32>} : memref<16x128xbf16, #tpu.memory_space<vmem>>, vector<16x128xbf16>,
    } else {
    }
    return
  }
  func.func @transform_0(%arg0: i32, %arg1: i32) -> (i32, i32) {
    %c0_i32 = arith.constant 0 : i32
    %c0_i32_0 = arith.constant 0 : i32
    return %arg0, %c0_i32 : i32, i32
  }
  func.func @transform_1(%arg0: i32, %arg1: i32) -> (i32, i32) {
    %c0_i32 = arith.constant 0 : i32
    %c0_i32_0 = arith.constant 0 : i32
    %c0_i32_1 = arith.constant 0 : i32
    return %c0_i32, %c0_i32_0 : i32, i32
  }
  func.func @transform_2(%arg0: i32, %arg1: i32) -> (i32, i32) {
    %c0_i32 = arith.constant 0 : i32
    %c0_i32_0 = arith.constant 0 : i32
    %c0_i32_1 = arith.constant 0 : i32
    return %c0_i32, %c0_i32_0 : i32, i32
  }
  func.func @transform_3(%arg0: i32, %arg1: i32) -> (i32, i32) {
    %c0_i32 = arith.constant 0 : i32
    %c0_i32_0 = arith.constant 0 : i32
    return %c0_i32, %arg1 : i32, i32
  }
  func.func @transform_4(%arg0: i32, %arg1: i32) -> (i32, i32) {
    %c0_i32 = arith.constant 0 : i32
    %c0_i32_0 = arith.constant 0 : i32
    return %c0_i32, %arg1 : i32, i32
  }
  func.func @transform_5(%arg0: i32, %arg1: i32) -> (i32, i32) {
    %c0_i32 = arith.constant 0 : i32
    %c0_i32_0 = arith.constant 0 : i32
    return %arg1, %c0_i32 : i32, i32
  }
  func.func @transform_6(%arg0: i32, %arg1: i32) -> (i32, i32) {
    %c0_i32 = arith.constant 0 : i32
    %c0_i32_0 = arith.constant 0 : i32
    %c0_i32_1 = arith.constant 0 : i32
    return %c0_i32, %c0_i32_0 : i32, i32
  }
  func.func @transform_7(%arg0: i32, %arg1: i32) -> (i32, i32) {
    %c0_i32 = arith.constant 0 : i32
    %c0_i32_0 = arith.constant 0 : i32
    return %arg0, %c0_i32 : i32, i32
  }
}

module attributes {stable_mosaic.version = 11 : i64} {
  func.func @_ln_linear_kernel(%arg0: i32, %arg1: i32, %arg2: memref<16x128xbf16, #tpu.memory_space<vmem>>, %arg3: memref<1x128xf32, #tpu.memory_space<vmem>>, %arg4: memref<1x128xf32, #tpu.memory_space<vmem>>, %arg5: memref<128x256xbf16, #tpu.memory_space<vmem>>, %arg6: memref<16x256xf32, #tpu.memory_space<vmem>>, %arg7: memref<16x128xbf16, #tpu.memory_space<vmem>>) attributes {dimension_semantics = [#tpu.dimension_semantics<parallel>, #tpu.dimension_semantics<arbitrary>], iteration_bounds = array<i64: 1, 1>, scalar_prefetch = 0 : i64, scratch_operands = 1 : i64, tpu.core_type = #tpu.core_type<tc>, window_params = [{transform_indices = @transform_0, window_bounds = array<i64: 16, 128>}, {pipeline_mode = #tpu.pipeline_mode<synchronous>, transform_indices = @transform_1, window_bounds = array<i64: 1, 128>}, {pipeline_mode = #tpu.pipeline_mode<synchronous>, transform_indices = @transform_2, window_bounds = array<i64: 1, 128>}, {transform_indices = @transform_3, window_bounds = array<i64: 128, 256>}, {transform_indices = @transform_4, window_bounds = array<i64: 16, 256>}]} {
    %c0_i32 = arith.constant 0 : i32
    %0 = arith.cmpi eq, %arg1, %c0_i32 : i32
    %1 = arith.extui %0 : i1 to i32
    %c0_i32_0 = arith.constant 0 : i32
    %2 = arith.cmpi ne, %1, %c0_i32_0 : i32
    scf.if %2 {
      %c0_6 = arith.constant 0 : index
      %c0_7 = arith.constant 0 : index
      %7 = vector.load %arg2[%c0_6, %c0_7] : memref<16x128xbf16, #tpu.memory_space<vmem>>, vector<16x128xbf16>
      %8 = arith.extf %7 : vector<16x128xbf16> to vector<16x128xf32>
      %cst_8 = arith.constant dense<0.000000e+00> : vector<16xf32>
      %9 = vector.multi_reduction <add>, %8, %cst_8 [1] : vector<16x128xf32> to vector<16xf32>
      %10 = vector.shape_cast %9 : vector<16xf32> to vector<16x1xf32>
      %cst_9 = arith.constant 1.280000e+02 : f32
      %11 = vector.broadcast %cst_9 : f32 to vector<16x1xf32>
      %12 = arith.divf %10, %11 : vector<16x1xf32>
      %13 = vector.broadcast %12 : vector<16x1xf32> to vector<16x128xf32>
      %14 = arith.subf %8, %13 : vector<16x128xf32>
      %15 = arith.mulf %14, %14 : vector<16x128xf32>
      %cst_10 = arith.constant dense<0.000000e+00> : vector<16xf32>
      %16 = vector.multi_reduction <add>, %15, %cst_10 [1] : vector<16x128xf32> to vector<16xf32>
      %17 = vector.shape_cast %16 : vector<16xf32> to vector<16x1xf32>
      %cst_11 = arith.constant 1.280000e+02 : f32
      %18 = vector.broadcast %cst_11 : f32 to vector<16x1xf32>
      %19 = arith.divf %17, %18 : vector<16x1xf32>
      %20 = vector.broadcast %12 : vector<16x1xf32> to vector<16x128xf32>
      %21 = arith.subf %8, %20 : vector<16x128xf32>
      %cst_12 = arith.constant 9.99999974E-6 : f32
      %22 = vector.broadcast %cst_12 : f32 to vector<16x1xf32>
      %23 = arith.addf %19, %22 : vector<16x1xf32>
      %24 = math.rsqrt %23 : vector<16x1xf32>
      %25 = vector.broadcast %24 : vector<16x1xf32> to vector<16x128xf32>
      %26 = arith.mulf %21, %25 : vector<16x128xf32>
      %c0_13 = arith.constant 0 : index
      %c0_14 = arith.constant 0 : index
      %27 = vector.load %arg3[%c0_13, %c0_14] : memref<1x128xf32, #tpu.memory_space<vmem>>, vector<1x128xf32>
      %28 = vector.broadcast %27 : vector<1x128xf32> to vector<16x128xf32>
      %29 = arith.mulf %26, %28 : vector<16x128xf32>
      %c0_15 = arith.constant 0 : index
      %c0_16 = arith.constant 0 : index
      %30 = vector.load %arg4[%c0_15, %c0_16] : memref<1x128xf32, #tpu.memory_space<vmem>>, vector<1x128xf32>
      %31 = vector.broadcast %30 : vector<1x128xf32> to vector<16x128xf32>
      %32 = arith.addf %29, %31 : vector<16x128xf32>
      %33 = arith.truncf %32 : vector<16x128xf32> to vector<16x128xbf16>
      %c0_17 = arith.constant 0 : index
      %c0_18 = arith.constant 0 : index
      %34 = vector.load %arg7[%c0_17, %c0_18] : memref<16x128xbf16, #tpu.memory_space<vmem>>, vector<16x128xbf16>
      tpu.vector_store %arg7[%c0_17, %c0_18], %33 {strides = array<i32>} : memref<16x128xbf16, #tpu.memory_space<vmem>>, vector<16x128xbf16>,
    } else {
    }
    %c0 = arith.constant 0 : index
    %c0_1 = arith.constant 0 : index
    %3 = vector.load %arg7[%c0, %c0_1] : memref<16x128xbf16, #tpu.memory_space<vmem>>, vector<16x128xbf16>
    %c0_2 = arith.constant 0 : index
    %c0_3 = arith.constant 0 : index
    %4 = vector.load %arg5[%c0_2, %c0_3] : memref<128x256xbf16, #tpu.memory_space<vmem>>, vector<128x256xbf16>
    %cst = arith.constant dense<0.000000e+00> : vector<16x256xf32>
    %5 = tpu.matmul %3, %4, %cst {dimension_numbers = #tpu.dot_dimension_numbers<[1], [0], [0], [1], [0, 0, 1, 1], [], []>} : vector<16x128xbf16>, vector<128x256xbf16>, vector<16x256xf32> -> vector<16x256xf32>
    %c0_4 = arith.constant 0 : index
    %c0_5 = arith.constant 0 : index
    %6 = vector.load %arg6[%c0_4, %c0_5] : memref<16x256xf32, #tpu.memory_space<vmem>>, vector<16x256xf32>
    tpu.vector_store %arg6[%c0_4, %c0_5], %5 {strides = array<i32>} : memref<16x256xf32, #tpu.memory_space<vmem>>, vector<16x256xf32>,
    return
  }
  func.func @transform_0(%arg0: i32, %arg1: i32) -> (i32, i32) {
    %c0_i32 = arith.constant 0 : i32
    %c0_i32_0 = arith.constant 0 : i32
    return %arg0, %c0_i32 : i32, i32
  }
  func.func @transform_1(%arg0: i32, %arg1: i32) -> (i32, i32) {
    %c0_i32 = arith.constant 0 : i32
    %c0_i32_0 = arith.constant 0 : i32
    %c0_i32_1 = arith.constant 0 : i32
    return %c0_i32, %c0_i32_0 : i32, i32
  }
  func.func @transform_2(%arg0: i32, %arg1: i32) -> (i32, i32) {
    %c0_i32 = arith.constant 0 : i32
    %c0_i32_0 = arith.constant 0 : i32
    %c0_i32_1 = arith.constant 0 : i32
    return %c0_i32, %c0_i32_0 : i32, i32
  }
  func.func @transform_3(%arg0: i32, %arg1: i32) -> (i32, i32) {
    %c0_i32 = arith.constant 0 : i32
    %c0_i32_0 = arith.constant 0 : i32
    return %c0_i32, %arg1 : i32, i32
  }
  func.func @transform_4(%arg0: i32, %arg1: i32) -> (i32, i32) {
    %c0_i32 = arith.constant 0 : i32
    return %arg0, %arg1 : i32, i32
  }
}

module attributes {stable_mosaic.version = 11 : i64} {
  func.func @_cross_attn_kernel(%arg0: i32, %arg1: i32, %arg2: memref<1x8x128xbf16, #tpu.memory_space<vmem>>, %arg3: memref<1x16x256xbf16, #tpu.memory_space<vmem>>, %arg4: memref<128x128xbf16, #tpu.memory_space<vmem>>, %arg5: memref<1x128xf32, #tpu.memory_space<vmem>>, %arg6: memref<1x8x128xbf16, #tpu.memory_space<vmem>>, %arg7: memref<1x8x128xbf16, #tpu.memory_space<vmem>>, %arg8: memref<8x128xf32, #tpu.memory_space<vmem>>) attributes {dimension_semantics = [#tpu.dimension_semantics<parallel>, #tpu.dimension_semantics<arbitrary>], iteration_bounds = array<i64: 2, 1>, scalar_prefetch = 0 : i64, scratch_operands = 1 : i64, tpu.core_type = #tpu.core_type<tc>, window_params = [{transform_indices = @transform_0, window_bounds = array<i64: 1, 8, 128>}, {transform_indices = @transform_1, window_bounds = array<i64: 1, 16, 256>}, {transform_indices = @transform_2, window_bounds = array<i64: 128, 128>}, {pipeline_mode = #tpu.pipeline_mode<synchronous>, transform_indices = @transform_3, window_bounds = array<i64: 1, 128>}, {transform_indices = @transform_4, window_bounds = array<i64: 1, 8, 128>}, {transform_indices = @transform_5, window_bounds = array<i64: 1, 8, 128>}]} {
    %c0_i32 = arith.constant 0 : i32
    %0 = arith.cmpi eq, %arg1, %c0_i32 : i32
    %1 = arith.extui %0 : i1 to i32
    %c0_i32_0 = arith.constant 0 : i32
    %2 = arith.cmpi ne, %1, %c0_i32_0 : i32
    scf.if %2 {
      %c0_57 = arith.constant 0 : index
      %c0_58 = arith.constant 0 : index
      %c0_59 = arith.constant 0 : index
      %100 = vector.load %arg6[%c0_57, %c0_58, %c0_59] : memref<1x8x128xbf16, #tpu.memory_space<vmem>>, vector<1x8x128xbf16>
      %101 = vector.shape_cast %100 : vector<1x8x128xbf16> to vector<8x128xbf16>
      %102 = arith.extf %101 : vector<8x128xbf16> to vector<8x128xf32>
      %c0_60 = arith.constant 0 : index
      %c0_61 = arith.constant 0 : index
      %103 = vector.load %arg5[%c0_60, %c0_61] : memref<1x128xf32, #tpu.memory_space<vmem>>, vector<1x128xf32>
      %104 = vector.broadcast %103 : vector<1x128xf32> to vector<8x128xf32>
      %105 = arith.addf %102, %104 : vector<8x128xf32>
      %c0_62 = arith.constant 0 : index
      %c0_63 = arith.constant 0 : index
      %106 = vector.load %arg8[%c0_62, %c0_63] : memref<8x128xf32, #tpu.memory_space<vmem>>, vector<8x128xf32>
      tpu.vector_store %arg8[%c0_62, %c0_63], %105 {strides = array<i32>} : memref<8x128xf32, #tpu.memory_space<vmem>>, vector<8x128xf32>,
    } else {
    }
    %c0 = arith.constant 0 : index
    %c0_1 = arith.constant 0 : index
    %c0_2 = arith.constant 0 : index
    %3 = vector.load %arg2[%c0, %c0_1, %c0_2] : memref<1x8x128xbf16, #tpu.memory_space<vmem>>, vector<1x8x32xbf16>
    %4 = vector.shape_cast %3 : vector<1x8x32xbf16> to vector<8x32xbf16>
    %cst = arith.constant 1.767580e-01 : bf16
    %5 = vector.broadcast %cst : bf16 to vector<8x32xbf16>
    %6 = arith.mulf %4, %5 : vector<8x32xbf16>
    %c0_3 = arith.constant 0 : index
    %c0_4 = arith.constant 0 : index
    %c0_5 = arith.constant 0 : index
    %7 = vector.load %arg3[%c0_3, %c0_4, %c0_5] : memref<1x16x256xbf16, #tpu.memory_space<vmem>>, vector<1x16x32xbf16>
    %8 = vector.shape_cast %7 : vector<1x16x32xbf16> to vector<16x32xbf16>
    %c0_6 = arith.constant 0 : index
    %c0_7 = arith.constant 0 : index
    %c128 = arith.constant 128 : index
    %9 = vector.load %arg3[%c0_6, %c0_7, %c128] : memref<1x16x256xbf16, #tpu.memory_space<vmem>>, vector<1x16x32xbf16>
    %10 = vector.shape_cast %9 : vector<1x16x32xbf16> to vector<16x32xbf16>
    %cst_8 = arith.constant dense<0.000000e+00> : vector<8x16xf32>
    %11 = tpu.matmul %6, %8, %cst_8 {dimension_numbers = #tpu.dot_dimension_numbers<[1], [1], [0], [0], [0, 0, 1, 0], [], []>} : vector<8x32xbf16>, vector<16x32xbf16>, vector<8x16xf32> -> vector<8x16xf32>
    %cst_9 = arith.constant dense<0xFF800000> : vector<8xf32>
    %12 = vector.multi_reduction <maximumf>, %11, %cst_9 [1] : vector<8x16xf32> to vector<8xf32>
    %13 = vector.shape_cast %12 : vector<8xf32> to vector<8x1xf32>
    %14 = vector.broadcast %13 : vector<8x1xf32> to vector<8x16xf32>
    %15 = arith.subf %11, %14 : vector<8x16xf32>
    %16 = math.exp %15 : vector<8x16xf32>
    %cst_10 = arith.constant dense<0.000000e+00> : vector<8xf32>
    %17 = vector.multi_reduction <add>, %16, %cst_10 [1] : vector<8x16xf32> to vector<8xf32>
    %18 = vector.shape_cast %17 : vector<8xf32> to vector<8x1xf32>
    %19 = arith.truncf %16 : vector<8x16xf32> to vector<8x16xbf16>
    %cst_11 = arith.constant dense<0.000000e+00> : vector<8x32xf32>
    %20 = tpu.matmul %19, %10, %cst_11 {dimension_numbers = #tpu.dot_dimension_numbers<[1], [0], [0], [1], [0, 0, 1, 1], [], []>} : vector<8x16xbf16>, vector<16x32xbf16>, vector<8x32xf32> -> vector<8x32xf32>
    %21 = tpu.reciprocal %18 {approx = true} : vector<8x1xf32> -> vector<8x1xf32>
    %22 = vector.broadcast %21 : vector<8x1xf32> to vector<8x32xf32>
    %23 = arith.mulf %20, %22 : vector<8x32xf32>
    %24 = arith.truncf %23 : vector<8x32xf32> to vector<8x32xbf16>
    %c0_12 = arith.constant 0 : index
    %c0_13 = arith.constant 0 : index
    %c32 = arith.constant 32 : index
    %25 = vector.load %arg2[%c0_12, %c0_13, %c32] : memref<1x8x128xbf16, #tpu.memory_space<vmem>>, vector<1x8x32xbf16>
    %26 = vector.shape_cast %25 : vector<1x8x32xbf16> to vector<8x32xbf16>
    %cst_14 = arith.constant 1.767580e-01 : bf16
    %27 = vector.broadcast %cst_14 : bf16 to vector<8x32xbf16>
    %28 = arith.mulf %26, %27 : vector<8x32xbf16>
    %c0_15 = arith.constant 0 : index
    %c0_16 = arith.constant 0 : index
    %c32_17 = arith.constant 32 : index
    %29 = vector.load %arg3[%c0_15, %c0_16, %c32_17] : memref<1x16x256xbf16, #tpu.memory_space<vmem>>, vector<1x16x32xbf16>
    %30 = vector.shape_cast %29 : vector<1x16x32xbf16> to vector<16x32xbf16>
    %c0_18 = arith.constant 0 : index
    %c0_19 = arith.constant 0 : index
    %c160 = arith.constant 160 : index
    %31 = vector.load %arg3[%c0_18, %c0_19, %c160] : memref<1x16x256xbf16, #tpu.memory_space<vmem>>, vector<1x16x32xbf16>
    %32 = vector.shape_cast %31 : vector<1x16x32xbf16> to vector<16x32xbf16>
    %cst_20 = arith.constant dense<0.000000e+00> : vector<8x16xf32>
    %33 = tpu.matmul %28, %30, %cst_20 {dimension_numbers = #tpu.dot_dimension_numbers<[1], [1], [0], [0], [0, 0, 1, 0], [], []>} : vector<8x32xbf16>, vector<16x32xbf16>, vector<8x16xf32> -> vector<8x16xf32>
    %cst_21 = arith.constant dense<0xFF800000> : vector<8xf32>
    %34 = vector.multi_reduction <maximumf>, %33, %cst_21 [1] : vector<8x16xf32> to vector<8xf32>
    %35 = vector.shape_cast %34 : vector<8xf32> to vector<8x1xf32>
    %36 = vector.broadcast %35 : vector<8x1xf32> to vector<8x16xf32>
    %37 = arith.subf %33, %36 : vector<8x16xf32>
    %38 = math.exp %37 : vector<8x16xf32>
    %cst_22 = arith.constant dense<0.000000e+00> : vector<8xf32>
    %39 = vector.multi_reduction <add>, %38, %cst_22 [1] : vector<8x16xf32> to vector<8xf32>
    %40 = vector.shape_cast %39 : vector<8xf32> to vector<8x1xf32>
    %41 = arith.truncf %38 : vector<8x16xf32> to vector<8x16xbf16>
    %cst_23 = arith.constant dense<0.000000e+00> : vector<8x32xf32>
    %42 = tpu.matmul %41, %32, %cst_23 {dimension_numbers = #tpu.dot_dimension_numbers<[1], [0], [0], [1], [0, 0, 1, 1], [], []>} : vector<8x16xbf16>, vector<16x32xbf16>, vector<8x32xf32> -> vector<8x32xf32>
    %43 = tpu.reciprocal %40 {approx = true} : vector<8x1xf32> -> vector<8x1xf32>
    %44 = vector.broadcast %43 : vector<8x1xf32> to vector<8x32xf32>
    %45 = arith.mulf %42, %44 : vector<8x32xf32>
    %46 = arith.truncf %45 : vector<8x32xf32> to vector<8x32xbf16>
    %c0_24 = arith.constant 0 : index
    %c0_25 = arith.constant 0 : index
    %c64 = arith.constant 64 : index
    %47 = vector.load %arg2[%c0_24, %c0_25, %c64] : memref<1x8x128xbf16, #tpu.memory_space<vmem>>, vector<1x8x32xbf16>
    %48 = vector.shape_cast %47 : vector<1x8x32xbf16> to vector<8x32xbf16>
    %cst_26 = arith.constant 1.767580e-01 : bf16
    %49 = vector.broadcast %cst_26 : bf16 to vector<8x32xbf16>
    %50 = arith.mulf %48, %49 : vector<8x32xbf16>
    %c0_27 = arith.constant 0 : index
    %c0_28 = arith.constant 0 : index
    %c64_29 = arith.constant 64 : index
    %51 = vector.load %arg3[%c0_27, %c0_28, %c64_29] : memref<1x16x256xbf16, #tpu.memory_space<vmem>>, vector<1x16x32xbf16>
    %52 = vector.shape_cast %51 : vector<1x16x32xbf16> to vector<16x32xbf16>
    %c0_30 = arith.constant 0 : index
    %c0_31 = arith.constant 0 : index
    %c192 = arith.constant 192 : index
    %53 = vector.load %arg3[%c0_30, %c0_31, %c192] : memref<1x16x256xbf16, #tpu.memory_space<vmem>>, vector<1x16x32xbf16>
    %54 = vector.shape_cast %53 : vector<1x16x32xbf16> to vector<16x32xbf16>
    %cst_32 = arith.constant dense<0.000000e+00> : vector<8x16xf32>
    %55 = tpu.matmul %50, %52, %cst_32 {dimension_numbers = #tpu.dot_dimension_numbers<[1], [1], [0], [0], [0, 0, 1, 0], [], []>} : vector<8x32xbf16>, vector<16x32xbf16>, vector<8x16xf32> -> vector<8x16xf32>
    %cst_33 = arith.constant dense<0xFF800000> : vector<8xf32>
    %56 = vector.multi_reduction <maximumf>, %55, %cst_33 [1] : vector<8x16xf32> to vector<8xf32>
    %57 = vector.shape_cast %56 : vector<8xf32> to vector<8x1xf32>
    %58 = vector.broadcast %57 : vector<8x1xf32> to vector<8x16xf32>
    %59 = arith.subf %55, %58 : vector<8x16xf32>
    %60 = math.exp %59 : vector<8x16xf32>
    %cst_34 = arith.constant dense<0.000000e+00> : vector<8xf32>
    %61 = vector.multi_reduction <add>, %60, %cst_34 [1] : vector<8x16xf32> to vector<8xf32>
    %62 = vector.shape_cast %61 : vector<8xf32> to vector<8x1xf32>
    %63 = arith.truncf %60 : vector<8x16xf32> to vector<8x16xbf16>
    %cst_35 = arith.constant dense<0.000000e+00> : vector<8x32xf32>
    %64 = tpu.matmul %63, %54, %cst_35 {dimension_numbers = #tpu.dot_dimension_numbers<[1], [0], [0], [1], [0, 0, 1, 1], [], []>} : vector<8x16xbf16>, vector<16x32xbf16>, vector<8x32xf32> -> vector<8x32xf32>
    %65 = tpu.reciprocal %62 {approx = true} : vector<8x1xf32> -> vector<8x1xf32>
    %66 = vector.broadcast %65 : vector<8x1xf32> to vector<8x32xf32>
    %67 = arith.mulf %64, %66 : vector<8x32xf32>
    %68 = arith.truncf %67 : vector<8x32xf32> to vector<8x32xbf16>
    %c0_36 = arith.constant 0 : index
    %c0_37 = arith.constant 0 : index
    %c96 = arith.constant 96 : index
    %69 = vector.load %arg2[%c0_36, %c0_37, %c96] : memref<1x8x128xbf16, #tpu.memory_space<vmem>>, vector<1x8x32xbf16>
    %70 = vector.shape_cast %69 : vector<1x8x32xbf16> to vector<8x32xbf16>
    %cst_38 = arith.constant 1.767580e-01 : bf16
    %71 = vector.broadcast %cst_38 : bf16 to vector<8x32xbf16>
    %72 = arith.mulf %70, %71 : vector<8x32xbf16>
    %c0_39 = arith.constant 0 : index
    %c0_40 = arith.constant 0 : index
    %c96_41 = arith.constant 96 : index
    %73 = vector.load %arg3[%c0_39, %c0_40, %c96_41] : memref<1x16x256xbf16, #tpu.memory_space<vmem>>, vector<1x16x32xbf16>
    %74 = vector.shape_cast %73 : vector<1x16x32xbf16> to vector<16x32xbf16>
    %c0_42 = arith.constant 0 : index
    %c0_43 = arith.constant 0 : index
    %c224 = arith.constant 224 : index
    %75 = vector.load %arg3[%c0_42, %c0_43, %c224] : memref<1x16x256xbf16, #tpu.memory_space<vmem>>, vector<1x16x32xbf16>
    %76 = vector.shape_cast %75 : vector<1x16x32xbf16> to vector<16x32xbf16>
    %cst_44 = arith.constant dense<0.000000e+00> : vector<8x16xf32>
    %77 = tpu.matmul %72, %74, %cst_44 {dimension_numbers = #tpu.dot_dimension_numbers<[1], [1], [0], [0], [0, 0, 1, 0], [], []>} : vector<8x32xbf16>, vector<16x32xbf16>, vector<8x16xf32> -> vector<8x16xf32>
    %cst_45 = arith.constant dense<0xFF800000> : vector<8xf32>
    %78 = vector.multi_reduction <maximumf>, %77, %cst_45 [1] : vector<8x16xf32> to vector<8xf32>
    %79 = vector.shape_cast %78 : vector<8xf32> to vector<8x1xf32>
    %80 = vector.broadcast %79 : vector<8x1xf32> to vector<8x16xf32>
    %81 = arith.subf %77, %80 : vector<8x16xf32>
    %82 = math.exp %81 : vector<8x16xf32>
    %cst_46 = arith.constant dense<0.000000e+00> : vector<8xf32>
    %83 = vector.multi_reduction <add>, %82, %cst_46 [1] : vector<8x16xf32> to vector<8xf32>
    %84 = vector.shape_cast %83 : vector<8xf32> to vector<8x1xf32>
    %85 = arith.truncf %82 : vector<8x16xf32> to vector<8x16xbf16>
    %cst_47 = arith.constant dense<0.000000e+00> : vector<8x32xf32>
    %86 = tpu.matmul %85, %76, %cst_47 {dimension_numbers = #tpu.dot_dimension_numbers<[1], [0], [0], [1], [0, 0, 1, 1], [], []>} : vector<8x16xbf16>, vector<16x32xbf16>, vector<8x32xf32> -> vector<8x32xf32>
    %87 = tpu.reciprocal %84 {approx = true} : vector<8x1xf32> -> vector<8x1xf32>
    %88 = vector.broadcast %87 : vector<8x1xf32> to vector<8x32xf32>
    %89 = arith.mulf %86, %88 : vector<8x32xf32>
    %90 = arith.truncf %89 : vector<8x32xf32> to vector<8x32xbf16>
    %91 = tpu.concatenate %24, %46, %68, %90 in 1 : vector<8x32xbf16>, vector<8x32xbf16>, vector<8x32xbf16>, vector<8x32xbf16> -> vector<8x128xbf16>
    %c0_48 = arith.constant 0 : index
    %c0_49 = arith.constant 0 : index
    %92 = vector.load %arg8[%c0_48, %c0_49] : memref<8x128xf32, #tpu.memory_space<vmem>>, vector<8x128xf32>
    %c0_50 = arith.constant 0 : index
    %c0_51 = arith.constant 0 : index
    %93 = vector.load %arg4[%c0_50, %c0_51] : memref<128x128xbf16, #tpu.memory_space<vmem>>, vector<128x128xbf16>
    %cst_52 = arith.constant dense<0.000000e+00> : vector<8x128xf32>
    %94 = tpu.matmul %91, %93, %cst_52 {dimension_numbers = #tpu.dot_dimension_numbers<[1], [0], [0], [1], [0, 0, 1, 1], [], []>} : vector<8x128xbf16>, vector<128x128xbf16>, vector<8x128xf32> -> vector<8x128xf32>
    %95 = arith.addf %92, %94 : vector<8x128xf32>
    %c0_53 = arith.constant 0 : index
    %c0_54 = arith.constant 0 : index
    %96 = vector.load %arg8[%c0_53, %c0_54] : memref<8x128xf32, #tpu.memory_space<vmem>>, vector<8x128xf32>
    tpu.vector_store %arg8[%c0_53, %c0_54], %95 {strides = array<i32>} : memref<8x128xf32, #tpu.memory_space<vmem>>, vector<8x128xf32>,
    %c0_i32_55 = arith.constant 0 : i32
    %97 = arith.cmpi eq, %arg1, %c0_i32_55 : i32
    %98 = arith.extui %97 : i1 to i32
    %c0_i32_56 = arith.constant 0 : i32
    %99 = arith.cmpi ne, %98, %c0_i32_56 : i32
    scf.if %99 {
      %c0_57 = arith.constant 0 : index
      %c0_58 = arith.constant 0 : index
      %100 = vector.load %arg8[%c0_57, %c0_58] : memref<8x128xf32, #tpu.memory_space<vmem>>, vector<8x128xf32>
      %101 = arith.truncf %100 : vector<8x128xf32> to vector<8x128xbf16>
      %c0_59 = arith.constant 0 : index
      %c0_60 = arith.constant 0 : index
      %c0_61 = arith.constant 0 : index
      %102 = vector.load %arg7[%c0_59, %c0_60, %c0_61] : memref<1x8x128xbf16, #tpu.memory_space<vmem>>, vector<1x8x128xbf16>
      %103 = vector.shape_cast %102 : vector<1x8x128xbf16> to vector<8x128xbf16>
      %104 = vector.shape_cast %101 : vector<8x128xbf16> to vector<1x8x128xbf16>
      tpu.vector_store %arg7[%c0_59, %c0_60, %c0_61], %104 {strides = array<i32>} : memref<1x8x128xbf16, #tpu.memory_space<vmem>>, vector<1x8x128xbf16>,
    } else {
    }
    return
  }
  func.func @transform_0(%arg0: i32, %arg1: i32) -> (i32, i32, i32) {
    %c0_i32 = arith.constant 0 : i32
    %c0_i32_0 = arith.constant 0 : i32
    return %arg0, %c0_i32, %arg1 : i32, i32, i32
  }
  func.func @transform_1(%arg0: i32, %arg1: i32) -> (i32, i32, i32) {
    %c0_i32 = arith.constant 0 : i32
    %c0_i32_0 = arith.constant 0 : i32
    return %arg0, %c0_i32, %arg1 : i32, i32, i32
  }
  func.func @transform_2(%arg0: i32, %arg1: i32) -> (i32, i32) {
    %c0_i32 = arith.constant 0 : i32
    %c0_i32_0 = arith.constant 0 : i32
    return %arg1, %c0_i32 : i32, i32
  }
  func.func @transform_3(%arg0: i32, %arg1: i32) -> (i32, i32) {
    %c0_i32 = arith.constant 0 : i32
    %c0_i32_0 = arith.constant 0 : i32
    %c0_i32_1 = arith.constant 0 : i32
    return %c0_i32, %c0_i32_0 : i32, i32
  }
  func.func @transform_4(%arg0: i32, %arg1: i32) -> (i32, i32, i32) {
    %c0_i32 = arith.constant 0 : i32
    %c0_i32_0 = arith.constant 0 : i32
    %c0_i32_1 = arith.constant 0 : i32
    return %arg0, %c0_i32, %c0_i32_0 : i32, i32, i32
  }
  func.func @transform_5(%arg0: i32, %arg1: i32) -> (i32, i32, i32) {
    %c0_i32 = arith.constant 0 : i32
    %c0_i32_0 = arith.constant 0 : i32
    %c0_i32_1 = arith.constant 0 : i32
    return %arg0, %c0_i32, %c0_i32_0 : i32, i32, i32
  }
}

</mosaic_0001>

<bundles_post_ra>
// kernel: text_decoder_forward.15
= control target key start
LH: loop header
LB: loop body
LE: loop exit
PB: predicated region body
PF: predicated region fallthrough
CT: control target
= control target key end

     0   :  { %v266_v3 = vmov 0.0   ;;  %vm267_vm0 = vmmov 0   ;;  %s337_s0 = inlined_call_operand.vmem [shape: bf16[16,128], index: 0, kind: input, shape index: {}]   ;;  %s338_s3 = inlined_call_operand.vmem [shape: bf16[128,128], index: 3, kind: input, shape index: {}]   ;;  %s339_s1 = inlined_call_operand.vmem [shape: f32[1,128], index: 1, kind: input, shape index: {}]   ;;  %s340_s2 = inlined_call_operand.vmem [shape: f32[1,128], index: 2, kind: input, shape index: {}]   ;;  %s341_s4 = inlined_call_operand.vmem [shape: f32[1,128], index: 4, kind: input, shape index: {}]   ;;  %s342_s5 = inlined_call_operand.vmem [shape: bf16[16,128], index: 5, kind: output, shape index: {}]  }
   0x1   :  { %v215_v0 = vld [vmem:[%s337_s0] sm:$0xff]   ;;  %232 = vmatprep.subr.bf16.mxu0 %v266_v3  ;;  %v255_v13 = vld [vmem:[%s338_s3 + $0x8] sm:$0xff]   ;;  %v256_v14 = vld [vmem:[%s338_s3 + $0x10] sm:$0xff]   ;;  %248 = vmatprep.mubr.msk.bf16.mxu0 %vm267_vm0, %v266_v3 }
   0x2   :  { %v216_v1 = vunpack.c.l.bf16 %v215_v0  ;;  %v217_v2 = vunpack.c.h.bf16 %v215_v0  ;;  %v254_v4 = vld [vmem:[%s338_s3] sm:$0xff]   ;;  %v257_v15 = vld [vmem:[%s338_s3 + $0x18] sm:$0xff]   ;;  %v259_v17 = vld [vmem:[%s338_s3 + $0x28] sm:$0xff]  }
   0x3   :  { %233 = vmatpush3.bf16.msra.mxu0 %v254_v4  ;;  %v258_v16 = vld [vmem:[%s338_s3 + $0x20] sm:$0xff]   ;;  %v260_v18 = vld [vmem:[%s338_s3 + $0x30] sm:$0xff]   ;;  %v261_v19 = vld [vmem:[%s338_s3 + $0x38] sm:$0xff]  }
   0x4   :  { %29 = vadd.xlane.f32.xlu0 %v216_v1  ;;  %234 = vmatprep.subr.bf16.mxu0 %v266_v3  ;;  %v199_v28 = vld [vmem:[%s339_s1] ss:$0 sm:$0xff] }
   0x5   :  { %v200_v32 = vld [vmem:[%s340_s2] ss:$0 sm:$0xff] }
   0x6   :  { %v201_v37 = vld [vmem:[%s341_s4] ss:$0 sm:$0xff] }
   0x7   :  { %235 = vmatpush3.bf16.msra.mxu0 %v255_v13 }
   0x8   :  { %31 = vadd.xlane.f32.xlu0 %v217_v2  ;;  %236 = vmatprep.subr.bf16.mxu0 %v266_v3 }
   0xb   :  { %237 = vmatpush3.bf16.msra.mxu0 %v256_v14 }
   0xc   :  { %238 = vmatprep.subr.bf16.mxu0 %v266_v3 }
   0xf   :  { %239 = vmatpush3.bf16.msra.mxu0 %v257_v15 }
  0x10   :  { %240 = vmatprep.subr.bf16.mxu0 %v266_v3 }
  0x13   :  { %241 = vmatpush3.bf16.msra.mxu0 %v258_v16 }
  0x14   :  { %242 = vmatprep.subr.bf16.mxu0 %v266_v3 }
  0x17   :  { %243 = vmatpush3.bf16.msra.mxu0 %v259_v17 }
  0x18   :  { %244 = vmatprep.subr.bf16.mxu0 %v266_v3 }
  0x1b   :  { %245 = vmatpush3.bf16.msra.mxu0 %v260_v18 }
  0x1c   :  { %246 = vmatprep.subr.bf16.mxu0 %v266_v3 }
  0x1f   :  { %247 = vmatpush3.bf16.msra.mxu0 %v261_v19 }
  0x91   :  { %v30_v5 = vpop.xlane.xlu0 %29 }
  0x92   :  { %v34_v6 = vmul.f32 0.0078125, %v30_v5 }
  0x94   :  { %v36_v7 = vsub.f32 %v216_v1, %v34_v6 }
  0x95   :  { %v32_v8 = vpop.xlane.xlu0 %31 }
  0x96   :  { %v35_v9 = vmul.f32 0.0078125, %v32_v8  ;;  %v38_v10 = vmul.f32 %v36_v7, %v36_v7 }
  0x98   :  { %v37_v11 = vsub.f32 %v217_v2, %v35_v9  ;;  %40 = vadd.xlane.f32.xlu1 %v38_v10 }
  0x9a   :  { %v39_v12 = vmul.f32 %v37_v11, %v37_v11 }
  0x9c   :  { %42 = vadd.xlane.f32.xlu1 %v39_v12 }
 0x125   :  { %v41_v20 = vpop.xlane.xlu1 %40 }
 0x126   :  { %v44_v21 = vmul.f32 0.0078125, %v41_v20 }
 0x128   :  { %v46_v22 = vadd.f32 1e-05, %v44_v21 }
 0x129   :  { %v43_v23 = vpop.xlane.xlu1 %42 }
 0x12a   :  { %262 = vrsqrt.f32 %v46_v22  ;;  %v45_v24 = vmul.f32 0.0078125, %v43_v23 }
 0x12c   :  { %v47_v25 = vadd.f32 1e-05, %v45_v24 }
 0x12e   :  { %264 = vrsqrt.f32 %v47_v25 }
 0x134   :  { %v263_v26 = vpop.eup %262 }
 0x135   :  { %v50_v27 = vmul.f32 %v263_v26, %v36_v7 }
 0x137   :  { %v59_v31 = vmul.f32 %v199_v28, %v50_v27 }
 0x138   :  { %v265_v29 = vpop.eup %264 }
 0x139   :  { %v51_v30 = vmul.f32 %v265_v29, %v37_v11  ;;  %v68_v34 = vadd.f32 %v200_v32, %v59_v31 }
 0x13b   :  { %v60_v33 = vmul.f32 %v199_v28, %v51_v30 }
 0x13d   :  { %v69_v35 = vadd.f32 %v200_v32, %v60_v33 }
 0x13f   :  { %v70_v36 = vpack.c.bf16 %v69_v35, %v68_v34 }
 0x141   :  { %249 = vmatmul.mubr.bf16.vlgmr.msra.gmra.mrb[0].mxu0 %v70_v36 }
 0x214   :  { %v178_v38 = vpop.f32.mrb[0].mxu0 }
 0x215   :  { %v250_v39 = vpop.f32.mrb[1].mxu0  ;;  %v179_v41 = vadd.f32 %v201_v37, %v178_v38 }
 0x216   :  { %v181_v40 = vpop.f32.mrb[2].mxu0 }
 0x217   :  { %v182_v42 = vadd.f32 %v201_v37, %v181_v40  ;;  %v251_v43 = vpop.f32.mrb[3].mxu0 }
 0x219   :  { %v221_v44 = vpack.c.bf16 %v182_v42, %v179_v41 }
 0x21b   :  { %222 = vst [vmem:[%s342_s5] sm:$0xff] %v221_v44  }

// kernel: text_decoder_forward.13
= control target key start
LH: loop header
LB: loop body
LE: loop exit
PB: predicated region body
PF: predicated region fallthrough
CT: control target
= control target key end

     0   :  { %v468_v4 = vmov 0.0   ;;  %v469_v31 = vmov 0   ;;  %vm470_vm0 = vmmov 0   ;;  %v107_v54 = vlaneseq  ;;  %s616_s0 = inlined_call_operand.vmem [shape: bf16[16,128], index: 0, kind: input, shape index: {}]   ;;  %s617_s3 = inlined_call_operand.vmem [shape: bf16[128,384], index: 3, kind: input, shape index: {}]   ;;  %s618_s1 = inlined_call_operand.vmem [shape: f32[1,128], index: 1, kind: input, shape index: {}]   ;;  %s619_s2 = inlined_call_operand.vmem [shape: f32[1,128], index: 2, kind: input, shape index: {}]   ;;  %s620_s4 = inlined_call_operand.vmem [shape: f32[1,384], index: 4, kind: input, shape index: {}]   ;;  %s621_s5 = inlined_call_operand.vmem [shape: bf16[16,384], index: 5, kind: output, shape index: {}]  }
   0x1   :  { %v397_v0 = vld [vmem:[%s616_s0] sm:$0xff]   ;;  %409 = vmatprep.subr.bf16.mxu1 %v468_v4  ;;  %v435_v6 = vld [vmem:[%s617_s3 + $0x8] ss:$12 sps:$4 sm:$0xff]   ;;  %v442_v19 = vld [vmem:[%s617_s3 + $0x30] ss:$12 sps:$4 sm:$0xff]   ;;  %282 = vmatprep.mubr.bf16.mxu0 %v469_v31 }
   0x2   :  { %v398_v1 = vunpack.c.l.bf16 %v397_v0  ;;  %v399_v2 = vunpack.c.h.bf16 %v397_v0  ;;  %v432_v3 = vld [vmem:[%s617_s3 + $0x4] ss:$12 sps:$4 sm:$0xff]   ;;  %v434_v5 = vld [vmem:[%s617_s3] ss:$12 sps:$4 sm:$0xff]   ;;  %v436_v7 = vld [vmem:[%s617_s3 + $0x1c] ss:$12 sps:$4 sm:$0xff]   ;;  %410 = vmatpush3.bf16.msra.mxu1 %v435_v6  ;;  %425 = vmatprep.mubr.msk.bf16.mxu1 %vm470_vm0, %v468_v4 }
   0x3   :  { %250 = vmatprep.subr.bf16.mxu0 %v432_v3  ;;  %411 = vmatprep.subr.bf16.mxu1 %v468_v4  ;;  %v438_v16 = vld [vmem:[%s617_s3 + $0x18] ss:$12 sps:$4 sm:$0xff]   ;;  %v439_v17 = vld [vmem:[%s617_s3 + $0x20] ss:$12 sps:$4 sm:$0xff]   ;;  %v446_v22 = vld [vmem:[%s617_s3 + $0x48] ss:$12 sps:$4 sm:$0xff]  }
   0x4   :  { %29 = vadd.xlane.f32.xlu0 %v398_v1  ;;  %251 = vmatpush1.bf16.msra.mxu0 %v434_v5  ;;  %v440_v18 = vld [vmem:[%s617_s3 + $0x34] ss:$12 sps:$4 sm:$0xff]   ;;  %v443_v20 = vld [vmem:[%s617_s3 + $0x38] ss:$12 sps:$4 sm:$0xff]   ;;  %v447_v23 = vld [vmem:[%s617_s3 + $0x50] ss:$12 sps:$4 sm:$0xff]  }
   0x5   :  { %252 = vmatprep.subr.bf16.mxu0 %v436_v7  ;;  %v444_v21 = vld [vmem:[%s617_s3 + $0x4c] ss:$12 sps:$4 sm:$0xff]   ;;  %v448_v24 = vld [vmem:[%s617_s3 + $0x64] ss:$12 sps:$4 sm:$0xff]   ;;  %v451_v26 = vld [vmem:[%s617_s3 + $0x68] ss:$12 sps:$4 sm:$0xff]  }
   0x6   :  { %412 = vmatpush3.bf16.msra.mxu1 %v439_v17  ;;  %v450_v25 = vld [vmem:[%s617_s3 + $0x60] ss:$12 sps:$4 sm:$0xff]   ;;  %v452_v27 = vld [vmem:[%s617_s3 + $0x7c] ss:$12 sps:$4 sm:$0xff]   ;;  %v454_v28 = vld [vmem:[%s617_s3 + $0x78] ss:$12 sps:$4 sm:$0xff]  }
   0x7   :  { %413 = vmatprep.subr.bf16.mxu1 %v468_v4  ;;  %v455_v29 = vld [vmem:[%s617_s3 + $0x80] ss:$12 sps:$4 sm:$0xff]   ;;  %v458_v32 = vld [vmem:[%s617_s3 + $0x90] ss:$12 sps:$4 sm:$0xff]   ;;  %v459_v33 = vld [vmem:[%s617_s3 + $0x98] ss:$12 sps:$4 sm:$0xff]  }
   0x8   :  { %31 = vadd.xlane.f32.xlu0 %v399_v2  ;;  %253 = vmatpush1.bf16.msra.mxu0 %v438_v16  ;;  %v456_v30 = vld [vmem:[%s617_s3 + $0x94] ss:$12 sps:$4 sm:$0xff]   ;;  %v460_v34 = vld [vmem:[%s617_s3 + $0xac] ss:$12 sps:$4 sm:$0xff]   ;;  %v463_v36 = vld [vmem:[%s617_s3 + $0xb0] ss:$12 sps:$4 sm:$0xff]  }
   0x9   :  { %254 = vmatprep.subr.bf16.mxu0 %v440_v18  ;;  %v462_v35 = vld [vmem:[%s617_s3 + $0xa8] ss:$12 sps:$4 sm:$0xff]   ;;  %v362_v45 = vld [vmem:[%s618_s1] ss:$0 sm:$0xff]  ;;  %v108_v55 = vshrl.u32 %v107_v54, 7 }
   0xa   :  { %414 = vmatpush3.bf16.msra.mxu1 %v443_v20  ;;  %v363_v49 = vld [vmem:[%s619_s2] ss:$0 sm:$0xff] }
   0xb   :  { %415 = vmatprep.subr.bf16.mxu1 %v468_v4  ;;  %v109_v56 = vsub.s32 0, %v108_v55  ;;  %v117_v57 = vsub.s32 2, %v108_v55  ;;  %v105_v58 = vld [vmem:[%s620_s4] sm:$0x7]  ;;  %v113_v59 = vsub.s32 1, %v108_v55 }
   0xc   :  { %255 = vmatpush1.bf16.msra.mxu0 %v442_v19 }
   0xd   :  { %256 = vmatprep.subr.bf16.mxu0 %v444_v21  ;;  %v110_v60 = vrot.slane %v105_v58, %v109_v56  ;;  %v118_v61 = vrot.slane %v105_v58, %v117_v57  ;;  %v114_v62 = vrot.slane %v105_v58, %v113_v59 }
   0xe   :  { %416 = vmatpush3.bf16.msra.mxu1 %v447_v23 }
   0xf   :  { %417 = vmatprep.subr.bf16.mxu1 %v468_v4 }
  0x10   :  { %257 = vmatpush1.bf16.msra.mxu0 %v446_v22 }
  0x11   :  { %258 = vmatprep.subr.bf16.mxu0 %v448_v24 }
  0x12   :  { %418 = vmatpush3.bf16.msra.mxu1 %v451_v26 }
  0x13   :  { %419 = vmatprep.subr.bf16.mxu1 %v468_v4 }
  0x14   :  { %259 = vmatpush1.bf16.msra.mxu0 %v450_v25 }
  0x15   :  { %260 = vmatprep.subr.bf16.mxu0 %v452_v27 }
  0x16   :  { %420 = vmatpush3.bf16.msra.mxu1 %v455_v29 }
  0x17   :  { %421 = vmatprep.subr.bf16.mxu1 %v468_v4 }
  0x18   :  { %261 = vmatpush1.bf16.msra.mxu0 %v454_v28 }
  0x19   :  { %262 = vmatprep.subr.bf16.mxu0 %v456_v30 }
  0x1a   :  { %422 = vmatpush3.bf16.msra.mxu1 %v459_v33 }
  0x1b   :  { %423 = vmatprep.subr.bf16.mxu1 %v468_v4 }
  0x1c   :  { %263 = vmatpush1.bf16.msra.mxu0 %v458_v32 }
  0x1d   :  { %264 = vmatprep.subr.bf16.mxu0 %v460_v34 }
  0x1e   :  { %424 = vmatpush3.bf16.msra.mxu1 %v463_v36 }
  0x20   :  { %265 = vmatpush1.bf16.msra.mxu0 %v462_v35 }
  0x91   :  { %v30_v8 = vpop.xlane.xlu0 %29 }
  0x92   :  { %v34_v9 = vmul.f32 0.0078125, %v30_v8 }
  0x94   :  { %v518_v10 = vsub.f32 %v398_v1, %v34_v9 }
  0x95   :  { %v32_v11 = vpop.xlane.xlu0 %31 }
  0x96   :  { %v35_v12 = vmul.f32 0.0078125, %v32_v11  ;;  %v38_v13 = vmul.f32 %v518_v10, %v518_v10 }
  0x98   :  { %v522_v14 = vsub.f32 %v399_v2, %v35_v12  ;;  %40 = vadd.xlane.f32.xlu1 %v38_v13 }
  0x9a   :  { %v39_v15 = vmul.f32 %v522_v14, %v522_v14 }
  0x9c   :  { %42 = vadd.xlane.f32.xlu1 %v39_v15 }
 0x125   :  { %v41_v37 = vpop.xlane.xlu1 %40 }
 0x126   :  { %v44_v38 = vmul.f32 0.0078125, %v41_v37 }
 0x128   :  { %v46_v39 = vadd.f32 1e-05, %v44_v38 }
 0x129   :  { %v43_v40 = vpop.xlane.xlu1 %42 }
 0x12a   :  { %464 = vrsqrt.f32 %v46_v39  ;;  %v45_v41 = vmul.f32 0.0078125, %v43_v40 }
 0x12c   :  { %v47_v42 = vadd.f32 1e-05, %v45_v41 }
 0x12e   :  { %466 = vrsqrt.f32 %v47_v42 }
 0x134   :  { %v465_v43 = vpop.eup %464 }
 0x135   :  { %v50_v44 = vmul.f32 %v465_v43, %v518_v10 }
 0x137   :  { %v59_v48 = vmul.f32 %v362_v45, %v50_v44 }
 0x138   :  { %v467_v46 = vpop.eup %466 }
 0x139   :  { %v51_v47 = vmul.f32 %v467_v46, %v522_v14  ;;  %v68_v51 = vadd.f32 %v363_v49, %v59_v48 }
 0x13b   :  { %v60_v50 = vmul.f32 %v362_v45, %v51_v47 }
 0x13d   :  { %v69_v52 = vadd.f32 %v363_v49, %v60_v50 }
 0x13f   :  { %v70_v53 = vpack.c.bf16 %v69_v52, %v68_v51 }
 0x141   :  { %283 = vmatmul.mubr.bf16.vlgmr.msra.gmra.mrb[0].mxu0 %v70_v53  ;;  %426 = vmatmul.mubr.bf16.vlgmr.msra.gmra.mrb[0].mxu1 %v70_v53 }
 0x214   :  { %v284_v63 = vpop.f32.mrb[0].mxu0  ;;  %v327_v0 = vpop.f32.mrb[0].mxu1 }
 0x215   :  { %v285_v1 = vadd.f32 %v284_v63, %v110_v60  ;;  %v328_v2 = vadd.f32 %v327_v0, %v118_v61  ;;  %v286_v3 = vpop.f32.mrb[1].mxu0  ;;  %v427_v4 = vpop.f32.mrb[1].mxu1 }
 0x216   :  { %v287_v5 = vadd.f32 %v286_v3, %v114_v62  ;;  %v288_v6 = vpop.f32.mrb[2].mxu0  ;;  %v330_v7 = vpop.f32.mrb[2].mxu1 }
 0x217   :  { %v393_v8 = vpack.c.bf16 %v328_v2, %v328_v2  ;;  %v289_v9 = vadd.f32 %v288_v6, %v110_v60  ;;  %v331_v10 = vadd.f32 %v330_v7, %v118_v61  ;;  %v290_v11 = vpop.f32.mrb[3].mxu0  ;;  %v428_v12 = vpop.f32.mrb[3].mxu1 }
 0x218   :  { %v392_v13 = vpack.c.bf16 %v287_v5, %v285_v1  ;;  %v291_v14 = vadd.f32 %v290_v11, %v114_v62 }
 0x219   :  { %355 = vst [vmem:[%s621_s5 + $0x8] sm:$0xf] %v393_v8  ;;  %v395_v15 = vpack.c.bf16 %v331_v10, %v331_v10 }
 0x21a   :  { %354 = vst [vmem:[%s621_s5] sm:$0xff] %v392_v13  ;;  %v394_v16 = vpack.c.bf16 %v291_v14, %v289_v9 }
 0x21b   :  { %357 = vst [vmem:[%s621_s5 + $0x14] sm:$0xf] %v395_v15 }
 0x21c   :  { %356 = vst [vmem:[%s621_s5 + $0xc] sm:$0xff] %v394_v16 }

// kernel: text_decoder_forward.16
= control target key start
LH: loop header
LB: loop body
LE: loop exit
PB: predicated region body
PF: predicated region fallthrough
CT: control target
= control target key end

     0   :  { %v348_v1 = vmov 0   ;;  %v229_v19 = vlaneseq  ;;  %s438_s1 = inlined_call_operand.vmem [shape: bf16[128,256], index: 1, kind: input, shape index: {}]   ;;  %s439_s0 = inlined_call_operand.vmem [shape: bf16[32,128], index: 0, kind: input, shape index: {}]   ;;  %s440_s2 = inlined_call_operand.vmem [shape: f32[1,256], index: 2, kind: input, shape index: {}]   ;;  %s441_s3 = inlined_call_operand.vmem [shape: bf16[32,256], index: 3, kind: output, shape index: {}]  }
   0x1   :  { %v322_v0 = vld [vmem:[%s438_s1 + $0x4] ss:$8 sps:$4 sm:$0xff]   ;;  %179 = vmatprep.mubr.bf16.mxu0 %v348_v1  ;;  %189 = vmatprep.mubr.bf16.mxu1 %v348_v1  ;;  %v324_v2 = vld [vmem:[%s438_s1] ss:$8 sps:$4 sm:$0xff]   ;;  %v325_v3 = vld [vmem:[%s438_s1 + $0x14] ss:$8 sps:$4 sm:$0xff]  }
   0x2   :  { %147 = vmatprep.subr.bf16.mxu0 %v322_v0  ;;  %305 = vmatprep.subr.bf16.mxu1 %v322_v0  ;;  %v327_v4 = vld [vmem:[%s438_s1 + $0x10] ss:$8 sps:$4 sm:$0xff]   ;;  %v328_v5 = vld [vmem:[%s438_s1 + $0x24] ss:$8 sps:$4 sm:$0xff]   ;;  %v330_v6 = vld [vmem:[%s438_s1 + $0x20] ss:$8 sps:$4 sm:$0xff]  }
   0x3   :  { %148 = vmatpush1.bf16.msra.mxu0 %v324_v2  ;;  %313 = vmatpush1.bf16.msra.mxu1 %v324_v2  ;;  %v331_v7 = vld [vmem:[%s438_s1 + $0x34] ss:$8 sps:$4 sm:$0xff]   ;;  %v333_v8 = vld [vmem:[%s438_s1 + $0x30] ss:$8 sps:$4 sm:$0xff]   ;;  %v334_v9 = vld [vmem:[%s438_s1 + $0x44] ss:$8 sps:$4 sm:$0xff]  }
   0x4   :  { %149 = vmatprep.subr.bf16.mxu0 %v325_v3  ;;  %306 = vmatprep.subr.bf16.mxu1 %v325_v3  ;;  %v336_v10 = vld [vmem:[%s438_s1 + $0x40] ss:$8 sps:$4 sm:$0xff]   ;;  %v337_v11 = vld [vmem:[%s438_s1 + $0x54] ss:$8 sps:$4 sm:$0xff]   ;;  %v339_v12 = vld [vmem:[%s438_s1 + $0x50] ss:$8 sps:$4 sm:$0xff]  }
   0x5   :  { %v340_v13 = vld [vmem:[%s438_s1 + $0x64] ss:$8 sps:$4 sm:$0xff]   ;;  %v342_v14 = vld [vmem:[%s438_s1 + $0x60] ss:$8 sps:$4 sm:$0xff]   ;;  %v343_v15 = vld [vmem:[%s438_s1 + $0x74] ss:$8 sps:$4 sm:$0xff]  }
   0x6   :  { %v345_v16 = vld [vmem:[%s438_s1 + $0x70] ss:$8 sps:$4 sm:$0xff]   ;;  %v346_v17 = vld [vmem:[%s439_s0] sm:$0xff]   ;;  %v347_v18 = vld [vmem:[%s439_s0 + $0x8] sm:$0xff]   ;;  %v230_v20 = vshrl.u32 %v229_v19, 7 }
   0x7   :  { %150 = vmatpush1.bf16.msra.mxu0 %v327_v4  ;;  %314 = vmatpush1.bf16.msra.mxu1 %v327_v4  ;;  %v227_v22 = vld [vmem:[%s440_s2] sm:$0x3] }
   0x8   :  { %151 = vmatprep.subr.bf16.mxu0 %v328_v5  ;;  %307 = vmatprep.subr.bf16.mxu1 %v328_v5  ;;  %v231_v21 = vsub.s32 0, %v230_v20  ;;  %v235_v23 = vsub.s32 1, %v230_v20 }
   0xa   :  { %v232_v24 = vrot.slane %v227_v22, %v231_v21  ;;  %v236_v25 = vrot.slane %v227_v22, %v235_v23 }
   0xb   :  { %152 = vmatpush1.bf16.msra.mxu0 %v330_v6  ;;  %315 = vmatpush1.bf16.msra.mxu1 %v330_v6 }
   0xc   :  { %153 = vmatprep.subr.bf16.mxu0 %v331_v7  ;;  %308 = vmatprep.subr.bf16.mxu1 %v331_v7 }
   0xf   :  { %154 = vmatpush1.bf16.msra.mxu0 %v333_v8  ;;  %316 = vmatpush1.bf16.msra.mxu1 %v333_v8 }
  0x10   :  { %155 = vmatprep.subr.bf16.mxu0 %v334_v9  ;;  %309 = vmatprep.subr.bf16.mxu1 %v334_v9 }
  0x13   :  { %156 = vmatpush1.bf16.msra.mxu0 %v336_v10  ;;  %317 = vmatpush1.bf16.msra.mxu1 %v336_v10 }
  0x14   :  { %157 = vmatprep.subr.bf16.mxu0 %v337_v11  ;;  %310 = vmatprep.subr.bf16.mxu1 %v337_v11 }
  0x17   :  { %158 = vmatpush1.bf16.msra.mxu0 %v339_v12  ;;  %318 = vmatpush1.bf16.msra.mxu1 %v339_v12 }
  0x18   :  { %159 = vmatprep.subr.bf16.mxu0 %v340_v13  ;;  %311 = vmatprep.subr.bf16.mxu1 %v340_v13 }
  0x1b   :  { %160 = vmatpush1.bf16.msra.mxu0 %v342_v14  ;;  %319 = vmatpush1.bf16.msra.mxu1 %v342_v14 }
  0x1c   :  { %161 = vmatprep.subr.bf16.mxu0 %v343_v15  ;;  %312 = vmatprep.subr.bf16.mxu1 %v343_v15 }
  0x1f   :  { %162 = vmatpush1.bf16.msra.mxu0 %v345_v16  ;;  %320 = vmatpush1.bf16.msra.mxu1 %v345_v16 }
  0x22   :  { %180 = vmatmul.mubr.bf16.vlgmr.msra.gmra.mrb[0].mxu0 %v346_v17  ;;  %190 = vmatmul.mubr.bf16.vlgmr.msra.gmra.mrb[0].mxu1 %v347_v18 }
  0xf5   :  { %v181_v26 = vpop.f32.mrb[0].mxu0  ;;  %v191_v27 = vpop.f32.mrb[0].mxu1 }
  0xf6   :  { %v239_v28 = vadd.f32 %v232_v24, %v181_v26  ;;  %v243_v29 = vadd.f32 %v232_v24, %v191_v27  ;;  %v183_v30 = vpop.f32.mrb[1].mxu0  ;;  %v193_v31 = vpop.f32.mrb[1].mxu1 }
  0xf7   :  { %v240_v32 = vadd.f32 %v236_v25, %v183_v30  ;;  %v244_v33 = vadd.f32 %v236_v25, %v193_v31  ;;  %v185_v34 = vpop.f32.mrb[2].mxu0  ;;  %v195_v35 = vpop.f32.mrb[2].mxu1 }
  0xf8   :  { %v241_v36 = vadd.f32 %v232_v24, %v185_v34  ;;  %v245_v37 = vadd.f32 %v232_v24, %v195_v35  ;;  %v187_v38 = vpop.f32.mrb[3].mxu0  ;;  %v197_v39 = vpop.f32.mrb[3].mxu1 }
  0xf9   :  { %v301_v40 = vpack.c.bf16 %v240_v32, %v239_v28  ;;  %v303_v41 = vpack.c.bf16 %v244_v33, %v243_v29  ;;  %v242_v42 = vadd.f32 %v236_v25, %v187_v38  ;;  %v246_v43 = vadd.f32 %v236_v25, %v197_v39 }
  0xfb   :  { %271 = vst [vmem:[%s441_s3] sm:$0xff] %v301_v40  ;;  %273 = vst [vmem:[%s441_s3 + $0x10] sm:$0xff] %v303_v41  ;;  %v302_v44 = vpack.c.bf16 %v242_v42, %v241_v36  ;;  %v304_v45 = vpack.c.bf16 %v246_v43, %v245_v37 }
  0xfd   :  { %272 = vst [vmem:[%s441_s3 + $0x8] sm:$0xff] %v302_v44  ;;  %274 = vst [vmem:[%s441_s3 + $0x18] sm:$0xff] %v304_v45 }

// kernel: text_decoder_forward.14
= control target key start
LH: loop header
LB: loop body
LE: loop exit
PB: predicated region body
PF: predicated region fallthrough
CT: control target
= control target key end

     0   :  { %s1104_s18 = smov 0   ;;  %s1237_s0 = inlined_call_operand.vmem [shape: bf16[2,8,384], index: 0, kind: input, shape index: {}]   ;;  %s1238_s1 = inlined_call_operand.vmem [shape: f32[8,8], index: 1, kind: input, shape index: {}]   ;;  %s1239_s2 = inlined_call_operand.vmem [shape: bf16[128,128], index: 2, kind: input, shape index: {}]   ;;  %s1240_s3 = inlined_call_operand.vmem [shape: f32[1,128], index: 3, kind: input, shape index: {}]   ;;  %s1241_s4 = inlined_call_operand.vmem [shape: bf16[2,8,128], index: 4, kind: input, shape index: {}]   ;;  %s1242_s5 = inlined_call_operand.vmem [shape: bf16[2,8,128], index: 5, kind: output, shape index: {}]  }
   0x1 LB: > { %s898_s19 = sadd.s32 4294967295, %s1067_s18   ;;  %p902_p0 = scmp.ge.s32.totalorder %s1067_s18, 1  ;;  %s1067_s18 = sphi %s1104_s18, %s15_s18  }
   0x2   : > { %p196_p1 = scmp.lt.s32.totalorder %s1067_s18, 3 }
   0x4   : > { %p197_p2 = pnand %p902_p0, %p196_p1 }
   0x5   : > { %p227_p3 = scmp.lt.s32.totalorder (!%p197_p2), %s898_s19, 1  ;;  %v1069_v0 = vmov (!%p197_p2), 0.0   ;;  %vm1070_vm0 = vmmov (!%p197_p2), 0   ;;  %vm247_vm1 = vcmask (!%p197_p2), 261120   ;;  %s1071_s24 = smov (!%p197_p2), 96   ;;  %v246_v14 = vld [vmem:[%s1238_s1] sm:$0xff] (!%p197_p2) }
   0x6   : > { %200 = sbr.rel (%p197_p2) target bundleno = 1347 (0x543), region = 40  ;;  %953 = vmatprep.subr.bf16.mxu0 (!%p197_p2), %v1069_v0  ;;  %955 = vmatprep.mubr.msk.bf16.mxu0 (!%p197_p2), %vm1070_vm0, %v1069_v0  ;;  %s1072_s25 = smov (!%p197_p2), 64   ;;  %vm294_vm2 = vcmask (!%p197_p2), 64512   ;;  %vm308_vm3 = vcmask (!%p197_p2), 1043456   ;;  %vm709_vm4 = vcmask (!%p197_p2), 523264   ;;  %vm712_vm5 = vcmask (!%p197_p2), 785408  }
   0x7   : > { %977 = vmatprep.subr.bf16.mxu1 (!%p197_p2), %v1069_v0  ;;  %979 = vmatprep.mubr.msk.bf16.mxu1 (!%p197_p2), %vm1070_vm0, %v1069_v0  ;;  %s1073_s26 = smov (!%p197_p2), 32  }
   0xd   : > { %s1244_s19 = smov (!%p227_p3, %s898_s19), 1 }
   0xe   : > { %s1021_s20 = smul.u32 12, %s1244_s19  ;;  %s904_s22 = sshll.u32 %s1244_s19, 2 }
   0xf   : > { %s239_s30 = scalar_lea.vmem %s1242_s5, %s904_s22 }
  0x10   : > { %s1124_s23 = scalar_lea.vmem %s1237_s0, %s1021_s20 }
  0x11   : > { %v242_v1 = vld [vmem:[%s1124_s23] sm:$0xf]  ;;  %v244_v2 = vld [vmem:[%s1124_s23 + $0x4] sm:$0xf]  ;;  %v245_v21 = vld [vmem:[%s1124_s23 + $0x8] sm:$0xf] }
  0x12   : > { %v243_v3 = vmul.bf16 1043676725, %v242_v1  ;;  %v252_v4 = vsel %vm247_vm1, %v244_v2, 0  ;;  %v909_v6 = vcombine.low %v244_v2, %v244_v2  ;;  %v310_v22 = vsel %vm308_vm3, %v245_v21, 0 }
  0x13   : > { %954 = vmatpush3.bf16.xpose.msra.mxu0 %v252_v4  ;;  %v911_v42 = vcombine.low %v245_v21, %v245_v21  ;;  %v1042_v21 = vld [vmem:[%s1239_s2 + $0x28] sm:$0xff]  }
  0x14   : > { %v908_v5 = vcombine.low %v243_v3, %v243_v3  ;;  %959 = vmatprep.subr.bf16.mxu0 %v1069_v0 }
  0x16   : > { %358 = vrot.lane.b32.xlu1 %v908_v5, %s1071_s24 }
  0x1a   : > { %956 = vmatmul.mubr.msk.bf16.vlgmr.msra.gmra.mrb[0].mxu0 %vm247_vm1, %v243_v3  ;;  %477 = vrot.lane.b32.xlu1 %v909_v6, %s1072_s25 }
  0x1b   : > { %961 = vmatprep.mubr.msk.bf16.mxu0 %vm1070_vm0, %v1069_v0  ;;  %960 = vmatpush3.bf16.msra.mxu0 %v310_v22 }
  0x1c   : > { %965 = vmatprep.subr.bf16.mxu0 %v1069_v0 }
  0x1e   : > { %475 = vrot.lane.b32.xlu1 %v908_v5, %s1072_s25 }
  0x22   : > { %588 = vrot.lane.b32.xlu1 %v909_v6, %s1073_s26 }
  0x26   : > { %586 = vrot.lane.b32.xlu1 %v908_v5, %s1073_s26 }
  0x88   : > { %v359_v7 = vpop.permute.xlu1 %358 }
  0x8c   : > { %v478_v8 = vpop.permute.xlu1 %477 }
  0x8d   : > { %v483_v9 = vsel %vm247_vm1, %v478_v8, 0 }
  0x8e   : > { %978 = vmatpush3.bf16.xpose.msra.mxu1 %v483_v9 }
  0x8f   : > { %989 = vmatprep.subr.bf16.mxu1 %v1069_v0 }
  0x90   : > { %v476_v10 = vpop.permute.xlu1 %475 }
  0x94   : > { %v589_v11 = vpop.permute.xlu1 %588 }
  0x95   : > { %980 = vmatmul.mubr.msk.bf16.vlgmr.msra.gmra.mrb[0].mxu1 %vm247_vm1, %v476_v10  ;;  %v594_v12 = vsel %vm247_vm1, %v589_v11, 0 }
  0x96   : > { %990 = vmatpush3.bf16.xpose.msra.mxu1 %v594_v12  ;;  %991 = vmatprep.mubr.msk.bf16.mxu1 %vm1070_vm0, %v1069_v0 }
  0x97   : > { %1001 = vmatprep.subr.bf16.mxu1 %v1069_v0 }
  0x98   : > { %v587_v13 = vpop.permute.xlu1 %586 }
  0x9d   : > { %992 = vmatmul.mubr.msk.bf16.vlgmr.msra.gmra.mrb[4].mxu1 %vm247_vm1, %v587_v13 }
  0x9e   : > { %1017 = vmatprep.mubr.msk.bf16.mxu1 %vm1070_vm0, %v1069_v0 }
  0xed   : > { %v288_v15 = vpop.f32.mrb[0].mxu0 }
  0xee   : > { %v289_v16 = vadd.f32 %v288_v15, %v246_v14  ;;  %v957_v17 = vpop.f32.mrb[1].mxu0  ;;  %v1037_v15 = vld [vmem:[%s1239_s2] sm:$0xff]  }
  0xef   : > { %v291_v18 = vpop.f32.mrb[2].mxu0  ;;  %1002 = vmatpush3.bf16.msra.mxu1 %v1037_v15  ;;  %v1039_v17 = vld [vmem:[%s1239_s2 + $0x10] sm:$0xff]  }
  0xf0   : > { %v958_v19 = vpop.f32.mrb[3].mxu0  ;;  %v295_v20 = vsel %vm294_vm2, %v289_v16, -inf  ;;  %1003 = vmatprep.subr.bf16.mxu1 %v1069_v0  ;;  %v1040_v18 = vld [vmem:[%s1239_s2 + $0x18] sm:$0xff]  }
  0xf1   : > { %296 = vmax.xlane.f32.xlu0 %v295_v20  ;;  %v1041_v20 = vld [vmem:[%s1239_s2 + $0x20] sm:$0xff]  }
 0x107   : > { %363 = vrot.lane.b32.xlu0 %v909_v6, %s1071_s24 }
 0x168   : > { %v519_v23 = vpop.f32.mrb[0].mxu1 }
 0x169   : > { %v520_v24 = vadd.f32 %v519_v23, %v246_v14  ;;  %v981_v25 = vpop.f32.mrb[1].mxu1 }
 0x16a   : > { %v522_v26 = vpop.f32.mrb[2].mxu1  ;;  %v1043_v25 = vld [vmem:[%s1239_s2 + $0x30] sm:$0xff]  }
 0x16b   : > { %v525_v27 = vsel %vm294_vm2, %v520_v24, -inf  ;;  %v982_v28 = vpop.f32.mrb[3].mxu1 }
 0x16c   : > { %526 = vmax.xlane.f32.xlu0 %v525_v27 }
 0x170   : > { %v630_v29 = vpop.f32.mrb[4].mxu1 }
 0x171   : > { %v631_v30 = vadd.f32 %v630_v29, %v246_v14  ;;  %v993_v31 = vpop.f32.mrb[5].mxu1  ;;  %v1044_v29 = vld [vmem:[%s1239_s2 + $0x38] sm:$0xff]  }
 0x172   : > { %v633_v32 = vpop.f32.mrb[6].mxu1 }
 0x173   : > { %v636_v33 = vsel %vm294_vm2, %v631_v30, -inf  ;;  %v994_v34 = vpop.f32.mrb[7].mxu1 }
 0x174   : > { %637 = vmax.xlane.f32.xlu1 %v636_v33 }
 0x17e   : > { %v297_v35 = vpop.xlane.xlu0 %296 }
 0x17f   : > { %v298_v36 = vsub.f32 %v289_v16, %v297_v35  ;;  %v1038_v16 = vld [vmem:[%s1239_s2 + $0x8] sm:$0xff]  }
 0x180   : > { %1004 = vmatpush3.bf16.msra.mxu1 %v1038_v16 }
 0x181   : > { %v299_v37 = vmul.f32 1.442695, %v298_v36  ;;  %1005 = vmatprep.subr.bf16.mxu1 %v1069_v0 }
 0x182   : > { %v364_v38 = vpop.permute.xlu0 %363  ;;  %424 = vrot.lane.b32.xlu0 %v911_v42, %s1071_s24 }
 0x183   : > { %1045 = vpow2.f32 %v299_v37  ;;  %v369_v40 = vsel %vm247_vm1, %v364_v38, 0 }
 0x184   : > { %1006 = vmatpush3.bf16.msra.mxu1 %v1039_v17 }
 0x185   : > { %1007 = vmatprep.subr.bf16.mxu1 %v1069_v0 }
 0x188   : > { %1008 = vmatpush3.bf16.msra.mxu1 %v1040_v18 }
 0x189   : > { %1009 = vmatprep.subr.bf16.mxu1 %v1069_v0 }
 0x18c   : > { %1010 = vmatpush3.bf16.msra.mxu1 %v1041_v20 }
 0x18d   : > { %v1046_v39 = vpop.eup %1045  ;;  %1011 = vmatprep.subr.bf16.mxu1 %v1069_v0 }
 0x18e   : > { %v304_v41 = vpack.c.bf16 %v1046_v39, %v1046_v39  ;;  %v301_v12 = vsel %vm294_vm2, %v1046_v39, 0.0 }
 0x190   : > { %962 = vmatmul.mubr.msk.bf16.vlgmr.msra.gmra.mrb[4].mxu0 %vm294_vm2, %v304_v41  ;;  %1012 = vmatpush3.bf16.msra.mxu1 %v1042_v21 }
 0x191   : > { %966 = vmatpush3.bf16.xpose.msra.mxu0 %v369_v40  ;;  %967 = vmatprep.mubr.msk.bf16.mxu0 %vm1070_vm0, %v1069_v0 }
 0x192   : > { %971 = vmatprep.subr.bf16.mxu0 %v1069_v0  ;;  %1013 = vmatprep.subr.bf16.mxu1 %v1069_v0 }
 0x194   : > { %1014 = vmatpush3.bf16.msra.mxu1 %v1043_v25 }
 0x195   : > { %1015 = vmatprep.subr.bf16.mxu1 %v1069_v0 }
 0x198   : > { %968 = vmatmul.mubr.msk.bf16.vlgmr.msra.gmra.mrb[8].mxu0 %vm247_vm1, %v359_v7  ;;  %1016 = vmatpush3.bf16.msra.mxu1 %v1044_v29 }
 0x199   : > { %973 = vmatprep.mubr.msk.bf16.mxu0 %vm1070_vm0, %v1069_v0 }
 0x1f9   : > { %v527_v53 = vpop.xlane.xlu0 %526 }
 0x1fa   : > { %v528_v56 = vsub.f32 %v520_v24, %v527_v53 }
 0x1fc   : > { %v529_v57 = vmul.f32 1.442695, %v528_v56 }
 0x1fd   : > { %v425_v54 = vpop.permute.xlu0 %424 }
 0x1fe   : > { %v430_v55 = vsel %vm308_vm3, %v425_v54, 0  ;;  %1047 = vpow2.f32 %v529_v57 }
 0x1ff   : > { %972 = vmatpush3.bf16.msra.mxu0 %v430_v55 }
 0x200   : > { %983 = vmatprep.subr.bf16.mxu0 %v1069_v0 }
 0x201   : > { %v638_v60 = vpop.xlane.xlu1 %637 }
 0x202   : > { %v639_v61 = vsub.f32 %v631_v30, %v638_v60 }
 0x204   : > { %v640_v1 = vmul.f32 1.442695, %v639_v61 }
 0x208   : > { %v1048_v58 = vpop.eup %1047 }
 0x209   : > { %v531_v59 = vsel %vm294_vm2, %v1048_v58, 0.0  ;;  %v534_v13 = vpack.c.bf16 %v1048_v58, %v1048_v58 }
 0x263   : > { %v1167_v43 = vpop.f32.mrb[4].mxu0 }
 0x264   : > { %v963_v44 = vpop.f32.mrb[5].mxu0 }
 0x265   : > { %v349_v45 = vpop.f32.mrb[6].mxu0 }
 0x266   : > { %v964_v46 = vpop.f32.mrb[7].mxu0 }
 0x26b   : > { %v405_v47 = vpop.f32.mrb[8].mxu0 }
 0x26c   : > { %v406_v48 = vadd.f32 %v405_v47, %v246_v14  ;;  %v969_v49 = vpop.f32.mrb[9].mxu0 }
 0x26d   : > { %v408_v50 = vpop.f32.mrb[10].mxu0 }
 0x26e   : > { %v970_v51 = vpop.f32.mrb[11].mxu0  ;;  %v411_v52 = vsel %vm294_vm2, %v406_v48, -inf }
 0x26f   : > { %412 = vmax.xlane.f32.xlu1 %v411_v52 }
 0x280   : > { %535 = vrot.lane.b32.xlu1 %v911_v42, %s1072_s25 }
 0x284   : > { %646 = vrot.lane.b32.xlu1 %v911_v42, %s1073_s26 }
 0x2a8   : > { %532 = vadd.xlane.f32.xlu1 %v531_v59 }
 0x2fc   : > { %v413_v62 = vpop.xlane.xlu1 %412 }
 0x2fd   : > { %v414_v63 = vsub.f32 %v406_v48, %v413_v62 }
 0x2ff   : > { %v415_v2 = vmul.f32 1.442695, %v414_v63 }
 0x300   : > { %v536_v3 = vpop.permute.xlu1 %535 }
 0x301   : > { %1049 = vpow2.f32 %v415_v2  ;;  %v541_v5 = vsel %vm308_vm3, %v536_v3, 0 }
 0x302   : > { %1051 = vpow2.f32 %v640_v1 }
 0x304   : > { %v647_v10 = vpop.permute.xlu1 %646 }
 0x305   : > { %v652_v11 = vsel %vm308_vm3, %v647_v10, 0 }
 0x30b   : > { %v1050_v4 = vpop.eup %1049 }
 0x30c   : > { %v417_v6 = vsel %vm294_vm2, %v1050_v4, 0.0  ;;  %v420_v7 = vpack.c.bf16 %v1050_v4, %v1050_v4  ;;  %v1052_v8 = vpop.eup %1051 }
 0x30d   : > { %418 = vadd.xlane.f32.xlu0 %v417_v6  ;;  %v642_v9 = vsel %vm294_vm2, %v1052_v8, 0.0  ;;  %v645_v14 = vpack.c.bf16 %v1052_v8, %v1052_v8 }
 0x30e   : > { %974 = vmatmul.mubr.msk.bf16.vlgmr.msra.gmra.mrb[12].mxu0 %vm294_vm2, %v420_v7 }
 0x30f   : > { %984 = vmatpush3.bf16.msra.mxu0 %v541_v5  ;;  %985 = vmatprep.mubr.msk.bf16.mxu0 %vm1070_vm0, %v1069_v0 }
 0x310   : > { %995 = vmatprep.subr.bf16.mxu0 %v1069_v0 }
 0x311   : > { %643 = vadd.xlane.f32.xlu0 %v642_v9 }
 0x315   : > { %302 = vadd.xlane.f32.xlu0 %v301_v12 }
 0x316   : > { %986 = vmatmul.mubr.msk.bf16.vlgmr.msra.gmra.mrb[16].mxu0 %vm294_vm2, %v534_v13 }
 0x317   : > { %996 = vmatpush3.bf16.msra.mxu0 %v652_v11  ;;  %997 = vmatprep.mubr.msk.bf16.mxu0 %vm1070_vm0, %v1069_v0 }
 0x31e   : > { %998 = vmatmul.mubr.msk.bf16.vlgmr.msra.gmra.mrb[20].mxu0 %vm294_vm2, %v645_v14 }
 0x335   : > { %v533_v22 = vpop.xlane.xlu1 %532 }
 0x39a   : > { %v419_v19 = vpop.xlane.xlu0 %418 }
 0x39b   : > { %1053 = vrcp.f32 %v419_v19 }
 0x39c   : > { %1055 = vrcp.f32 %v533_v22 }
 0x39e   : > { %v644_v30 = vpop.xlane.xlu0 %643 }
 0x39f   : > { %1057 = vrcp.f32 %v644_v30 }
 0x3a2   : > { %v303_v47 = vpop.xlane.xlu0 %302 }
 0x3a3   : > { %1059 = vrcp.f32 %v303_v47 }
 0x3a5   : > { %v1054_v23 = vpop.eup %1053 }
 0x3a6   : > { %v1056_v33 = vpop.eup %1055 }
 0x3a9   : > { %v1058_v40 = vpop.eup %1057 }
 0x3ad   : > { %v1060_v48 = vpop.eup %1059 }
 0x3ae   : > { %v353_v49 = vmul.f32 %v1060_v48, %v1167_v43  ;;  %v917_v43 = vld [vmem:[%s1240_s3] ss:$0 sm:$0xff] }
 0x3b0   : > { %v354_v51 = vpack.c.bf16 %v353_v49, %v353_v49 }
 0x3e1   : > { %v466_v24 = vpop.f32.mrb[12].mxu0 }
 0x3e2   : > { %v473_v26 = vmul.f32 %v1054_v23, %v466_v24  ;;  %v975_v27 = vpop.f32.mrb[13].mxu0 }
 0x3e3   : > { %v469_v28 = vpop.f32.mrb[14].mxu0 }
 0x3e4   : > { %v474_v31 = vpack.c.bf16 %v473_v26, %v473_v26  ;;  %v976_v32 = vpop.f32.mrb[15].mxu0 }
 0x3e6   : > { %698 = vrot.lane.b32.xlu1 %v474_v31, %s1073_s26 }
 0x3e9   : > { %v577_v34 = vpop.f32.mrb[16].mxu0 }
 0x3ea   : > { %v584_v35 = vmul.f32 %v1056_v33, %v577_v34  ;;  %v987_v36 = vpop.f32.mrb[17].mxu0 }
 0x3eb   : > { %v580_v37 = vpop.f32.mrb[18].mxu0 }
 0x3ec   : > { %v585_v38 = vpack.c.bf16 %v584_v35, %v584_v35  ;;  %v988_v39 = vpop.f32.mrb[19].mxu0 }
 0x3ee   : > { %701 = vrot.lane.b32.xlu0 %v585_v38, %s1072_s25 }
 0x3f1   : > { %v688_v41 = vpop.f32.mrb[20].mxu0 }
 0x3f2   : > { %v695_v42 = vmul.f32 %v1058_v40, %v688_v41  ;;  %v999_v44 = vpop.f32.mrb[21].mxu0 }
 0x3f3   : > { %v691_v45 = vpop.f32.mrb[22].mxu0 }
 0x3f4   : > { %v696_v46 = vpack.c.bf16 %v695_v42, %v695_v42  ;;  %v1000_v0 = vpop.f32.mrb[23].mxu0 }
 0x3f6   : > { %704 = vrot.lane.b32.xlu1 %v696_v46, %s1071_s24  ;;  %s235_s24 = scalar_lea.vmem %s1241_s4, %s904_s22 }
 0x3f7   : > { %v716_v57 = vld [vmem:[%s235_s24] sm:$0xf] }
 0x3f8   : > { %v717_v58 = vunpack.c.l.bf16 %v716_v57 }
 0x3fa   : > { %v725_v59 = vadd.f32 %v917_v43, %v717_v58 }
 0x458   : > { %v699_v50 = vpop.permute.xlu1 %698 }
 0x459   : > { %v708_v53 = vsel %vm247_vm1, %v354_v51, %v699_v50 }
 0x460   : > { %v702_v52 = vpop.permute.xlu0 %701 }
 0x461   : > { %v711_v54 = vsel %vm709_vm4, %v708_v53, %v702_v52 }
 0x468   : > { %v705_v55 = vpop.permute.xlu1 %704 }
 0x469   : > { %v714_v56 = vsel %vm712_vm5, %v711_v54, %v705_v55 }
 0x46a   : > { %1018 = vmatmul.mubr.bf16.vlgmr.msra.gmra.mrb[8].mxu1 %v714_v56 }
 0x53d   : > { %v824_v60 = vpop.f32.mrb[8].mxu1 }
 0x53e   : > { %v830_v61 = vadd.f32 %v824_v60, %v725_v59  ;;  %v1019_v62 = vpop.f32.mrb[9].mxu1 }
 0x53f   : > { %v827_v63 = vpop.f32.mrb[10].mxu1 }
 0x540   : > { %v831_v1 = vpack.c.bf16 %v830_v61, %v830_v61  ;;  %v1020_v2 = vpop.f32.mrb[11].mxu1 }
 0x542   : > { %832 = vst [vmem:[%s239_s30] sm:$0xf] %v831_v1 }
 0x543 PF: > { %s15_s18 = sadd.s32 1, %s1067_s18  }
 0x544   : > { %p12_p4 = scmp.ge.s32.totalorder %s15_s18, 4  }
 0x546   :  { %14 = sbr.rel (!%p12_p4) target bundleno = 1 (0x1), region = 73 }

// kernel: text_decoder_forward.25
= control target key start
LH: loop header
LB: loop body
LE: loop exit
PB: predicated region body
PF: predicated region fallthrough
CT: control target
= control target key end

     0   :  { %s406_s0 = inlined_call_operand.vmem [shape: bf16[16,128], index: 0, kind: input, shape index: {}]   ;;  %s407_s1 = inlined_call_operand.vmem [shape: f32[1,128], index: 1, kind: input, shape index: {}]   ;;  %s408_s2 = inlined_call_operand.vmem [shape: f32[1,128], index: 2, kind: input, shape index: {}]   ;;  %s409_s3 = inlined_call_operand.vmem [shape: bf16[128,256], index: 3, kind: input, shape index: {}]   ;;  %s410_s4 = inlined_call_operand.hbm [shape: f32[16,256], index: 4, kind: output, shape index: {}]  }
   0x1   :  { %v249_v0 = vld [vmem:[%s406_s0] sm:$0xff]  }
   0x2   :  { %v250_v1 = vunpack.c.l.bf16 %v249_v0  ;;  %v251_v2 = vunpack.c.h.bf16 %v249_v0 }
   0x4   :  { %27 = vadd.xlane.f32.xlu0 %v250_v1 }
   0x5   :  { %9 = vsyncpa [#allocation4], 0  ;;  %v256_v3 = vld [vmem:[%s409_s3 + $0x4] ss:$8 sps:$4 sm:$0xff]   ;;  %v258_v4 = vld [vmem:[%s409_s3] ss:$8 sps:$4 sm:$0xff]  }
   0x6   :  { %v259_v5 = vld [vmem:[%s409_s3 + $0x14] ss:$8 sps:$4 sm:$0xff]   ;;  %167 = vmatprep.subr.bf16.mxu0 %v256_v3  ;;  %v261_v14 = vld [vmem:[%s409_s3 + $0x10] ss:$8 sps:$4 sm:$0xff]   ;;  %v262_v15 = vld [vmem:[%s409_s3 + $0x24] ss:$8 sps:$4 sm:$0xff]  }
   0x7   :  { %168 = vmatpush1.bf16.msra.mxu0 %v258_v4  ;;  %v264_v16 = vld [vmem:[%s409_s3 + $0x20] ss:$8 sps:$4 sm:$0xff]   ;;  %v265_v17 = vld [vmem:[%s409_s3 + $0x34] ss:$8 sps:$4 sm:$0xff]   ;;  %v267_v18 = vld [vmem:[%s409_s3 + $0x30] ss:$8 sps:$4 sm:$0xff]  }
   0x8   :  { %29 = vadd.xlane.f32.xlu0 %v251_v2  ;;  %169 = vmatprep.subr.bf16.mxu0 %v259_v5  ;;  %v268_v19 = vld [vmem:[%s409_s3 + $0x44] ss:$8 sps:$4 sm:$0xff]   ;;  %v270_v20 = vld [vmem:[%s409_s3 + $0x40] ss:$8 sps:$4 sm:$0xff]   ;;  %v271_v21 = vld [vmem:[%s409_s3 + $0x54] ss:$8 sps:$4 sm:$0xff]  }
   0x9   :  { %v308_v22 = vmov 0   ;;  %v273_v23 = vld [vmem:[%s409_s3 + $0x50] ss:$8 sps:$4 sm:$0xff]   ;;  %v274_v24 = vld [vmem:[%s409_s3 + $0x64] ss:$8 sps:$4 sm:$0xff]   ;;  %s309_s24 = smov [#allocation3]  }
   0xa   :  { %199 = vmatprep.mubr.bf16.mxu0 %v308_v22  ;;  %v276_v25 = vld [vmem:[%s409_s3 + $0x60] ss:$8 sps:$4 sm:$0xff]   ;;  %v277_v26 = vld [vmem:[%s409_s3 + $0x74] ss:$8 sps:$4 sm:$0xff]   ;;  %v279_v27 = vld [vmem:[%s409_s3 + $0x70] ss:$8 sps:$4 sm:$0xff]  }
   0xb   :  { %170 = vmatpush1.bf16.msra.mxu0 %v261_v14  ;;  %v230_v36 = vld [vmem:[%s407_s1] ss:$0 sm:$0xff]  ;;  %s219_s25 = sshll.u32 %s309_s24, 4  ;;  %s220_s25 = int_to_ptr.vmem [resolvable:$true] %s219_s25 }
   0xc   :  { %171 = vmatprep.subr.bf16.mxu0 %v262_v15  ;;  %v231_v40 = vld [vmem:[%s408_s2] ss:$0 sm:$0xff]  ;;  %s284_s1 = scalar_lea.vmem %s220_s25, 512  ;;  %p289_p1 = scmp.lt.s32.totalorder %s220_s25, %s220_s25 }
   0xd   :  { %p285_p0 = scmp.ne.s32.totalorder %s220_s25, %s284_s1  ;;  %p290_p2 = scmp.lt.s32.totalorder %s284_s1, %s284_s1 }
   0xf   :  { %172 = vmatpush1.bf16.msra.mxu0 %v264_v16  ;;  %p291_p3 = por %p290_p2, %p289_p1 }
  0x10   :  { %173 = vmatprep.subr.bf16.mxu0 %v265_v17 }
  0x11   :  { %p292_p4 = pnand %p291_p3, %p285_p0 }
  0x13   :  { %174 = vmatpush1.bf16.msra.mxu0 %v267_v18 }
  0x14   :  { %175 = vmatprep.subr.bf16.mxu0 %v268_v19 }
  0x17   :  { %176 = vmatpush1.bf16.msra.mxu0 %v270_v20 }
  0x18   :  { %177 = vmatprep.subr.bf16.mxu0 %v271_v21 }
  0x1b   :  { %178 = vmatpush1.bf16.msra.mxu0 %v273_v23 }
  0x1c   :  { %179 = vmatprep.subr.bf16.mxu0 %v274_v24 }
  0x1f   :  { %180 = vmatpush1.bf16.msra.mxu0 %v276_v25 }
  0x20   :  { %181 = vmatprep.subr.bf16.mxu0 %v277_v26 }
  0x23   :  { %182 = vmatpush1.bf16.msra.mxu0 %v279_v27 }
  0x91   :  { %v28_v6 = vpop.xlane.xlu0 %27 }
  0x92   :  { %v32_v7 = vmul.f32 0.0078125, %v28_v6 }
  0x94   :  { %v34_v8 = vsub.f32 %v250_v1, %v32_v7 }
  0x95   :  { %v30_v9 = vpop.xlane.xlu0 %29 }
  0x96   :  { %v33_v10 = vmul.f32 0.0078125, %v30_v9  ;;  %v36_v11 = vmul.f32 %v34_v8, %v34_v8 }
  0x98   :  { %v35_v12 = vsub.f32 %v251_v2, %v33_v10  ;;  %38 = vadd.xlane.f32.xlu1 %v36_v11 }
  0x9a   :  { %v37_v13 = vmul.f32 %v35_v12, %v35_v12 }
  0x9c   :  { %40 = vadd.xlane.f32.xlu1 %v37_v13 }
 0x125   :  { %v39_v28 = vpop.xlane.xlu1 %38 }
 0x126   :  { %v42_v29 = vmul.f32 0.0078125, %v39_v28 }
 0x128   :  { %v44_v30 = vadd.f32 1e-05, %v42_v29 }
 0x129   :  { %v41_v31 = vpop.xlane.xlu1 %40 }
 0x12a   :  { %280 = vrsqrt.f32 %v44_v30  ;;  %v43_v32 = vmul.f32 0.0078125, %v41_v31 }
 0x12c   :  { %v45_v33 = vadd.f32 1e-05, %v43_v32 }
 0x12e   :  { %282 = vrsqrt.f32 %v45_v33 }
 0x134   :  { %v281_v34 = vpop.eup %280 }
 0x135   :  { %v48_v35 = vmul.f32 %v281_v34, %v34_v8 }
 0x137   :  { %v57_v39 = vmul.f32 %v230_v36, %v48_v35 }
 0x138   :  { %v283_v37 = vpop.eup %282 }
 0x139   :  { %v49_v38 = vmul.f32 %v283_v37, %v35_v12  ;;  %v66_v42 = vadd.f32 %v231_v40, %v57_v39 }
 0x13b   :  { %v58_v41 = vmul.f32 %v230_v36, %v49_v38 }
 0x13d   :  { %v67_v43 = vadd.f32 %v231_v40, %v58_v41 }
 0x13f   :  { %v68_v44 = vpack.c.bf16 %v67_v43, %v66_v42 }
 0x141   :  { %200 = vmatmul.mubr.bf16.vlgmr.msra.gmra.mrb[0].mxu0 %v68_v44 }
 0x214   :  { %v201_v45 = vpop.f32.mrb[0].mxu0 }
 0x215   :  { %210 = vst [vmem:[#allocation3] sm:$0xff] %v201_v45  ;;  %v203_v46 = vpop.f32.mrb[1].mxu0 }
 0x216   :  { %211 = vst [vmem:[#allocation3 + $0x8] sm:$0xff] %v203_v46  ;;  %v205_v47 = vpop.f32.mrb[2].mxu0 }
 0x217   :  { %212 = vst [vmem:[#allocation3 + $0x10] sm:$0xff] %v205_v47  ;;  %v207_v48 = vpop.f32.mrb[3].mxu0 }
 0x218   :  { %213 = vst [vmem:[#allocation3 + $0x18] sm:$0xff] %v207_v48 }
 0x219   :  { %295 = shalt.err (!%p292_p4)
}
 0x21a   :  { %s296_s27 = scalar_lea.hbm %s410_s4, 512 }
 0x21b   :  { %p297_p5 = scmp.ne.s32.totalorder %s410_s4, %s296_s27  ;;  %p300_p6 = scmp.lt.u32.totalorder %s296_s27, %s410_s4 }
 0x21d   :  { %p302_p7 = pnand %p300_p6, %p297_p5 }
 0x21f   :  { %305 = shalt.err (!%p302_p7)
}
 0x220   :  { %s310_s6 = smov 256   ;;  %s311_s7 = smov 16  }
 0x221   :  { %225 = dma.vmem_to_hbm [thread:$0]  %s220_s25, 512, %s410_s4, [#allocation4], %s310_s6, %s310_s6, %s311_s7  }
 0x222   :  { %306 = dma.done.wait [#allocation4], 512  }
 0x223   :  { %307 = vsyncadd [#allocation4], 4294966784 }
 0x224   :  { %229 = vsyncpa [#allocation4], 1 }

// kernel: text_decoder_forward.17
= control target key start
LH: loop header
LB: loop body
LE: loop exit
PB: predicated region body
PF: predicated region fallthrough
CT: control target
= control target key end

     0   :  { %s1269_s18 = smov 0   ;;  %s1271_s19 = smov 0   ;;  %s1414_s0 = inlined_call_operand.vmem [shape: bf16[2,8,128], index: 0, kind: input, shape index: {}]   ;;  %s1415_s1 = inlined_call_operand.vmem [shape: bf16[2,16,256], index: 1, kind: input, shape index: {}]   ;;  %s1416_s2 = inlined_call_operand.vmem [shape: bf16[128,128], index: 2, kind: input, shape index: {}]   ;;  %s1417_s3 = inlined_call_operand.vmem [shape: f32[1,128], index: 3, kind: input, shape index: {}]   ;;  %s1418_s4 = inlined_call_operand.vmem [shape: bf16[2,8,128], index: 4, kind: input, shape index: {}]   ;;  %s1419_s5 = inlined_call_operand.vmem [shape: bf16[2,8,128], index: 5, kind: output, shape index: {}]  }
   0x1   :  { %s1273_s20 = smov 0  }
   0x2 LB: > { %s27_s21 = sadd.s32 1, %s1228_s19  ;;  %p1033_p0 = scmp.ge.s32.totalorder %s1232_s20, 1  ;;  %s1232_s20 = sphi %s1273_s20, %s15_s20   ;;  %s1228_s19 = sphi %s1271_s19, %s1421_s19   ;;  %s1224_s18 = sphi %s1269_s18, %s1420_s18  }
   0x3   : > { %p29_p1 = scmp.ge.s32.totalorder %s27_s21, 2  ;;  %p240_p2 = scmp.lt.s32.totalorder %s1232_s20, 3 }
   0x5   : > { %s1423_s21 = smov (%p29_p1, %s27_s21), 0  ;;  %p241_p3 = pnand %p1033_p0, %p240_p2 }
   0x6   : > { %p287_p4 = scmp.lt.s32.totalorder (!%p241_p3), %s1224_s18, 1  ;;  %v1234_v0 = vmov (!%p241_p3), 0.0   ;;  %vm1235_vm0 = vmmov (!%p241_p3), 0   ;;  %vm346_vm1 = vcmask (!%p241_p3), 261120   ;;  %s1236_s30 = smov (!%p241_p3), 96   ;;  %vm393_vm2 = vcmask (!%p241_p3), 130048  }
   0x7   : > { %244 = sbr.rel (%p241_p3) target bundleno = 1343 (0x53f), region = 40  ;;  %1087 = vmatprep.subr.bf16.mxu0 (!%p241_p3), %v1234_v0  ;;  %1089 = vmatprep.mubr.msk.bf16.mxu0 (!%p241_p3), %vm1235_vm0, %v1234_v0  ;;  %s1237_s6 = smov (!%p241_p3), 64   ;;  %vm798_vm3 = vcmask (!%p241_p3), 523264   ;;  %vm801_vm4 = vcmask (!%p241_p3), 785408  }
   0x8   : > { %1111 = vmatprep.subr.bf16.mxu1 (!%p241_p3), %v1234_v0  ;;  %1113 = vmatprep.mubr.msk.bf16.mxu1 (!%p241_p3), %vm1235_vm0, %v1234_v0  ;;  %s1238_s7 = smov (!%p241_p3), 32  }
   0xe   : > { %s1425_s18 = smov (!%p287_p4, %s1224_s18), 1 }
   0xf   : > { %s1061_s22 = sshll.u32 %s1425_s18, 4  ;;  %s1293_s23 = sshll.u32 %s1425_s18, 2 }
  0x10   : > { %s1298_s26 = scalar_lea.vmem %s1415_s1, %s1061_s22  ;;  %s293_s29 = scalar_lea.vmem %s1414_s0, %s1293_s23 }
  0x11   : > { %v1184_v1 = vld [vmem:[%s1298_s26] ss:$8 sps:$4 sm:$0xff]   ;;  %v1185_v18 = vld [vmem:[%s1298_s26 + $0x4] ss:$8 sps:$4 sm:$0xff]   ;;  %s317_s10 = scalar_lea.vmem %s1419_s5, %s1293_s23 }
  0x12   : > { %v335_v2 = vld [vmem:[%s293_s29] sm:$0xf]  ;;  %v351_v3 = vsel %vm346_vm1, %v1184_v1, 0 }
  0x13   : > { %v336_v4 = vmul.bf16 1043676725, %v335_v2  ;;  %1088 = vmatpush3.bf16.xpose.msra.mxu0 %v351_v3 }
  0x14   : > { %1093 = vmatprep.subr.bf16.mxu0 %v1234_v0 }
  0x15   : > { %v1044_v5 = vcombine.low %v336_v4, %v336_v4 }
  0x17   : > { %459 = vrot.lane.b32.xlu1 %v1044_v5, %s1236_s30 }
  0x1a   : > { %1090 = vmatmul.mubr.msk.bf16.vlgmr.msra.gmra.mrb[0].mxu0 %vm346_vm1, %v336_v4  ;;  %v1186_v4 = vld [vmem:[%s1416_s2] sm:$0xff]  }
  0x1b   : > { %570 = vrot.lane.b32.xlu1 %v1184_v1, %s1237_s6  ;;  %1095 = vmatprep.mubr.msk.bf16.mxu0 %vm1235_vm0, %v1234_v0 }
  0x1c   : > { %1094 = vmatpush3.bf16.msra.mxu0 %v1185_v18 }
  0x1d   : > { %1099 = vmatprep.subr.bf16.mxu0 %v1234_v0 }
  0x1f   : > { %568 = vrot.lane.b32.xlu1 %v1044_v5, %s1237_s6 }
  0x23   : > { %679 = vrot.lane.b32.xlu1 %v1184_v1, %s1238_s7 }
  0x27   : > { %677 = vrot.lane.b32.xlu1 %v1044_v5, %s1238_s7  ;;  %v1187_v5 = vld [vmem:[%s1416_s2 + $0x8] sm:$0xff]  }
  0x89   : > { %v460_v6 = vpop.permute.xlu1 %459 }
  0x8d   : > { %v571_v7 = vpop.permute.xlu1 %570 }
  0x8e   : > { %v576_v8 = vsel %vm346_vm1, %v571_v7, 0  ;;  %v1189_v7 = vld [vmem:[%s1416_s2 + $0x18] sm:$0xff]  }
  0x8f   : > { %1112 = vmatpush3.bf16.xpose.msra.mxu1 %v576_v8 }
  0x90   : > { %1123 = vmatprep.subr.bf16.mxu1 %v1234_v0 }
  0x91   : > { %v569_v9 = vpop.permute.xlu1 %568 }
  0x95   : > { %v680_v10 = vpop.permute.xlu1 %679 }
  0x96   : > { %1114 = vmatmul.mubr.msk.bf16.vlgmr.msra.gmra.mrb[0].mxu1 %vm346_vm1, %v569_v9  ;;  %v685_v11 = vsel %vm346_vm1, %v680_v10, 0  ;;  %v1190_v9 = vld [vmem:[%s1416_s2 + $0x20] sm:$0xff]   ;;  %v1191_v10 = vld [vmem:[%s1416_s2 + $0x28] sm:$0xff]  }
  0x97   : > { %1124 = vmatpush3.bf16.xpose.msra.mxu1 %v685_v11  ;;  %1125 = vmatprep.mubr.msk.bf16.mxu1 %vm1235_vm0, %v1234_v0 }
  0x98   : > { %1135 = vmatprep.subr.bf16.mxu1 %v1234_v0 }
  0x99   : > { %v678_v12 = vpop.permute.xlu1 %677 }
  0x9e   : > { %1126 = vmatmul.mubr.msk.bf16.vlgmr.msra.gmra.mrb[4].mxu1 %vm346_vm1, %v678_v12 }
  0x9f   : > { %1151 = vmatprep.mubr.msk.bf16.mxu1 %vm1235_vm0, %v1234_v0  ;;  %1136 = vmatpush3.bf16.msra.mxu1 %v1186_v4 }
  0xa0   : > { %1137 = vmatprep.subr.bf16.mxu1 %v1234_v0 }
  0xa3   : > { %1138 = vmatpush3.bf16.msra.mxu1 %v1187_v5 }
  0xa4   : > { %1139 = vmatprep.subr.bf16.mxu1 %v1234_v0 }
  0xed   : > { %v387_v13 = vpop.f32.mrb[0].mxu0 }
  0xee   : > { %v1091_v14 = vpop.f32.mrb[1].mxu0  ;;  %v394_v15 = vsel %vm393_vm2, %v387_v13, -inf }
  0xef   : > { %395 = vmax.xlane.f32.xlu0 %v394_v15  ;;  %v390_v16 = vpop.f32.mrb[2].mxu0  ;;  %v1192_v14 = vld [vmem:[%s1416_s2 + $0x30] sm:$0xff]  }
  0xf0   : > { %v1092_v17 = vpop.f32.mrb[3].mxu0 }
 0x105   : > { %461 = vrot.lane.b32.xlu0 %v1184_v1, %s1236_s30 }
 0x169   : > { %v612_v19 = vpop.f32.mrb[0].mxu1 }
 0x16a   : > { %v618_v20 = vsel %vm393_vm2, %v612_v19, -inf  ;;  %v1115_v21 = vpop.f32.mrb[1].mxu1 }
 0x16b   : > { %619 = vmax.xlane.f32.xlu0 %v618_v20  ;;  %v615_v22 = vpop.f32.mrb[2].mxu1 }
 0x16c   : > { %v1116_v23 = vpop.f32.mrb[3].mxu1 }
 0x171   : > { %v721_v24 = vpop.f32.mrb[4].mxu1 }
 0x172   : > { %v727_v25 = vsel %vm393_vm2, %v721_v24, -inf  ;;  %v1127_v26 = vpop.f32.mrb[5].mxu1 }
 0x173   : > { %728 = vmax.xlane.f32.xlu1 %v727_v25  ;;  %v724_v27 = vpop.f32.mrb[6].mxu1 }
 0x174   : > { %v1128_v28 = vpop.f32.mrb[7].mxu1 }
 0x17c   : > { %v396_v29 = vpop.xlane.xlu0 %395 }
 0x17d   : > { %v397_v30 = vsub.f32 %v387_v13, %v396_v29 }
 0x17f   : > { %v398_v31 = vmul.f32 1.442695, %v397_v30 }
 0x180   : > { %v462_v32 = vpop.permute.xlu0 %461 }
 0x181   : > { %519 = vrot.lane.b32.xlu0 %v1185_v18, %s1236_s30  ;;  %1194 = vpow2.f32 %v398_v31  ;;  %v467_v34 = vsel %vm346_vm1, %v462_v32, 0 }
 0x18b   : > { %v1195_v33 = vpop.eup %1194 }
 0x18c   : > { %v403_v35 = vpack.c.bf16 %v1195_v33, %v1195_v33  ;;  %v400_v63 = vsel %vm393_vm2, %v1195_v33, 0.0 }
 0x18e   : > { %1096 = vmatmul.mubr.msk.bf16.vlgmr.msra.gmra.mrb[4].mxu0 %vm393_vm2, %v403_v35 }
 0x18f   : > { %1100 = vmatpush3.bf16.xpose.msra.mxu0 %v467_v34  ;;  %1101 = vmatprep.mubr.msk.bf16.mxu0 %vm1235_vm0, %v1234_v0 }
 0x190   : > { %1105 = vmatprep.subr.bf16.mxu0 %v1234_v0 }
 0x196   : > { %1102 = vmatmul.mubr.msk.bf16.vlgmr.msra.gmra.mrb[8].mxu0 %vm346_vm1, %v460_v6  ;;  %v1188_v6 = vld [vmem:[%s1416_s2 + $0x10] sm:$0xff]  }
 0x197   : > { %1107 = vmatprep.mubr.msk.bf16.mxu0 %vm1235_vm0, %v1234_v0  ;;  %1140 = vmatpush3.bf16.msra.mxu1 %v1188_v6 }
 0x198   : > { %1141 = vmatprep.subr.bf16.mxu1 %v1234_v0 }
 0x19b   : > { %1142 = vmatpush3.bf16.msra.mxu1 %v1189_v7 }
 0x19c   : > { %1143 = vmatprep.subr.bf16.mxu1 %v1234_v0 }
 0x19f   : > { %1144 = vmatpush3.bf16.msra.mxu1 %v1190_v9 }
 0x1a0   : > { %1145 = vmatprep.subr.bf16.mxu1 %v1234_v0 }
 0x1a3   : > { %1146 = vmatpush3.bf16.msra.mxu1 %v1191_v10 }
 0x1a4   : > { %1147 = vmatprep.subr.bf16.mxu1 %v1234_v0 }
 0x1a7   : > { %1148 = vmatpush3.bf16.msra.mxu1 %v1192_v14 }
 0x1a8   : > { %1149 = vmatprep.subr.bf16.mxu1 %v1234_v0 }
 0x1f8   : > { %v620_v45 = vpop.xlane.xlu0 %619 }
 0x1f9   : > { %v621_v47 = vsub.f32 %v612_v19, %v620_v45 }
 0x1fb   : > { %v622_v48 = vmul.f32 1.442695, %v621_v47 }
 0x1fc   : > { %v520_v46 = vpop.permute.xlu0 %519 }
 0x1fd   : > { %1106 = vmatpush3.bf16.msra.mxu0 %v520_v46  ;;  %1196 = vpow2.f32 %v622_v48 }
 0x1fe   : > { %1117 = vmatprep.subr.bf16.mxu0 %v1234_v0 }
 0x200   : > { %v729_v51 = vpop.xlane.xlu1 %728 }
 0x201   : > { %v730_v52 = vsub.f32 %v721_v24, %v729_v51 }
 0x203   : > { %v731_v55 = vmul.f32 1.442695, %v730_v52 }
 0x207   : > { %v1197_v49 = vpop.eup %1196 }
 0x208   : > { %v624_v50 = vsel %vm393_vm2, %v1197_v49, 0.0  ;;  %v627_v2 = vpack.c.bf16 %v1197_v49, %v1197_v49 }
 0x261   : > { %v1340_v36 = vpop.f32.mrb[4].mxu0 }
 0x262   : > { %v1097_v37 = vpop.f32.mrb[5].mxu0 }
 0x263   : > { %v450_v38 = vpop.f32.mrb[6].mxu0 }
 0x264   : > { %v1098_v39 = vpop.f32.mrb[7].mxu0 }
 0x269   : > { %v503_v40 = vpop.f32.mrb[8].mxu0 }
 0x26a   : > { %v1103_v41 = vpop.f32.mrb[9].mxu0  ;;  %v509_v42 = vsel %vm393_vm2, %v503_v40, -inf }
 0x26b   : > { %510 = vmax.xlane.f32.xlu1 %v509_v42  ;;  %v506_v43 = vpop.f32.mrb[10].mxu0 }
 0x26c   : > { %v1104_v44 = vpop.f32.mrb[11].mxu0 }
 0x27c   : > { %628 = vrot.lane.b32.xlu1 %v1185_v18, %s1237_s6 }
 0x280   : > { %737 = vrot.lane.b32.xlu1 %v1185_v18, %s1238_s7  ;;  %v1193_v18 = vld [vmem:[%s1416_s2 + $0x38] sm:$0xff]  }
 0x281   : > { %1150 = vmatpush3.bf16.msra.mxu1 %v1193_v18 }
 0x2a4   : > { %625 = vadd.xlane.f32.xlu1 %v624_v50 }
 0x2f8   : > { %v511_v53 = vpop.xlane.xlu1 %510 }
 0x2f9   : > { %v512_v54 = vsub.f32 %v503_v40, %v511_v53 }
 0x2fb   : > { %v513_v56 = vmul.f32 1.442695, %v512_v54 }
 0x2fc   : > { %v629_v59 = vpop.permute.xlu1 %628 }
 0x2fd   : > { %1198 = vpow2.f32 %v513_v56 }
 0x2fe   : > { %1200 = vpow2.f32 %v731_v55 }
 0x300   : > { %v738_v1 = vpop.permute.xlu1 %737 }
 0x307   : > { %v1199_v57 = vpop.eup %1198 }
 0x308   : > { %v515_v58 = vsel %vm393_vm2, %v1199_v57, 0.0  ;;  %v518_v60 = vpack.c.bf16 %v1199_v57, %v1199_v57  ;;  %v1201_v61 = vpop.eup %1200 }
 0x309   : > { %516 = vadd.xlane.f32.xlu0 %v515_v58  ;;  %v733_v62 = vsel %vm393_vm2, %v1201_v61, 0.0  ;;  %v736_v3 = vpack.c.bf16 %v1201_v61, %v1201_v61 }
 0x30a   : > { %1108 = vmatmul.mubr.msk.bf16.vlgmr.msra.gmra.mrb[12].mxu0 %vm393_vm2, %v518_v60 }
 0x30b   : > { %1118 = vmatpush3.bf16.msra.mxu0 %v629_v59  ;;  %1119 = vmatprep.mubr.msk.bf16.mxu0 %vm1235_vm0, %v1234_v0 }
 0x30c   : > { %1129 = vmatprep.subr.bf16.mxu0 %v1234_v0 }
 0x30d   : > { %734 = vadd.xlane.f32.xlu0 %v733_v62 }
 0x311   : > { %401 = vadd.xlane.f32.xlu0 %v400_v63 }
 0x312   : > { %1120 = vmatmul.mubr.msk.bf16.vlgmr.msra.gmra.mrb[16].mxu0 %vm393_vm2, %v627_v2 }
 0x313   : > { %1130 = vmatpush3.bf16.msra.mxu0 %v738_v1  ;;  %1131 = vmatprep.mubr.msk.bf16.mxu0 %vm1235_vm0, %v1234_v0 }
 0x31a   : > { %1132 = vmatmul.mubr.msk.bf16.vlgmr.msra.gmra.mrb[20].mxu0 %vm393_vm2, %v736_v3 }
 0x331   : > { %v626_v11 = vpop.xlane.xlu1 %625 }
 0x396   : > { %v517_v8 = vpop.xlane.xlu0 %516 }
 0x397   : > { %1202 = vrcp.f32 %v517_v8 }
 0x398   : > { %1204 = vrcp.f32 %v626_v11 }
 0x39a   : > { %v735_v19 = vpop.xlane.xlu0 %734 }
 0x39b   : > { %1206 = vrcp.f32 %v735_v19 }
 0x39e   : > { %v402_v35 = vpop.xlane.xlu0 %401 }
 0x39f   : > { %1208 = vrcp.f32 %v402_v35 }
 0x3a1   : > { %v1203_v12 = vpop.eup %1202 }
 0x3a2   : > { %v1205_v22 = vpop.eup %1204 }
 0x3a5   : > { %v1207_v29 = vpop.eup %1206 }
 0x3a9   : > { %v1209_v37 = vpop.eup %1208 }
 0x3aa   : > { %v454_v38 = vmul.f32 %v1209_v37, %v1340_v36  ;;  %v1039_v36 = vld [vmem:[%s1417_s3] ss:$0 sm:$0xff] }
 0x3ac   : > { %v455_v40 = vpack.c.bf16 %v454_v38, %v454_v38 }
 0x3dd   : > { %v559_v13 = vpop.f32.mrb[12].mxu0 }
 0x3de   : > { %v566_v15 = vmul.f32 %v1203_v12, %v559_v13  ;;  %v1109_v16 = vpop.f32.mrb[13].mxu0 }
 0x3df   : > { %v562_v17 = vpop.f32.mrb[14].mxu0 }
 0x3e0   : > { %v567_v20 = vpack.c.bf16 %v566_v15, %v566_v15  ;;  %v1110_v21 = vpop.f32.mrb[15].mxu0 }
 0x3e2   : > { %787 = vrot.lane.b32.xlu1 %v567_v20, %s1238_s7 }
 0x3e5   : > { %v668_v23 = vpop.f32.mrb[16].mxu0 }
 0x3e6   : > { %v675_v24 = vmul.f32 %v1205_v22, %v668_v23  ;;  %v1121_v25 = vpop.f32.mrb[17].mxu0 }
 0x3e7   : > { %v671_v26 = vpop.f32.mrb[18].mxu0 }
 0x3e8   : > { %v676_v27 = vpack.c.bf16 %v675_v24, %v675_v24  ;;  %v1122_v28 = vpop.f32.mrb[19].mxu0 }
 0x3ea   : > { %790 = vrot.lane.b32.xlu0 %v676_v27, %s1237_s6 }
 0x3ed   : > { %v777_v30 = vpop.f32.mrb[20].mxu0 }
 0x3ee   : > { %v784_v31 = vmul.f32 %v1207_v29, %v777_v30  ;;  %v1133_v32 = vpop.f32.mrb[21].mxu0 }
 0x3ef   : > { %v780_v33 = vpop.f32.mrb[22].mxu0 }
 0x3f0   : > { %v785_v34 = vpack.c.bf16 %v784_v31, %v784_v31  ;;  %v1134_v0 = vpop.f32.mrb[23].mxu0 }
 0x3f2   : > { %793 = vrot.lane.b32.xlu1 %v785_v34, %s1236_s30  ;;  %s313_s30 = scalar_lea.vmem %s1418_s4, %s1293_s23 }
 0x3f3   : > { %v324_v46 = vld [vmem:[%s313_s30] sm:$0xf] }
 0x3f4   : > { %v325_v47 = vunpack.c.l.bf16 %v324_v46 }
 0x3f6   : > { %v333_v48 = vadd.f32 %v1039_v36, %v325_v47 }
 0x454   : > { %v788_v39 = vpop.permute.xlu1 %787 }
 0x455   : > { %v797_v42 = vsel %vm346_vm1, %v455_v40, %v788_v39 }
 0x45c   : > { %v791_v41 = vpop.permute.xlu0 %790 }
 0x45d   : > { %v800_v43 = vsel %vm798_vm3, %v797_v42, %v791_v41 }
 0x464   : > { %v794_v44 = vpop.permute.xlu1 %793 }
 0x465   : > { %v803_v45 = vsel %vm801_vm4, %v800_v43, %v794_v44 }
 0x466   : > { %1152 = vmatmul.mubr.bf16.vlgmr.msra.gmra.mrb[8].mxu1 %v803_v45 }
 0x539   : > { %v904_v49 = vpop.f32.mrb[8].mxu1 }
 0x53a   : > { %v910_v50 = vadd.f32 %v904_v49, %v333_v48  ;;  %v1153_v51 = vpop.f32.mrb[9].mxu1 }
 0x53b   : > { %v907_v52 = vpop.f32.mrb[10].mxu1 }
 0x53c   : > { %v916_v53 = vpack.c.bf16 %v910_v50, %v910_v50  ;;  %v1154_v54 = vpop.f32.mrb[11].mxu1 }
 0x53e   : > { %917 = vst [vmem:[%s317_s10] sm:$0xf] %v916_v53 }
 0x53f PF: > { %s15_s20 = sadd.s32 1, %s1232_s20   ;;  %s1420_s18 = smov %s1228_s19 }
 0x540   : > { %p12_p5 = scmp.ge.s32.totalorder %s15_s20, 4   ;;  %s1421_s19 = smov %s1423_s21 }
 0x542   :  { %14 = sbr.rel (!%p12_p5) target bundleno = 2 (0x2), region = 87 }

// kernel: text_decoder_forward.18
= control target key start
LH: loop header
LB: loop body
LE: loop exit
PB: predicated region body
PF: predicated region fallthrough
CT: control target
= control target key end

     0   :  { %v1022_v37 = vmov 0   ;;  %s1293_s0 = inlined_call_operand.vmem [shape: bf16[16,128], index: 0, kind: input, shape index: {}]   ;;  %s1294_s3 = inlined_call_operand.vmem [shape: bf16[128,512], index: 3, kind: input, shape index: {}]   ;;  %s1295_s5 = inlined_call_operand.vmem [shape: bf16[512,128], index: 5, kind: input, shape index: {}]   ;;  %s1296_s1 = inlined_call_operand.vmem [shape: f32[1,128], index: 1, kind: input, shape index: {}]   ;;  %s1297_s2 = inlined_call_operand.vmem [shape: f32[1,128], index: 2, kind: input, shape index: {}]   ;;  %s1298_s4 = inlined_call_operand.vmem [shape: f32[1,512], index: 4, kind: input, shape index: {}]   ;;  %s1299_s6 = inlined_call_operand.vmem [shape: f32[1,128], index: 6, kind: input, shape index: {}]   ;;  %s1300_s7 = inlined_call_operand.vmem [shape: bf16[16,128], index: 7, kind: output, shape index: {}]  }
   0x1   :  { %v869_v0 = vld [vmem:[%s1293_s0] sm:$0xff]   ;;  %v924_v4 = vld [vmem:[%s1294_s3 + $0xc] ss:$16 sps:$4 sm:$0xff]   ;;  %v927_v6 = vld [vmem:[%s1294_s3 + $0x8] ss:$16 sps:$4 sm:$0xff]   ;;  %336 = vmatprep.mubr.bf16.mxu0 %v1022_v37  ;;  %379 = vmatprep.mubr.bf16.mxu1 %v1022_v37 }
   0x2   :  { %v1066_v1 = vunpack.c.l.bf16 %v869_v0  ;;  %v1069_v2 = vunpack.c.h.bf16 %v869_v0  ;;  %v922_v3 = vld [vmem:[%s1294_s3 + $0x4] ss:$16 sps:$4 sm:$0xff]   ;;  %v926_v5 = vld [vmem:[%s1294_s3] ss:$16 sps:$4 sm:$0xff]   ;;  %347 = vmatprep.subr.bf16.mxu1 %v924_v4  ;;  %v930_v8 = vld [vmem:[%s1294_s3 + $0x2c] ss:$16 sps:$4 sm:$0xff]  }
   0x3   :  { %304 = vmatprep.subr.bf16.mxu0 %v922_v3  ;;  %v928_v7 = vld [vmem:[%s1294_s3 + $0x24] ss:$16 sps:$4 sm:$0xff]   ;;  %348 = vmatpush1.bf16.msra.mxu1 %v927_v6  ;;  %v932_v17 = vld [vmem:[%s1294_s3 + $0x20] ss:$16 sps:$4 sm:$0xff]   ;;  %v933_v18 = vld [vmem:[%s1294_s3 + $0x28] ss:$16 sps:$4 sm:$0xff]  }
   0x4   :  { %35 = vadd.xlane.f32.xlu0 %v1066_v1  ;;  %305 = vmatpush1.bf16.msra.mxu0 %v926_v5  ;;  %v934_v19 = vld [vmem:[%s1294_s3 + $0x44] ss:$16 sps:$4 sm:$0xff]   ;;  %v936_v20 = vld [vmem:[%s1294_s3 + $0x4c] ss:$16 sps:$4 sm:$0xff]   ;;  %v938_v21 = vld [vmem:[%s1294_s3 + $0x40] ss:$16 sps:$4 sm:$0xff]  }
   0x5   :  { %306 = vmatprep.subr.bf16.mxu0 %v928_v7  ;;  %349 = vmatprep.subr.bf16.mxu1 %v930_v8  ;;  %v939_v22 = vld [vmem:[%s1294_s3 + $0x48] ss:$16 sps:$4 sm:$0xff]   ;;  %v940_v23 = vld [vmem:[%s1294_s3 + $0x64] ss:$16 sps:$4 sm:$0xff]   ;;  %v942_v24 = vld [vmem:[%s1294_s3 + $0x6c] ss:$16 sps:$4 sm:$0xff]  }
   0x6   :  { %v944_v25 = vld [vmem:[%s1294_s3 + $0x60] ss:$16 sps:$4 sm:$0xff]   ;;  %v945_v26 = vld [vmem:[%s1294_s3 + $0x68] ss:$16 sps:$4 sm:$0xff]   ;;  %v946_v27 = vld [vmem:[%s1294_s3 + $0x84] ss:$16 sps:$4 sm:$0xff]  }
   0x7   :  { %350 = vmatpush1.bf16.msra.mxu1 %v933_v18  ;;  %v948_v28 = vld [vmem:[%s1294_s3 + $0x8c] ss:$16 sps:$4 sm:$0xff]   ;;  %v950_v29 = vld [vmem:[%s1294_s3 + $0x80] ss:$16 sps:$4 sm:$0xff]   ;;  %v951_v30 = vld [vmem:[%s1294_s3 + $0x88] ss:$16 sps:$4 sm:$0xff]  }
   0x8   :  { %37 = vadd.xlane.f32.xlu0 %v1069_v2  ;;  %307 = vmatpush1.bf16.msra.mxu0 %v932_v17  ;;  %v952_v31 = vld [vmem:[%s1294_s3 + $0xa4] ss:$16 sps:$4 sm:$0xff]   ;;  %v954_v32 = vld [vmem:[%s1294_s3 + $0xac] ss:$16 sps:$4 sm:$0xff]   ;;  %v956_v33 = vld [vmem:[%s1294_s3 + $0xa0] ss:$16 sps:$4 sm:$0xff]  }
   0x9   :  { %308 = vmatprep.subr.bf16.mxu0 %v934_v19  ;;  %351 = vmatprep.subr.bf16.mxu1 %v936_v20  ;;  %v957_v34 = vld [vmem:[%s1294_s3 + $0xa8] ss:$16 sps:$4 sm:$0xff]   ;;  %v958_v35 = vld [vmem:[%s1294_s3 + $0xc4] ss:$16 sps:$4 sm:$0xff]   ;;  %v960_v36 = vld [vmem:[%s1294_s3 + $0xcc] ss:$16 sps:$4 sm:$0xff]  }
   0xa   :  { %v962_v38 = vld [vmem:[%s1294_s3 + $0xc0] ss:$16 sps:$4 sm:$0xff]   ;;  %v963_v39 = vld [vmem:[%s1294_s3 + $0xc8] ss:$16 sps:$4 sm:$0xff]   ;;  %v964_v40 = vld [vmem:[%s1294_s3 + $0xe4] ss:$16 sps:$4 sm:$0xff]  }
   0xb   :  { %352 = vmatpush1.bf16.msra.mxu1 %v939_v22  ;;  %v966_v41 = vld [vmem:[%s1294_s3 + $0xec] ss:$16 sps:$4 sm:$0xff]   ;;  %v968_v42 = vld [vmem:[%s1294_s3 + $0xe0] ss:$16 sps:$4 sm:$0xff]   ;;  %v969_v43 = vld [vmem:[%s1294_s3 + $0xe8] ss:$16 sps:$4 sm:$0xff]  }
   0xc   :  { %309 = vmatpush1.bf16.msra.mxu0 %v938_v21  ;;  %353 = vmatprep.subr.bf16.mxu1 %v942_v24  ;;  %v970_v44 = vld [vmem:[%s1295_s5 + $0x40] sm:$0xff]   ;;  %v974_v3 = vld [vmem:[%s1295_s5 + $0x48] sm:$0xff]   ;;  %v978_v7 = vld [vmem:[%s1295_s5 + $0x50] sm:$0xff]  }
   0xd   :  { %310 = vmatprep.subr.bf16.mxu0 %v940_v23  ;;  %v971_v45 = vld [vmem:[%s1295_s5 + $0xc0] sm:$0xff]   ;;  %v975_v4 = vld [vmem:[%s1295_s5 + $0xc8] sm:$0xff]   ;;  %v979_v8 = vld [vmem:[%s1295_s5 + $0xd0] sm:$0xff]  }
   0xe   :  { %v797_v54 = vld [vmem:[%s1296_s1] ss:$0 sm:$0xff]  ;;  %v976_v5 = vld [vmem:[%s1295_s5 + $0x8] sm:$0xff]   ;;  %v994_v23 = vld [vmem:[%s1295_s5 + $0x70] sm:$0xff]  }
   0xf   :  { %354 = vmatpush1.bf16.msra.mxu1 %v945_v26  ;;  %v798_v58 = vld [vmem:[%s1297_s2] ss:$0 sm:$0xff]  ;;  %v977_v6 = vld [vmem:[%s1295_s5 + $0x88] sm:$0xff]   ;;  %v995_v24 = vld [vmem:[%s1295_s5 + $0xf0] sm:$0xff]  }
  0x10   :  { %311 = vmatpush1.bf16.msra.mxu0 %v944_v25  ;;  %355 = vmatprep.subr.bf16.mxu1 %v948_v28  ;;  %v972_v62 = vld [vmem:[%s1295_s5] sm:$0xff]   ;;  %v990_v19 = vld [vmem:[%s1295_s5 + $0x68] sm:$0xff]   ;;  %v996_v25 = vld [vmem:[%s1295_s5 + $0x30] sm:$0xff]  }
  0x11   :  { %312 = vmatprep.subr.bf16.mxu0 %v946_v27  ;;  %v973_v63 = vld [vmem:[%s1295_s5 + $0x80] sm:$0xff]   ;;  %v991_v20 = vld [vmem:[%s1295_s5 + $0xe8] sm:$0xff]   ;;  %v997_v26 = vld [vmem:[%s1295_s5 + $0xb0] sm:$0xff]  }
  0x12   :  { %v988_v17 = vld [vmem:[%s1295_s5 + $0x20] sm:$0xff]   ;;  %v992_v21 = vld [vmem:[%s1295_s5 + $0x28] sm:$0xff]   ;;  %v998_v27 = vld [vmem:[%s1295_s5 + $0x78] sm:$0xff]  }
  0x13   :  { %356 = vmatpush1.bf16.msra.mxu1 %v951_v30  ;;  %v989_v18 = vld [vmem:[%s1295_s5 + $0xa0] sm:$0xff]   ;;  %v993_v22 = vld [vmem:[%s1295_s5 + $0xa8] sm:$0xff]   ;;  %v999_v28 = vld [vmem:[%s1295_s5 + $0xf8] sm:$0xff]  }
  0x14   :  { %313 = vmatpush1.bf16.msra.mxu0 %v950_v29  ;;  %357 = vmatprep.subr.bf16.mxu1 %v954_v32  ;;  %v1000_v29 = vld [vmem:[%s1295_s5 + $0x38] sm:$0xff]  }
  0x15   :  { %314 = vmatprep.subr.bf16.mxu0 %v952_v31  ;;  %v1001_v30 = vld [vmem:[%s1295_s5 + $0xb8] sm:$0xff]   ;;  %v124_v31 = vlaneseq }
  0x17   :  { %358 = vmatpush1.bf16.msra.mxu1 %v957_v34  ;;  %v125_v32 = vshrl.u32 %v124_v31, 7 }
  0x18   :  { %315 = vmatpush1.bf16.msra.mxu0 %v956_v33  ;;  %359 = vmatprep.subr.bf16.mxu1 %v960_v36 }
  0x19   :  { %316 = vmatprep.subr.bf16.mxu0 %v958_v35  ;;  %v126_v33 = vsub.s32 0, %v125_v32  ;;  %v134_v34 = vsub.s32 2, %v125_v32  ;;  %v122_v35 = vld [vmem:[%s1298_s4] sm:$0xf]  ;;  %v130_v36 = vsub.s32 1, %v125_v32  ;;  %v138_v37 = vsub.s32 3, %v125_v32 }
  0x1b   :  { %360 = vmatpush1.bf16.msra.mxu1 %v963_v39  ;;  %v135_v39 = vrot.slane %v122_v35, %v134_v34 }
  0x1c   :  { %317 = vmatpush1.bf16.msra.mxu0 %v962_v38  ;;  %361 = vmatprep.subr.bf16.mxu1 %v966_v41  ;;  %v127_v38 = vrot.slane %v122_v35, %v126_v33  ;;  %v139_v41 = vrot.slane %v122_v35, %v138_v37 }
  0x1d   :  { %318 = vmatprep.subr.bf16.mxu0 %v964_v40  ;;  %v131_v40 = vrot.slane %v122_v35, %v130_v36 }
  0x1f   :  { %362 = vmatpush1.bf16.msra.mxu1 %v969_v43 }
  0x20   :  { %319 = vmatpush1.bf16.msra.mxu0 %v968_v42  ;;  %899 = vmatprep.subr.bf16.mxu1 %v971_v45 }
  0x21   :  { %877 = vmatprep.subr.bf16.mxu0 %v970_v44 }
  0x91   :  { %v36_v9 = vpop.xlane.xlu0 %35 }
  0x92   :  { %v40_v10 = vmul.f32 0.0078125, %v36_v9  ;;  %v980_v9 = vld [vmem:[%s1295_s5 + $0x10] sm:$0xff]  }
  0x94   :  { %v1091_v11 = vsub.f32 %v1066_v1, %v40_v10  ;;  %v981_v10 = vld [vmem:[%s1295_s5 + $0x90] sm:$0xff]  }
  0x95   :  { %v38_v12 = vpop.xlane.xlu0 %37 }
  0x96   :  { %v41_v13 = vmul.f32 0.0078125, %v38_v12  ;;  %v44_v14 = vmul.f32 %v1091_v11, %v1091_v11  ;;  %v983_v12 = vld [vmem:[%s1295_s5 + $0xd8] sm:$0xff]  }
  0x98   :  { %v1096_v15 = vsub.f32 %v1069_v2, %v41_v13  ;;  %46 = vadd.xlane.f32.xlu1 %v44_v14  ;;  %v984_v13 = vld [vmem:[%s1295_s5 + $0x18] sm:$0xff]  }
  0x99   :  { %v985_v14 = vld [vmem:[%s1295_s5 + $0x98] sm:$0xff]  }
  0x9a   :  { %v45_v16 = vmul.f32 %v1096_v15, %v1096_v15 }
  0x9c   :  { %48 = vadd.xlane.f32.xlu1 %v45_v16  ;;  %v987_v16 = vld [vmem:[%s1295_s5 + $0xe0] sm:$0xff]  }
 0x125   :  { %v47_v46 = vpop.xlane.xlu1 %46 }
 0x126   :  { %v50_v47 = vmul.f32 0.0078125, %v47_v46 }
 0x128   :  { %v52_v48 = vadd.f32 1e-05, %v50_v47 }
 0x129   :  { %v49_v49 = vpop.xlane.xlu1 %48 }
 0x12a   :  { %1002 = vrsqrt.f32 %v52_v48  ;;  %v51_v50 = vmul.f32 0.0078125, %v49_v49 }
 0x12c   :  { %v53_v51 = vadd.f32 1e-05, %v51_v50 }
 0x12e   :  { %1004 = vrsqrt.f32 %v53_v51 }
 0x134   :  { %v1003_v52 = vpop.eup %1002 }
 0x135   :  { %v56_v53 = vmul.f32 %v1003_v52, %v1091_v11  ;;  %v982_v11 = vld [vmem:[%s1295_s5 + $0x58] sm:$0xff]  }
 0x137   :  { %v65_v57 = vmul.f32 %v797_v54, %v56_v53 }
 0x138   :  { %v1005_v55 = vpop.eup %1004 }
 0x139   :  { %v57_v56 = vmul.f32 %v1005_v55, %v1096_v15  ;;  %v74_v60 = vadd.f32 %v798_v58, %v65_v57  ;;  %v986_v15 = vld [vmem:[%s1295_s5 + $0x60] sm:$0xff]  }
 0x13b   :  { %v66_v59 = vmul.f32 %v797_v54, %v57_v56 }
 0x13d   :  { %v75_v61 = vadd.f32 %v798_v58, %v66_v59 }
 0x13f   :  { %v76_v0 = vpack.c.bf16 %v75_v61, %v74_v60 }
 0x141   :  { %337 = vmatmul.mubr.bf16.vlgmr.msra.gmra.mrb[0].mxu0 %v76_v0  ;;  %380 = vmatmul.mubr.bf16.vlgmr.msra.gmra.mrb[0].mxu1 %v76_v0 }
 0x142   :  { %878 = vmatpush3.bf16.msra.mxu0 %v972_v62  ;;  %900 = vmatpush3.bf16.msra.mxu1 %v973_v63 }
 0x143   :  { %879 = vmatprep.subr.bf16.mxu0 %v974_v3  ;;  %901 = vmatprep.subr.bf16.mxu1 %v975_v4 }
 0x146   :  { %880 = vmatpush3.bf16.msra.mxu0 %v976_v5  ;;  %902 = vmatpush3.bf16.msra.mxu1 %v977_v6 }
 0x147   :  { %881 = vmatprep.subr.bf16.mxu0 %v978_v7  ;;  %903 = vmatprep.subr.bf16.mxu1 %v979_v8 }
 0x14a   :  { %882 = vmatpush3.bf16.msra.mxu0 %v980_v9  ;;  %904 = vmatpush3.bf16.msra.mxu1 %v981_v10 }
 0x14b   :  { %883 = vmatprep.subr.bf16.mxu0 %v982_v11  ;;  %905 = vmatprep.subr.bf16.mxu1 %v983_v12 }
 0x14e   :  { %884 = vmatpush3.bf16.msra.mxu0 %v984_v13  ;;  %906 = vmatpush3.bf16.msra.mxu1 %v985_v14 }
 0x14f   :  { %885 = vmatprep.subr.bf16.mxu0 %v986_v15  ;;  %907 = vmatprep.subr.bf16.mxu1 %v987_v16 }
 0x152   :  { %886 = vmatpush3.bf16.msra.mxu0 %v988_v17  ;;  %908 = vmatpush3.bf16.msra.mxu1 %v989_v18 }
 0x153   :  { %887 = vmatprep.subr.bf16.mxu0 %v990_v19  ;;  %909 = vmatprep.subr.bf16.mxu1 %v991_v20 }
 0x156   :  { %888 = vmatpush3.bf16.msra.mxu0 %v992_v21  ;;  %910 = vmatpush3.bf16.msra.mxu1 %v993_v22 }
 0x157   :  { %889 = vmatprep.subr.bf16.mxu0 %v994_v23  ;;  %911 = vmatprep.subr.bf16.mxu1 %v995_v24 }
 0x15a   :  { %890 = vmatpush3.bf16.msra.mxu0 %v996_v25  ;;  %912 = vmatpush3.bf16.msra.mxu1 %v997_v26 }
 0x15b   :  { %891 = vmatprep.subr.bf16.mxu0 %v998_v27  ;;  %913 = vmatprep.subr.bf16.mxu1 %v999_v28 }
 0x15e   :  { %892 = vmatpush3.bf16.msra.mxu0 %v1000_v29  ;;  %914 = vmatpush3.bf16.msra.mxu1 %v1001_v30 }
 0x214   :  { %v338_v42 = vpop.f32.mrb[0].mxu0  ;;  %v381_v43 = vpop.f32.mrb[0].mxu1 }
 0x215   :  { %v339_v44 = vadd.f32 %v338_v42, %v127_v38  ;;  %v382_v45 = vadd.f32 %v381_v43, %v135_v39  ;;  %v340_v46 = vpop.f32.mrb[1].mxu0  ;;  %v383_v47 = vpop.f32.mrb[1].mxu1 }
 0x216   :  { %v341_v48 = vadd.f32 %v340_v46, %v131_v40  ;;  %v384_v49 = vadd.f32 %v383_v47, %v139_v41  ;;  %v342_v50 = vpop.f32.mrb[2].mxu0  ;;  %v385_v51 = vpop.f32.mrb[2].mxu1 }
 0x217   :  { %v398_v52 = vmul.f32 0.70710677, %v339_v44  ;;  %v400_v53 = vmul.f32 0.70710677, %v382_v45  ;;  %v343_v56 = vadd.f32 %v342_v50, %v127_v38  ;;  %v386_v57 = vadd.f32 %v385_v51, %v135_v39  ;;  %v344_v58 = vpop.f32.mrb[3].mxu0  ;;  %v387_v59 = vpop.f32.mrb[3].mxu1 }
 0x218   :  { %v399_v54 = vmul.f32 0.70710677, %v341_v48  ;;  %v401_v55 = vmul.f32 0.70710677, %v384_v49  ;;  %v345_v60 = vadd.f32 %v344_v58, %v131_v40  ;;  %v388_v61 = vadd.f32 %v387_v59, %v139_v41 }
 0x219   :  { %1006 = verf.f32 %v398_v52  ;;  %v402_v62 = vmul.f32 0.70710677, %v343_v56  ;;  %v404_v63 = vmul.f32 0.70710677, %v386_v57  ;;  %v390_v10 = vmul.f32 0.5, %v339_v44 }
 0x21a   :  { %1008 = verf.f32 %v400_v53  ;;  %v403_v0 = vmul.f32 0.70710677, %v345_v60  ;;  %v405_v3 = vmul.f32 0.70710677, %v388_v61  ;;  %v392_v11 = vmul.f32 0.5, %v382_v45 }
 0x21b   :  { %1010 = verf.f32 %v399_v54  ;;  %v391_v14 = vmul.f32 0.5, %v341_v48  ;;  %v394_v16 = vmul.f32 0.5, %v343_v56  ;;  %v393_v19 = vmul.f32 0.5, %v384_v49  ;;  %v799_v44 = vld [vmem:[%s1299_s6] ss:$0 sm:$0xff] }
 0x21c   :  { %1012 = verf.f32 %v401_v55  ;;  %v396_v21 = vmul.f32 0.5, %v386_v57  ;;  %v395_v26 = vmul.f32 0.5, %v345_v60  ;;  %v397_v30 = vmul.f32 0.5, %v388_v61 }
 0x21d   :  { %1014 = verf.f32 %v402_v62  ;;  %v85_v52 = vadd.f32 %v1066_v1, %v799_v44  ;;  %v86_v54 = vadd.f32 %v1069_v2, %v799_v44 }
 0x21e   :  { %1016 = verf.f32 %v404_v63 }
 0x21f   :  { %1018 = verf.f32 %v403_v0 }
 0x220   :  { %1020 = verf.f32 %v405_v3 }
 0x223   :  { %v1007_v4 = vpop.eup %1006 }
 0x224   :  { %v1009_v5 = vpop.eup %1008  ;;  %v414_v8 = vadd.f32 1.0, %v1007_v4 }
 0x225   :  { %v1011_v6 = vpop.eup %1010  ;;  %v416_v12 = vadd.f32 1.0, %v1009_v5 }
 0x226   :  { %v1013_v7 = vpop.eup %1012  ;;  %v415_v15 = vadd.f32 1.0, %v1011_v6  ;;  %v422_v24 = vmul.f32 %v414_v8, %v390_v10 }
 0x227   :  { %v1015_v9 = vpop.eup %1014  ;;  %v417_v20 = vadd.f32 1.0, %v1013_v7  ;;  %v424_v28 = vmul.f32 %v416_v12, %v392_v11 }
 0x228   :  { %v1017_v13 = vpop.eup %1016  ;;  %v418_v17 = vadd.f32 1.0, %v1015_v9  ;;  %v423_v32 = vmul.f32 %v415_v15, %v391_v14 }
 0x229   :  { %v1019_v18 = vpop.eup %1018  ;;  %v420_v22 = vadd.f32 1.0, %v1017_v13  ;;  %v425_v35 = vmul.f32 %v417_v20, %v393_v19 }
 0x22a   :  { %v1021_v23 = vpop.eup %1020  ;;  %v426_v25 = vmul.f32 %v418_v17, %v394_v16  ;;  %v419_v27 = vadd.f32 1.0, %v1019_v18 }
 0x22b   :  { %v428_v29 = vmul.f32 %v420_v22, %v396_v21  ;;  %v421_v31 = vadd.f32 1.0, %v1021_v23 }
 0x22c   :  { %v432_v33 = vpack.c.bf16 %v426_v25, %v422_v24  ;;  %v427_v34 = vmul.f32 %v419_v27, %v395_v26 }
 0x22d   :  { %v434_v36 = vpack.c.bf16 %v428_v29, %v424_v28  ;;  %v429_v37 = vmul.f32 %v421_v31, %v397_v30 }
 0x22e   :  { %v433_v38 = vpack.c.bf16 %v427_v34, %v423_v32 }
 0x22f   :  { %v435_v39 = vpack.c.bf16 %v429_v37, %v425_v35 }
 0x230   :  { %724 = vmatprep.mubr.bf16.mxu0 %v433_v38 }
 0x231   :  { %765 = vmatprep.mubr.bf16.mxu1 %v435_v39  ;;  %725 = vmatmul.mubr.bf16.vlgmr.msra.gmra.mrb[4].mxu0 %v432_v33 }
 0x232   :  { %766 = vmatmul.mubr.bf16.vlgmr.msra.gmra.mrb[4].mxu1 %v434_v36 }
 0x304   :  { %v893_v40 = vpop.f32.mrb[4].mxu0 }
 0x305   :  { %v915_v41 = vpop.f32.mrb[4].mxu1  ;;  %v894_v42 = vpop.f32.mrb[5].mxu0 }
 0x306   :  { %v895_v43 = vadd.f32 %v894_v42, %v893_v40  ;;  %v916_v45 = vpop.f32.mrb[5].mxu1  ;;  %v896_v46 = vpop.f32.mrb[6].mxu0 }
 0x307   :  { %v917_v47 = vadd.f32 %v916_v45, %v915_v41  ;;  %v918_v48 = vpop.f32.mrb[6].mxu1  ;;  %v897_v49 = vpop.f32.mrb[7].mxu0 }
 0x308   :  { %v898_v50 = vadd.f32 %v897_v49, %v896_v46  ;;  %v919_v51 = vpop.f32.mrb[7].mxu1 }
 0x309   :  { %v768_v53 = vadd.f32 %v917_v47, %v895_v43  ;;  %v920_v55 = vadd.f32 %v919_v51, %v918_v48 }
 0x30b   :  { %v771_v56 = vadd.f32 %v920_v55, %v898_v50  ;;  %v774_v57 = vadd.f32 %v768_v53, %v85_v52 }
 0x30d   :  { %v775_v58 = vadd.f32 %v771_v56, %v86_v54 }
 0x30f   :  { %v875_v59 = vpack.c.bf16 %v775_v58, %v774_v57 }
 0x311   :  { %876 = vst [vmem:[%s1300_s7] sm:$0xff] %v875_v59  }

</bundles_post_ra>
